<compile_context>
chip_gen: v7x
topology: tpu7x:2x2x1
jax: 0.10.0
libtpu: 0.0.40
codegen_flags: <defaults>
</compile_context>

<pallas_src>
import functools
import math

import jax
import jax.numpy as jnp
from jax.experimental import pallas as pl
from jax.experimental.pallas import tpu as pltpu

BN_EPS = 1e-5          # PyTorch BatchNorm2d default
CONV_K = 5             # fixed 5x5 kernels in mk_conv_bn_relu_pool


def _vmem_limit_bytes():
    """Scoped-VMEM budget derived per TPU generation (fallback: 32 MiB)."""
    try:
        cap = int(pltpu.get_tpu_info().vmem_capacity_bytes)
        return max(16 * 1024 * 1024, min(int(cap * 0.45), 96 * 1024 * 1024))
    except Exception:  # non-TPU backend / interpret mode
        return 32 * 1024 * 1024


VMEM_LIMIT = _vmem_limit_bytes()


# ----------------------------------------------------------------------------
# Pallas kernels
# ----------------------------------------------------------------------------
def _conv_stats_kernel(xp_ref, w_ref, y_ref, st_ref, *, taps, oh, ow):
    """Per-image 5x5 'valid' conv as ONE big-K matmul + BN partial statistics.

    xp_ref : (1, HPP, WP, CI)  bf16 phase-decomposed image (one sample, VMEM)
    w_ref  : (25*CI, CO)       bf16 weight, rows ordered (kh, kw, ci)
    y_ref  : (1, OH*OW, CO)    bf16 conv output
    st_ref : (1, 2, CO)        f32 [per-image mean, centered sum-of-squares]
    """
    # im2col assembled in VMEM: 25 static window slices, concatenated on the
    # lane axis -> contraction K = 25*CI (single MXU matmul, no per-tap K=8).
    patches = [xp_ref[0, pl.ds(r0, oh), pl.ds(c0, ow), :] for (r0, c0) in taps]
    a = jnp.concatenate(patches, axis=-1)                 # (OH, OW, 25*CI) bf16
    a2 = a.reshape(oh * ow, a.shape[-1])                  # single reshape (not 25)
    y = jnp.dot(a2, w_ref[...], preferred_element_type=jnp.float32)  # (OH*OW, CO)
    y_ref[0] = y.astype(y_ref.dtype)

    # Per-image BN partials in f32: mean and CENTERED sum of squares
    # (Welford/Chan-combinable, avoids E[x^2]-E[x]^2 cancellation).
    inv_cnt = 1.0 / float(oh * ow)
    m = jnp.sum(y, axis=0, keepdims=True) * inv_cnt       # (1, CO)
    d = y - m
    ss = jnp.sum(d * d, axis=0, keepdims=True)            # (1, CO)
    st_ref[0] = jnp.concatenate([m, ss], axis=0)          # (2, CO)


def _bn_relu_pool_kernel(y_ref, a_ref, b_ref, o_ref):
    """Fused BatchNorm-apply + ReLU + 2x2/2 max-pool (per image, no strided ds).

    y_ref: (1, OH, OW, CO) bf16; a_ref/b_ref: (1, CO) f32 folded BN affine;
    o_ref: (1, PH, PW, CO) bf16 with PH = OH//2, PW = OW//2 (floor semantics).
    """
    ph, pw, co = o_ref.shape[1], o_ref.shape[2], o_ref.shape[3]
    v = y_ref[0, pl.ds(0, 2 * ph), pl.ds(0, 2 * pw), :].astype(jnp.float32)
    v = jnp.maximum(v * a_ref[...] + b_ref[...], 0.0)     # (2PH, 2PW, CO)
    # column-pair max: split the sublane (width) axis, then select/ max
    v = v.reshape(2 * ph, pw, 2, co)
    v = jnp.maximum(v[:, :, 0, :], v[:, :, 1, :])          # (2PH, PW, CO)
    # row-pair max: split the leading (major) axis - effectively free
    v = v.reshape(ph, 2, pw, co)
    v = jnp.maximum(v[:, 0], v[:, 1])                      # (PH, PW, CO)
    o_ref[0] = v.astype(o_ref.dtype)


def _head_kernel(h_ref, w_ref, b_ref, eps_ref, loc_ref, scale_ref, z_ref,
                 acc_ref, *, z_dim):
    """K-tiled fused matmul for [fc_loc | fc_scale], softplus(+1e-7), rsample."""
    kk = pl.program_id(0)

    @pl.when(kk == 0)
    def _init():
        acc_ref[...] = jnp.zeros_like(acc_ref)

    acc_ref[...] += jnp.dot(h_ref[...], w_ref[...],
                            preferred_element_type=jnp.float32)

    @pl.when(kk == pl.num_programs(0) - 1)
    def _finalize():
        y = acc_ref[...] + b_ref[...]
        loc = y[:, :z_dim]
        s_pre = y[:, z_dim:2 * z_dim]
        # PyTorch Softplus (beta=1, threshold=20), then + 1e-7.
        sp = jnp.where(s_pre > 20.0, s_pre,
                       jnp.log1p(jnp.exp(jnp.minimum(s_pre, 20.0))))
        scale = sp + 1e-7
        loc_ref[...] = loc
        scale_ref[...] = scale
        # Normal(loc, scale).rsample() == loc + scale * eps, eps ~ N(0, 1)
        z_ref[...] = loc + scale * eps_ref[...]


# ----------------------------------------------------------------------------
# Stage / head wrappers (grid + BlockSpecs)
# ----------------------------------------------------------------------------
def _phase_decompose(x, stride):
    """(N, H, W, C) -> (N, S*S*HP, WP, C): every conv tap at any conv_stride
    becomes a contiguous static window (no HBM data expansion)."""
    n, h, w, c = x.shape
    s = stride
    if s == 1:
        return x, h, w
    hp, wp = -(-h // s), -(-w // s)
    xpad = jnp.pad(x, ((0, 0), (0, hp * s - h), (0, wp * s - w), (0, 0)))
    xp = xpad.reshape(n, hp, s, wp, s, c).transpose(0, 2, 4, 1, 3, 5)
    return xp.reshape(n, s * s * hp, wp, c), hp, wp


def _conv_bn_relu_pool_stage(x, w_mat, gamma, beta, stride, k=CONV_K):
    """conv5(no bias) -> BN(train batch stats) -> ReLU -> maxpool(2,2), as two
    batch-gridded Pallas passes ("parallel" axis)."""
    n, h, w, ci = x.shape
    co = w_mat.shape[-1]
    assert w_mat.shape[0] == k * k * ci
    s = stride
    oh = (h - k) // s + 1
    ow = (w - k) // s + 1
    ph, pw = oh // 2, ow // 2
    assert oh >= 2 and ow >= 2, "stage output too small for 2x2 max-pool"

    xp, hp, _ = _phase_decompose(x, s)
    taps = tuple(
        (((kh % s) * s + (kw % s)) * hp + kh // s, kw // s)
        for kh in range(k) for kw in range(k))

    kern_a = functools.partial(_conv_stats_kernel, taps=taps, oh=oh, ow=ow)
    y, stats = pl.pallas_call(
        kern_a,
        grid=(n,),
        in_specs=[
            pl.BlockSpec((1,) + xp.shape[1:], lambda i: (i, 0, 0, 0)),
            pl.BlockSpec(w_mat.shape, lambda i: (0, 0)),
        ],
        out_specs=(
            pl.BlockSpec((1, oh * ow, co), lambda i: (i, 0, 0)),
            pl.BlockSpec((1, 2, co), lambda i: (i, 0, 0)),
        ),
        out_shape=(
            jax.ShapeDtypeStruct((n, oh * ow, co), jnp.bfloat16),
            jax.ShapeDtypeStruct((n, 2, co), jnp.float32),
        ),
        compiler_params=pltpu.CompilerParams(
            dimension_semantics=("parallel",),
            vmem_limit_bytes=VMEM_LIMIT),
    )(xp, w_mat)

    # Welford/Chan combine of per-image (mean, centered sumsq) into the GLOBAL
    # training-mode batch statistics (biased variance, eps=1e-5 as in PyTorch),
    # folded into a single per-channel affine y*A + B.  Tiny f32 glue reduction.
    pix = float(oh * ow)
    m_i = stats[:, 0, :]                                  # (N, CO)
    ss_i = stats[:, 1, :]
    mean = jnp.mean(m_i, axis=0)
    var = (jnp.sum(ss_i, axis=0)
           + pix * jnp.sum((m_i - mean) ** 2, axis=0)) / (n * pix)
    inv = gamma * jax.lax.rsqrt(var + BN_EPS)
    bn_a = inv.reshape(1, co).astype(jnp.float32)
    bn_b = (beta - mean * inv).reshape(1, co).astype(jnp.float32)

    y4 = y.reshape(n, oh, ow, co)                         # free reinterpretation
    pooled = pl.pallas_call(
        _bn_relu_pool_kernel,
        grid=(n,),
        in_specs=[
            pl.BlockSpec((1, oh, ow, co), lambda i: (i, 0, 0, 0)),
            pl.BlockSpec((1, co), lambda i: (0, 0)),
            pl.BlockSpec((1, co), lambda i: (0, 0)),
        ],
        out_specs=pl.BlockSpec((1, ph, pw, co), lambda i: (i, 0, 0, 0)),
        out_shape=jax.ShapeDtypeStruct((n, ph, pw, co), jnp.bfloat16),
        compiler_params=pltpu.CompilerParams(
            dimension_semantics=("parallel",),
            vmem_limit_bytes=VMEM_LIMIT),
    )(y4, bn_a, bn_b)
    return pooled


def _head(hidden, w_head, b_head, eps, z_dim, *, k_tile=512):
    """Fused [fc_loc|fc_scale] matmul + softplus + rsample, K-tiled so the
    (flat_dim, 128) weight never has to be VMEM-resident all at once."""
    n, flat = hidden.shape
    hw = w_head.shape[1]
    if flat <= k_tile:
        tk, kt = flat, 1
    else:
        tk = k_tile                                       # multiple of 128
        pad = (-flat) % tk
        if pad:
            hidden = jnp.pad(hidden, ((0, 0), (0, pad)))
            w_head = jnp.pad(w_head, ((0, pad), (0, 0)))
        kt = (flat + pad) // tk

    kern = functools.partial(_head_kernel, z_dim=z_dim)
    return pl.pallas_call(
        kern,
        grid=(kt,),
        in_specs=[
            pl.BlockSpec((n, tk), lambda kk: (0, kk)),
            pl.BlockSpec((tk, hw), lambda kk: (kk, 0)),
            pl.BlockSpec((1, hw), lambda kk: (0, 0)),
            pl.BlockSpec((n, z_dim), lambda kk: (0, 0)),
        ],
        out_specs=(
            pl.BlockSpec((n, z_dim), lambda kk: (0, 0)),
            pl.BlockSpec((n, z_dim), lambda kk: (0, 0)),
            pl.BlockSpec((n, z_dim), lambda kk: (0, 0)),
        ),
        out_shape=(
            jax.ShapeDtypeStruct((n, z_dim), jnp.float32),   # loc
            jax.ShapeDtypeStruct((n, z_dim), jnp.float32),   # scale
            jax.ShapeDtypeStruct((n, z_dim), jnp.float32),   # rsample
        ),
        scratch_shapes=[pltpu.VMEM((n, hw), jnp.float32)],
        compiler_params=pltpu.CompilerParams(
            dimension_semantics=("arbitrary",),
            vmem_limit_bytes=VMEM_LIMIT),
    )(hidden, w_head, b_head, eps)


# ----------------------------------------------------------------------------
# Parameters and full forward pass
# ----------------------------------------------------------------------------
def stage_dims(i_h, i_w, conv_stride, k=CONV_K):
    oh1 = (i_h - k) // conv_stride + 1
    ow1 = (i_w - k) // conv_stride + 1
    ph1, pw1 = oh1 // 2, ow1 // 2
    oh2 = (ph1 - k) // conv_stride + 1
    ow2 = (pw1 - k) // conv_stride + 1
    ph2, pw2 = oh2 // 2, ow2 // 2
    return ph1, pw1, ph2, pw2


def compute_flat_dim(i_h, i_w, conv_stride, k=CONV_K, c2=64):
    ph2, pw2 = stage_dims(i_h, i_w, conv_stride, k)[2:]
    return c2 * ph2 * pw2


def _xavier_uniform(key, shape, fan_in, fan_out):
    bound = math.sqrt(6.0 / (fan_in + fan_out))
    return jax.random.uniform(key, shape, jnp.float32, -bound, bound)


def init_raw_params(key, i_channel, z_dim, flat_dim, k=CONV_K, c1=32, c2=64):
    ks = jax.random.split(key, 4)
    return dict(
        w1=_xavier_uniform(ks[0], (k, k, i_channel, c1),
                           i_channel * k * k, c1 * k * k),
        g1=jnp.ones((c1,), jnp.float32), b1=jnp.zeros((c1,), jnp.float32),
        w2=_xavier_uniform(ks[1], (k, k, c1, c2), c1 * k * k, c2 * k * k),
        g2=jnp.ones((c2,), jnp.float32), b2=jnp.zeros((c2,), jnp.float32),
        w_loc=_xavier_uniform(ks[2], (flat_dim, z_dim), flat_dim, z_dim),
        b_loc=jnp.zeros((z_dim,), jnp.float32),
        w_scale=_xavier_uniform(ks[3], (flat_dim, z_dim), flat_dim, z_dim),
        b_scale=jnp.zeros((z_dim,), jnp.float32),
    )


def pack_params(raw, i_h, i_w, conv_stride, k=CONV_K):
    """Pack raw f32 params into kernel layouts: bf16 conv weights with the 25
    taps folded into the contraction rows (kh, kw, ci), and head weight rows
    permuted from the torch NCHW flatten to our NHWC flatten (so no runtime
    transpose of the activations is needed)."""
    ci, c1 = raw["w1"].shape[2], raw["w1"].shape[3]
    c2 = raw["w2"].shape[3]
    z_dim = raw["w_loc"].shape[1]
    ph2, pw2 = stage_dims(i_h, i_w, conv_stride, k)[2:]

    w1_mat = raw["w1"].reshape(k * k * ci, c1).astype(jnp.bfloat16)
    w2_mat = raw["w2"].reshape(k * k * c1, c2).astype(jnp.bfloat16)

    def reorder_rows(wm):            # torch (c, h, w) flat order -> (h, w, c)
        z = wm.shape[1]
        return wm.reshape(c2, ph2, pw2, z).transpose(1, 2, 0, 3).reshape(-1, z)

    flat = c2 * ph2 * pw2
    head_w = max(128, ((2 * z_dim + 127) // 128) * 128)
    w_head = jnp.zeros((flat, head_w), jnp.float32)
    w_head = w_head.at[:, :z_dim].set(reorder_rows(raw["w_loc"]))
    w_head = w_head.at[:, z_dim:2 * z_dim].set(reorder_rows(raw["w_scale"]))
    b_head = jnp.zeros((1, head_w), jnp.float32)
    b_head = b_head.at[0, :z_dim].set(raw["b_loc"])
    b_head = b_head.at[0, z_dim:2 * z_dim].set(raw["b_scale"])

    return dict(
        w1_mat=w1_mat, g1=raw["g1"], b1=raw["b1"],
        w2_mat=w2_mat, g2=raw["g2"], b2=raw["b2"],
        w_head=w_head.astype(jnp.bfloat16), b_head=b_head,
    )


def ls_encoder_forward(img_nchw, params, conv_stride, z_dim, sample_key):
    n = img_nchw.shape[0]
    # NCHW -> NHWC, cast to bf16 ONCE (activations carried in bf16 end to end).
    x = jnp.transpose(img_nchw, (0, 2, 3, 1)).astype(jnp.bfloat16)

    p1 = _conv_bn_relu_pool_stage(x, params["w1_mat"], params["g1"],
                                  params["b1"], conv_stride)
    p2 = _conv_bn_relu_pool_stage(p1, params["w2_mat"], params["g2"],
                                  params["b2"], conv_stride)

    # NHWC flatten (free); head weight rows were permuted at pack time to match
    # the torch NCHW .view(-1, flat_dim) semantics.
    hidden = p2.reshape(n, -1)

    eps = jax.random.normal(sample_key, (n, z_dim), jnp.float32)
    loc, scale, zd_q = _head(hidden, params["w_head"], params["b_head"],
                             eps, z_dim)
    # TODO(synk): torch.distributions.Normal has no JAX-array equivalent; we
    # return its (loc, scale) parameters instead of a distribution object, and
    # BatchNorm running-stats buffers are not updated (training-mode batch
    # statistics only, as in the PyTorch training forward).
    return (loc, scale), zd_q


# ----------------------------------------------------------------------------
# Pure-JAX/XLA reference of the same forward pass (for correctness check)
# ----------------------------------------------------------------------------
def reference_forward(img_nchw, raw, conv_stride, eps):
    x = jnp.transpose(img_nchw, (0, 2, 3, 1)).astype(jnp.float32)

    def stage(h, w_hwio, gamma, beta):
        y = jax.lax.conv_general_dilated(
            h, w_hwio, (conv_stride, conv_stride), "VALID",
            dimension_numbers=("NHWC", "HWIO", "NHWC"))
        mean = jnp.mean(y, axis=(0, 1, 2))
        var = jnp.mean((y - mean) ** 2, axis=(0, 1, 2))
        y = (y - mean) * jax.lax.rsqrt(var + BN_EPS) * gamma + beta
        y = jnp.maximum(y, 0.0)
        nb, oh, ow, c = y.shape
        ph, pw = oh // 2, ow // 2
        y = y[:, :2 * ph, :2 * pw, :].reshape(nb, ph, 2, pw, 2, c)
        return jnp.max(y, axis=(2, 4))

    h1 = stage(x, raw["w1"], raw["g1"], raw["b1"])
    h2 = stage(h1, raw["w2"], raw["g2"], raw["b2"])
    hidden = jnp.transpose(h2, (0, 3, 1, 2)).reshape(img_nchw.shape[0], -1)
    loc = hidden @ raw["w_loc"] + raw["b_loc"]
    scale = jax.nn.softplus(hidden @ raw["w_scale"] + raw["b_scale"]) + 1e-7
    return loc, scale, loc + scale * eps


if __name__ == "__main__":
    batch, i_channel, i_h, i_w = 2, 3, 16, 16
    conv_stride = 1
    z_dim = 8

    flat_dim = compute_flat_dim(i_h, i_w, conv_stride)      # = 64 for 16x16
    key = jax.random.PRNGKey(0)
    k_img, k_par, k_smp = jax.random.split(key, 3)

    img = jax.random.normal(k_img, (batch, i_channel, i_h, i_w), jnp.float32)
    raw = init_raw_params(k_par, i_channel, z_dim, flat_dim)
    params = pack_params(raw, i_h, i_w, conv_stride)

    (loc, scale), zd_q = ls_encoder_forward(img, params, conv_stride, z_dim, k_smp)
    jax.block_until_ready((loc, scale, zd_q))

    assert loc.shape == (batch, z_dim)
    assert scale.shape == (batch, z_dim)
    assert zd_q.shape == (batch, z_dim)
    assert bool(jnp.all(scale > 0.0))
    assert bool(jnp.all(jnp.isfinite(loc) & jnp.isfinite(scale) & jnp.isfinite(zd_q)))

    # Numerical check vs. the pure-JAX reference (generous tolerance: conv
    # matmuls and inter-stage activations are bf16 with f32 accumulation).
    eps = jax.random.normal(k_smp, (batch, z_dim), jnp.float32)
    loc_r, scale_r, zd_r = reference_forward(img, raw, conv_stride, eps)

    def _close(a, b, tol=0.1):
        return float(jnp.max(jnp.abs(a - b))) <= tol * (1.0 + float(jnp.max(jnp.abs(b))))

    assert _close(loc, loc_r) and _close(scale, scale_r) and _close(zd_q, zd_r)

    print("KERNEL_OK")
</pallas_src>

<mosaic_0001>
module attributes {stable_mosaic.version = 11 : i64} {
  func.func @_conv_stats_kernel(%arg0: i32, %arg1: memref<1x16x16x3xbf16, #tpu.memory_space<vmem>>, %arg2: memref<75x32xbf16, #tpu.memory_space<vmem>>, %arg3: memref<1x144x32xbf16, #tpu.memory_space<vmem>>, %arg4: memref<1x2x32xf32, #tpu.memory_space<vmem>>) attributes {dimension_semantics = [#tpu.dimension_semantics<parallel>], iteration_bounds = array<i64: 2>, scalar_prefetch = 0 : i64, scratch_operands = 0 : i64, tpu.core_type = #tpu.core_type<tc>, window_params = [{transform_indices = @transform_0, window_bounds = array<i64: 1, 16, 16, 3>}, {pipeline_mode = #tpu.pipeline_mode<synchronous>, transform_indices = @transform_1, window_bounds = array<i64: 75, 32>}, {transform_indices = @transform_2, window_bounds = array<i64: 1, 144, 32>}, {transform_indices = @transform_3, window_bounds = array<i64: 1, 2, 32>}]} {
    %c0 = arith.constant 0 : index
    %c0_0 = arith.constant 0 : index
    %c0_1 = arith.constant 0 : index
    %c0_2 = arith.constant 0 : index
    %0 = vector.load %arg1[%c0, %c0_0, %c0_1, %c0_2] : memref<1x16x16x3xbf16, #tpu.memory_space<vmem>>, vector<1x12x12x3xbf16>
    %1 = vector.shape_cast %0 : vector<1x12x12x3xbf16> to vector<12x12x3xbf16>
    %c0_3 = arith.constant 0 : index
    %c0_4 = arith.constant 0 : index
    %c1 = arith.constant 1 : index
    %c0_5 = arith.constant 0 : index
    %2 = vector.load %arg1[%c0_3, %c0_4, %c1, %c0_5] : memref<1x16x16x3xbf16, #tpu.memory_space<vmem>>, vector<1x12x12x3xbf16>
    %3 = vector.shape_cast %2 : vector<1x12x12x3xbf16> to vector<12x12x3xbf16>
    %c0_6 = arith.constant 0 : index
    %c0_7 = arith.constant 0 : index
    %c2 = arith.constant 2 : index
    %c0_8 = arith.constant 0 : index
    %4 = vector.load %arg1[%c0_6, %c0_7, %c2, %c0_8] : memref<1x16x16x3xbf16, #tpu.memory_space<vmem>>, vector<1x12x12x3xbf16>
    %5 = vector.shape_cast %4 : vector<1x12x12x3xbf16> to vector<12x12x3xbf16>
    %c0_9 = arith.constant 0 : index
    %c0_10 = arith.constant 0 : index
    %c3 = arith.constant 3 : index
    %c0_11 = arith.constant 0 : index
    %6 = vector.load %arg1[%c0_9, %c0_10, %c3, %c0_11] : memref<1x16x16x3xbf16, #tpu.memory_space<vmem>>, vector<1x12x12x3xbf16>
    %7 = vector.shape_cast %6 : vector<1x12x12x3xbf16> to vector<12x12x3xbf16>
    %c0_12 = arith.constant 0 : index
    %c0_13 = arith.constant 0 : index
    %c4 = arith.constant 4 : index
    %c0_14 = arith.constant 0 : index
    %8 = vector.load %arg1[%c0_12, %c0_13, %c4, %c0_14] : memref<1x16x16x3xbf16, #tpu.memory_space<vmem>>, vector<1x12x12x3xbf16>
    %9 = vector.shape_cast %8 : vector<1x12x12x3xbf16> to vector<12x12x3xbf16>
    %c0_15 = arith.constant 0 : index
    %c1_16 = arith.constant 1 : index
    %c0_17 = arith.constant 0 : index
    %c0_18 = arith.constant 0 : index
    %10 = vector.load %arg1[%c0_15, %c1_16, %c0_17, %c0_18] : memref<1x16x16x3xbf16, #tpu.memory_space<vmem>>, vector<1x12x12x3xbf16>
    %11 = vector.shape_cast %10 : vector<1x12x12x3xbf16> to vector<12x12x3xbf16>
    %c0_19 = arith.constant 0 : index
    %c1_20 = arith.constant 1 : index
    %c1_21 = arith.constant 1 : index
    %c0_22 = arith.constant 0 : index
    %12 = vector.load %arg1[%c0_19, %c1_20, %c1_21, %c0_22] : memref<1x16x16x3xbf16, #tpu.memory_space<vmem>>, vector<1x12x12x3xbf16>
    %13 = vector.shape_cast %12 : vector<1x12x12x3xbf16> to vector<12x12x3xbf16>
    %c0_23 = arith.constant 0 : index
    %c1_24 = arith.constant 1 : index
    %c2_25 = arith.constant 2 : index
    %c0_26 = arith.constant 0 : index
    %14 = vector.load %arg1[%c0_23, %c1_24, %c2_25, %c0_26] : memref<1x16x16x3xbf16, #tpu.memory_space<vmem>>, vector<1x12x12x3xbf16>
    %15 = vector.shape_cast %14 : vector<1x12x12x3xbf16> to vector<12x12x3xbf16>
    %c0_27 = arith.constant 0 : index
    %c1_28 = arith.constant 1 : index
    %c3_29 = arith.constant 3 : index
    %c0_30 = arith.constant 0 : index
    %16 = vector.load %arg1[%c0_27, %c1_28, %c3_29, %c0_30] : memref<1x16x16x3xbf16, #tpu.memory_space<vmem>>, vector<1x12x12x3xbf16>
    %17 = vector.shape_cast %16 : vector<1x12x12x3xbf16> to vector<12x12x3xbf16>
    %c0_31 = arith.constant 0 : index
    %c1_32 = arith.constant 1 : index
    %c4_33 = arith.constant 4 : index
    %c0_34 = arith.constant 0 : index
    %18 = vector.load %arg1[%c0_31, %c1_32, %c4_33, %c0_34] : memref<1x16x16x3xbf16, #tpu.memory_space<vmem>>, vector<1x12x12x3xbf16>
    %19 = vector.shape_cast %18 : vector<1x12x12x3xbf16> to vector<12x12x3xbf16>
    %c0_35 = arith.constant 0 : index
    %c2_36 = arith.constant 2 : index
    %c0_37 = arith.constant 0 : index
    %c0_38 = arith.constant 0 : index
    %20 = vector.load %arg1[%c0_35, %c2_36, %c0_37, %c0_38] : memref<1x16x16x3xbf16, #tpu.memory_space<vmem>>, vector<1x12x12x3xbf16>
    %21 = vector.shape_cast %20 : vector<1x12x12x3xbf16> to vector<12x12x3xbf16>
    %c0_39 = arith.constant 0 : index
    %c2_40 = arith.constant 2 : index
    %c1_41 = arith.constant 1 : index
    %c0_42 = arith.constant 0 : index
    %22 = vector.load %arg1[%c0_39, %c2_40, %c1_41, %c0_42] : memref<1x16x16x3xbf16, #tpu.memory_space<vmem>>, vector<1x12x12x3xbf16>
    %23 = vector.shape_cast %22 : vector<1x12x12x3xbf16> to vector<12x12x3xbf16>
    %c0_43 = arith.constant 0 : index
    %c2_44 = arith.constant 2 : index
    %c2_45 = arith.constant 2 : index
    %c0_46 = arith.constant 0 : index
    %24 = vector.load %arg1[%c0_43, %c2_44, %c2_45, %c0_46] : memref<1x16x16x3xbf16, #tpu.memory_space<vmem>>, vector<1x12x12x3xbf16>
    %25 = vector.shape_cast %24 : vector<1x12x12x3xbf16> to vector<12x12x3xbf16>
    %c0_47 = arith.constant 0 : index
    %c2_48 = arith.constant 2 : index
    %c3_49 = arith.constant 3 : index
    %c0_50 = arith.constant 0 : index
    %26 = vector.load %arg1[%c0_47, %c2_48, %c3_49, %c0_50] : memref<1x16x16x3xbf16, #tpu.memory_space<vmem>>, vector<1x12x12x3xbf16>
    %27 = vector.shape_cast %26 : vector<1x12x12x3xbf16> to vector<12x12x3xbf16>
    %c0_51 = arith.constant 0 : index
    %c2_52 = arith.constant 2 : index
    %c4_53 = arith.constant 4 : index
    %c0_54 = arith.constant 0 : index
    %28 = vector.load %arg1[%c0_51, %c2_52, %c4_53, %c0_54] : memref<1x16x16x3xbf16, #tpu.memory_space<vmem>>, vector<1x12x12x3xbf16>
    %29 = vector.shape_cast %28 : vector<1x12x12x3xbf16> to vector<12x12x3xbf16>
    %c0_55 = arith.constant 0 : index
    %c3_56 = arith.constant 3 : index
    %c0_57 = arith.constant 0 : index
    %c0_58 = arith.constant 0 : index
    %30 = vector.load %arg1[%c0_55, %c3_56, %c0_57, %c0_58] : memref<1x16x16x3xbf16, #tpu.memory_space<vmem>>, vector<1x12x12x3xbf16>
    %31 = vector.shape_cast %30 : vector<1x12x12x3xbf16> to vector<12x12x3xbf16>
    %c0_59 = arith.constant 0 : index
    %c3_60 = arith.constant 3 : index
    %c1_61 = arith.constant 1 : index
    %c0_62 = arith.constant 0 : index
    %32 = vector.load %arg1[%c0_59, %c3_60, %c1_61, %c0_62] : memref<1x16x16x3xbf16, #tpu.memory_space<vmem>>, vector<1x12x12x3xbf16>
    %33 = vector.shape_cast %32 : vector<1x12x12x3xbf16> to vector<12x12x3xbf16>
    %c0_63 = arith.constant 0 : index
    %c3_64 = arith.constant 3 : index
    %c2_65 = arith.constant 2 : index
    %c0_66 = arith.constant 0 : index
    %34 = vector.load %arg1[%c0_63, %c3_64, %c2_65, %c0_66] : memref<1x16x16x3xbf16, #tpu.memory_space<vmem>>, vector<1x12x12x3xbf16>
    %35 = vector.shape_cast %34 : vector<1x12x12x3xbf16> to vector<12x12x3xbf16>
    %c0_67 = arith.constant 0 : index
    %c3_68 = arith.constant 3 : index
    %c3_69 = arith.constant 3 : index
    %c0_70 = arith.constant 0 : index
    %36 = vector.load %arg1[%c0_67, %c3_68, %c3_69, %c0_70] : memref<1x16x16x3xbf16, #tpu.memory_space<vmem>>, vector<1x12x12x3xbf16>
    %37 = vector.shape_cast %36 : vector<1x12x12x3xbf16> to vector<12x12x3xbf16>
    %c0_71 = arith.constant 0 : index
    %c3_72 = arith.constant 3 : index
    %c4_73 = arith.constant 4 : index
    %c0_74 = arith.constant 0 : index
    %38 = vector.load %arg1[%c0_71, %c3_72, %c4_73, %c0_74] : memref<1x16x16x3xbf16, #tpu.memory_space<vmem>>, vector<1x12x12x3xbf16>
    %39 = vector.shape_cast %38 : vector<1x12x12x3xbf16> to vector<12x12x3xbf16>
    %c0_75 = arith.constant 0 : index
    %c4_76 = arith.constant 4 : index
    %c0_77 = arith.constant 0 : index
    %c0_78 = arith.constant 0 : index
    %40 = vector.load %arg1[%c0_75, %c4_76, %c0_77, %c0_78] : memref<1x16x16x3xbf16, #tpu.memory_space<vmem>>, vector<1x12x12x3xbf16>
    %41 = vector.shape_cast %40 : vector<1x12x12x3xbf16> to vector<12x12x3xbf16>
    %c0_79 = arith.constant 0 : index
    %c4_80 = arith.constant 4 : index
    %c1_81 = arith.constant 1 : index
    %c0_82 = arith.constant 0 : index
    %42 = vector.load %arg1[%c0_79, %c4_80, %c1_81, %c0_82] : memref<1x16x16x3xbf16, #tpu.memory_space<vmem>>, vector<1x12x12x3xbf16>
    %43 = vector.shape_cast %42 : vector<1x12x12x3xbf16> to vector<12x12x3xbf16>
    %c0_83 = arith.constant 0 : index
    %c4_84 = arith.constant 4 : index
    %c2_85 = arith.constant 2 : index
    %c0_86 = arith.constant 0 : index
    %44 = vector.load %arg1[%c0_83, %c4_84, %c2_85, %c0_86] : memref<1x16x16x3xbf16, #tpu.memory_space<vmem>>, vector<1x12x12x3xbf16>
    %45 = vector.shape_cast %44 : vector<1x12x12x3xbf16> to vector<12x12x3xbf16>
    %c0_87 = arith.constant 0 : index
    %c4_88 = arith.constant 4 : index
    %c3_89 = arith.constant 3 : index
    %c0_90 = arith.constant 0 : index
    %46 = vector.load %arg1[%c0_87, %c4_88, %c3_89, %c0_90] : memref<1x16x16x3xbf16, #tpu.memory_space<vmem>>, vector<1x12x12x3xbf16>
    %47 = vector.shape_cast %46 : vector<1x12x12x3xbf16> to vector<12x12x3xbf16>
    %c0_91 = arith.constant 0 : index
    %c4_92 = arith.constant 4 : index
    %c4_93 = arith.constant 4 : index
    %c0_94 = arith.constant 0 : index
    %48 = vector.load %arg1[%c0_91, %c4_92, %c4_93, %c0_94] : memref<1x16x16x3xbf16, #tpu.memory_space<vmem>>, vector<1x12x12x3xbf16>
    %49 = vector.shape_cast %48 : vector<1x12x12x3xbf16> to vector<12x12x3xbf16>
    %50 = tpu.concatenate %1, %3, %5, %7, %9, %11, %13, %15, %17, %19, %21, %23, %25, %27, %29, %31 in 2 : vector<12x12x3xbf16>, vector<12x12x3xbf16>, vector<12x12x3xbf16>, vector<12x12x3xbf16>, vector<12x12x3xbf16>, vector<12x12x3xbf16>, vector<12x12x3xbf16>, vector<12x12x3xbf16>, vector<12x12x3xbf16>, vector<12x12x3xbf16>, vector<12x12x3xbf16>, vector<12x12x3xbf16>, vector<12x12x3xbf16>, vector<12x12x3xbf16>, vector<12x12x3xbf16>, vector<12x12x3xbf16> -> vector<12x12x48xbf16>
    %51 = tpu.concatenate %33, %35, %37, %39, %41, %43, %45, %47, %49 in 2 : vector<12x12x3xbf16>, vector<12x12x3xbf16>, vector<12x12x3xbf16>, vector<12x12x3xbf16>, vector<12x12x3xbf16>, vector<12x12x3xbf16>, vector<12x12x3xbf16>, vector<12x12x3xbf16>, vector<12x12x3xbf16> -> vector<12x12x27xbf16>
    %52 = tpu.concatenate %50, %51 in 2 : vector<12x12x48xbf16>, vector<12x12x27xbf16> -> vector<12x12x75xbf16>
    %53 = vector.shape_cast %52 : vector<12x12x75xbf16> to vector<144x75xbf16>
    %c0_95 = arith.constant 0 : index
    %c0_96 = arith.constant 0 : index
    %54 = vector.load %arg2[%c0_95, %c0_96] : memref<75x32xbf16, #tpu.memory_space<vmem>>, vector<75x32xbf16>
    %cst = arith.constant dense<0.000000e+00> : vector<144x32xf32>
    %55 = tpu.matmul %53, %54, %cst {dimension_numbers = #tpu.dot_dimension_numbers<[1], [0], [0], [1], [0, 0, 1, 1], [], []>} : vector<144x75xbf16>, vector<75x32xbf16>, vector<144x32xf32> -> vector<144x32xf32>
    %56 = arith.truncf %55 : vector<144x32xf32> to vector<144x32xbf16>
    %c0_97 = arith.constant 0 : index
    %c0_98 = arith.constant 0 : index
    %c0_99 = arith.constant 0 : index
    %57 = vector.load %arg3[%c0_97, %c0_98, %c0_99] : memref<1x144x32xbf16, #tpu.memory_space<vmem>>, vector<1x144x32xbf16>
    %58 = vector.shape_cast %57 : vector<1x144x32xbf16> to vector<144x32xbf16>
    %59 = vector.shape_cast %56 : vector<144x32xbf16> to vector<1x144x32xbf16>
    tpu.vector_store %arg3[%c0_97, %c0_98, %c0_99], %59 {strides = array<i32>} : memref<1x144x32xbf16, #tpu.memory_space<vmem>>, vector<1x144x32xbf16>,
    %cst_100 = arith.constant dense<0.000000e+00> : vector<32xf32>
    %60 = vector.multi_reduction <add>, %55, %cst_100 [0] : vector<144x32xf32> to vector<32xf32>
    %61 = vector.shape_cast %60 : vector<32xf32> to vector<1x32xf32>
    %cst_101 = arith.constant 0.0069444445 : f32
    %62 = vector.broadcast %cst_101 : f32 to vector<1x32xf32>
    %63 = arith.mulf %61, %62 : vector<1x32xf32>
    %64 = vector.broadcast %63 : vector<1x32xf32> to vector<144x32xf32>
    %65 = arith.subf %55, %64 : vector<144x32xf32>
    %66 = arith.mulf %65, %65 : vector<144x32xf32>
    %cst_102 = arith.constant dense<0.000000e+00> : vector<32xf32>
    %67 = vector.multi_reduction <add>, %66, %cst_102 [0] : vector<144x32xf32> to vector<32xf32>
    %68 = vector.shape_cast %67 : vector<32xf32> to vector<1x32xf32>
    %69 = tpu.concatenate %63, %68 in 0 : vector<1x32xf32>, vector<1x32xf32> -> vector<2x32xf32>
    %c0_103 = arith.constant 0 : index
    %c0_104 = arith.constant 0 : index
    %c0_105 = arith.constant 0 : index
    %70 = vector.load %arg4[%c0_103, %c0_104, %c0_105] : memref<1x2x32xf32, #tpu.memory_space<vmem>>, vector<1x2x32xf32>
    %71 = vector.shape_cast %70 : vector<1x2x32xf32> to vector<2x32xf32>
    %72 = vector.shape_cast %69 : vector<2x32xf32> to vector<1x2x32xf32>
    tpu.vector_store %arg4[%c0_103, %c0_104, %c0_105], %72 {strides = array<i32>} : memref<1x2x32xf32, #tpu.memory_space<vmem>>, vector<1x2x32xf32>,
    return
  }
  func.func @transform_0(%arg0: i32) -> (i32, i32, i32, i32) {
    %c0_i32 = arith.constant 0 : i32
    %c0_i32_0 = arith.constant 0 : i32
    %c0_i32_1 = arith.constant 0 : i32
    %c0_i32_2 = arith.constant 0 : i32
    return %arg0, %c0_i32, %c0_i32_0, %c0_i32_1 : i32, i32, i32, i32
  }
  func.func @transform_1(%arg0: i32) -> (i32, i32) {
    %c0_i32 = arith.constant 0 : i32
    %c0_i32_0 = arith.constant 0 : i32
    %c0_i32_1 = arith.constant 0 : i32
    return %c0_i32, %c0_i32_0 : i32, i32
  }
  func.func @transform_2(%arg0: i32) -> (i32, i32, i32) {
    %c0_i32 = arith.constant 0 : i32
    %c0_i32_0 = arith.constant 0 : i32
    %c0_i32_1 = arith.constant 0 : i32
    return %arg0, %c0_i32, %c0_i32_0 : i32, i32, i32
  }
  func.func @transform_3(%arg0: i32) -> (i32, i32, i32) {
    %c0_i32 = arith.constant 0 : i32
    %c0_i32_0 = arith.constant 0 : i32
    %c0_i32_1 = arith.constant 0 : i32
    return %arg0, %c0_i32, %c0_i32_0 : i32, i32, i32
  }
}

</mosaic_0001>

<bundles_post_ra>
// kernel: tpu_custom_call.1
= control target key start
LH: loop header
LB: loop body
LE: loop exit
PB: predicated region body
PF: predicated region fallthrough
CT: control target
= control target key end

     0   :  { %9 = vsyncpa [#allocation3], 0  ;;  %s8484_s0 = inlined_call_operand.vmem [shape: bf16[2,16,16,3], index: 0, kind: input, shape index: {}]   ;;  %s8485_s1 = inlined_call_operand.vmem [shape: bf16[75,32], index: 1, kind: input, shape index: {}]   ;;  %s8486_s2 = inlined_call_operand.vmem [shape: bf16[2,144,32], index: 2, kind: output, shape index: {0}]   ;;  %s8487_s3 = inlined_call_operand.hbm [shape: f32[2,2,32], index: 3, kind: output, shape index: {1}]  }
   0x1   :  { %11 = vsyncpa [#allocation3 + $0x1], 0  ;;  %s5987_s12 = smov 0   ;;  %s5989_s13 = smov 0  }
   0x2   :  { %s5991_s14 = smov 0   ;;  %s5993_s15 = smov 0  }
   0x3 LB: > { %s6008_s16 = sadd.s32 4294967295, %s5944_s15   ;;  %s4768_s17 = sadd.s32 4294967294, %s5944_s15   ;;  %s5944_s15 = sphi %s5993_s15, %s8766_s15   ;;  %s5940_s14 = sphi %s5991_s14, %s8765_s14   ;;  %s5936_s13 = sphi %s5989_s13, %s8764_s13   ;;  %s5932_s12 = sphi %s5987_s12, %s8763_s12  }
   0x4   : > { %s6012_s18 = sadd.s32 1, %s5944_s15   ;;  %s97_s19 = sadd.s32 1, %s5940_s14 }
   0x5   : > { %s94_s20 = ssub.s32 %s5944_s15, %s6012_s18  ;;  %p107_p0 = scmp.ne.s32.totalorder %s5940_s14, %s5936_s13 }
   0x6   : > { %p95_p1 = scmp.eq.s32.totalorder %s94_s20, 0  ;;  %p108_p2 = scmp.eq.s32.totalorder %s6008_s16, 1 }
   0x7   : > { %p113_p3 = scmp.ne.s32.totalorder %s5936_s13, %s5932_s12  ;;  %p114_p4 = scmp.eq.s32.totalorder %s4768_s17, 1 }
   0x8   : > { %s6023_s21 = scalar_select %p95_p1, %s5940_s14, %s97_s19  }
   0x9   : > { %p6025_p5 = por %p108_p2, %p107_p0  ;;  %p6029_p6 = por %p114_p4, %p113_p3 }
   0xa   : > { %p4771_p7 = scmp.ge.s32.totalorder %s5944_s15, 1  ;;  %p143_p8 = scmp.lt.s32.totalorder %s5944_s15, 3 }
   0xc   : > { %p144_p9 = pnand %p4771_p7, %p143_p8 }
   0xe   : > { %147 = sbr.rel (%p144_p9) target bundleno = 1035 (0x40b), region = 28 }
  0x15   : > { %p172_p10 = scmp.lt.s32.totalorder %s6008_s16, 1  ;;  %s5946_s29 = smov 3   ;;  %vm2191_vm0 = vcmask 23552   ;;  %vm8500_vm1 = vcmask 48128   ;;  %vm8499_vm2 = vcmask 72704   ;;  %vm8498_vm3 = vcmask 97280  }
  0x16   : > { %s5947_s30 = smov 6   ;;  %s5948_s4 = smov 9   ;;  %vm8497_vm4 = vcmask 121856   ;;  %vm8496_vm5 = vcmask 146432   ;;  %vm2353_vm6 = vcmask 171008   ;;  %vm2378_vm7 = vcmask 195584  }
  0x17   : > { %s6037_s24 = scalar_select %p172_p10, %s6008_s16, 1  ;;  %vm4335_vm8 = vcmask 1044480   ;;  %vm4336_vm9 = vcmask 1045504   ;;  %vm8490_vm10 = vmmov 0   ;;  %vm2403_vm11 = vcmask 220160  }
  0x18   : > { %s5949_s5 = smov 12   ;;  %s5950_s6 = smov 15   ;;  %vm2428_vm12 = vcmask 244736   ;;  %vm8495_vm13 = vcmask 269312   ;;  %vm8493_vm14 = vcmask 293888   ;;  %vm8494_vm15 = vcmask 318464  }
  0x19   : > { %s5400_s25 = sshll.u32 %s6037_s24, 7  ;;  %s5951_s7 = smov 18  }
  0x1a   : > { %s6043_s28 = scalar_lea.vmem %s8484_s0, %s5400_s25  ;;  %s5952_s8 = smov 21  }
  0x1b   : > { %v187_v0 = vld [vmem:[%s6043_s28 + $0x10] sm:$0xf]  ;;  %v6047_v1 = vld [vmem:[%s6043_s28 + $0x14] sm:$0x7]  ;;  %v183_v2 = vld [vmem:[%s6043_s28] sm:$0xf] }
  0x1c   : > { %v5078_v3 = vcombine.low %v187_v0, %v6047_v1  ;;  %v6052_v4 = vld [vmem:[%s6043_s28 + $0x4] sm:$0x7]  ;;  %v189_v5 = vld [vmem:[%s6043_s28 + $0x18] sm:$0xf]  ;;  %v6056_v6 = vld [vmem:[%s6043_s28 + $0x1c] sm:$0x7] }
  0x1d   : > { %v5076_v7 = vcombine.low %v183_v2, %v6052_v4  ;;  %v5079_v8 = vcombine.low %v189_v5, %v6056_v6  ;;  %v185_v9 = vld [vmem:[%s6043_s28 + $0x8] sm:$0xf]  ;;  %v6062_v10 = vld [vmem:[%s6043_s28 + $0xc] sm:$0x7]  ;;  %v191_v16 = vld [vmem:[%s6043_s28 + $0x20] sm:$0xf] }
  0x1e   : > { %v193_v11 = vld [vmem:[%s6043_s28 + $0x28] sm:$0xf]  ;;  %v658_v12 = vshrl.u32 %v5078_v3, 16  ;;  %v660_v13 = vshll.u32 %v5078_v3, 16  ;;  %v5077_v14 = vcombine.low %v185_v9, %v6062_v10  ;;  %v6067_v15 = vld [vmem:[%s6043_s28 + $0x2c] sm:$0x7] }
  0x1f   : > { %v644_v17 = vshrl.u32 %v5076_v7, 16  ;;  %v646_v18 = vshll.u32 %v5076_v7, 16  ;;  %v665_v19 = vshrl.u32 %v5079_v8, 16  ;;  %v667_v20 = vshll.u32 %v5079_v8, 16  ;;  %v6071_v21 = vld [vmem:[%s6043_s28 + $0x24] sm:$0x7] }
  0x20   : > { %v662_v22 = vrot.slane %v660_v13, 1  ;;  %v651_v23 = vshrl.u32 %v5077_v14, 16  ;;  %v653_v24 = vshll.u32 %v5077_v14, 16  ;;  %v5081_v25 = vcombine.low %v193_v11, %v6067_v15  ;;  %v197_v26 = vld [vmem:[%s6043_s28 + $0x38] sm:$0xf]  ;;  %s5953_s9 = smov 24  }
  0x21   : > { %v648_v27 = vrot.slane %v646_v18, 1  ;;  %v669_v28 = vrot.slane %v667_v20, 1  ;;  %v5080_v29 = vcombine.low %v191_v16, %v6071_v21  ;;  %v6077_v30 = vld [vmem:[%s6043_s28 + $0x3c] sm:$0x7]  ;;  %v195_v31 = vld [vmem:[%s6043_s28 + $0x30] sm:$0xf] }
  0x22   : > { %v663_v32 = vor.u32 %v662_v22, %v658_v12  ;;  %v655_v33 = vrot.slane %v653_v24, 1  ;;  %v681_v34 = vshll.u32 %v5081_v25, 16  ;;  %v6081_v35 = vld [vmem:[%s6043_s28 + $0x34] sm:$0x7]  ;;  %v679_v38 = vshrl.u32 %v5081_v25, 16  ;;  %s5954_s10 = smov 27  }
  0x23   : > { %v649_v36 = vor.u32 %v648_v27, %v644_v17  ;;  %v670_v37 = vor.u32 %v669_v28, %v665_v19  ;;  %v674_v39 = vshll.u32 %v5080_v29, 16  ;;  %v201_v40 = vld [vmem:[%s6043_s28 + $0x48] sm:$0xf]  ;;  %v6085_v41 = vld [vmem:[%s6043_s28 + $0x4c] sm:$0x7]  ;;  %v672_v43 = vshrl.u32 %v5080_v29, 16 }
  0x24   : > { %731 = vrot.lane.b32.xlu1 %v663_v32, %s5946_s29  ;;  %v683_v42 = vrot.slane %v681_v34, 1  ;;  %v5083_v44 = vcombine.low %v197_v26, %v6077_v30  ;;  %v5082_v45 = vcombine.low %v195_v31, %v6081_v35  ;;  %v199_v46 = vld [vmem:[%s6043_s28 + $0x40] sm:$0xf]  ;;  %v6092_v47 = vld [vmem:[%s6043_s28 + $0x44] sm:$0x7]  ;;  %v656_v48 = vor.u32 %v655_v33, %v651_v23  ;;  %s5955_s11 = smov 30  }
  0x25   : > { %727 = vrot.lane.b32.xlu0 %v649_v36, %s5946_s29  ;;  %v676_v49 = vrot.slane %v674_v39, 1  ;;  %v5085_v50 = vcombine.low %v201_v40, %v6085_v41  ;;  %v5084_v51 = vcombine.low %v199_v46, %v6092_v47  ;;  %v205_v52 = vld [vmem:[%s6043_s28 + $0x58] sm:$0xf]  ;;  %v6099_v53 = vld [vmem:[%s6043_s28 + $0x5c] sm:$0x7]  ;;  %s5956_s17 = smov 33  }
  0x26   : > { %v695_v54 = vshll.u32 %v5083_v44, 16  ;;  %v203_v55 = vld [vmem:[%s6043_s28 + $0x50] sm:$0xf]  ;;  %v684_v56 = vor.u32 %v683_v42, %v679_v38  ;;  %v693_v57 = vshrl.u32 %v5083_v44, 16  ;;  %v688_v58 = vshll.u32 %v5082_v45, 16  ;;  %s5957_s19 = smov 36  }
  0x27   : > { %v6103_v59 = vld [vmem:[%s6043_s28 + $0x54] sm:$0x7]  ;;  %v686_v61 = vshrl.u32 %v5082_v45, 16  ;;  %v709_v62 = vshll.u32 %v5085_v50, 16  ;;  %v5087_v63 = vcombine.low %v205_v52, %v6099_v53  ;;  %v677_v0 = vor.u32 %v676_v49, %v672_v43  ;;  %v220_v24 = vld [vmem:[%s6043_s28 + $0x8] sm:$0xe] }
  0x28   : > { %733 = vrot.lane.b32.xlu1 %v670_v37, %s5946_s29  ;;  %v697_v60 = vrot.slane %v695_v54, 1  ;;  %v690_v2 = vrot.slane %v688_v58, 1  ;;  %v702_v3 = vshll.u32 %v5084_v51, 16  ;;  %v5086_v5 = vcombine.low %v203_v55, %v6103_v59  ;;  %v219_v25 = vld [vmem:[%s6043_s28] sm:$0xe]  ;;  %s5958_s20 = smov 39  }
  0x29   : > { %729 = vrot.lane.b32.xlu0 %v656_v48, %s5946_s29  ;;  %v707_v8 = vshrl.u32 %v5085_v50, 16  ;;  %v711_v9 = vrot.slane %v709_v62, 1  ;;  %v723_v11 = vshll.u32 %v5087_v63, 16  ;;  %v700_v13 = vshrl.u32 %v5084_v51, 16  ;;  %v222_v31 = vld [vmem:[%s6043_s28 + $0x18] sm:$0xe] }
  0x2a   : > { %v698_v7 = vor.u32 %v697_v60, %v693_v57  ;;  %v691_v12 = vor.u32 %v690_v2, %v686_v61  ;;  %v704_v14 = vrot.slane %v702_v3, 1  ;;  %v716_v16 = vshll.u32 %v5086_v5, 16  ;;  %v221_v32 = vld [vmem:[%s6043_s28 + $0x10] sm:$0xe]  ;;  %v224_v37 = vld [vmem:[%s6043_s28 + $0x28] sm:$0xe] }
  0x2b   : > { %v712_v17 = vor.u32 %v711_v9, %v707_v8  ;;  %v721_v18 = vshrl.u32 %v5087_v63, 16  ;;  %v725_v19 = vrot.slane %v723_v11, 1  ;;  %v714_v22 = vshrl.u32 %v5086_v5, 16  ;;  %v223_v38 = vld [vmem:[%s6043_s28 + $0x20] sm:$0xe]  ;;  %s5963_s25 = smov 48  }
  0x2c   : > { %737 = vrot.lane.b32.xlu1 %v684_v56, %s5946_s29  ;;  %v705_v20 = vor.u32 %v704_v14, %v700_v13  ;;  %v718_v23 = vrot.slane %v716_v16, 1  ;;  %v5089_v27 = vcombine.low %v220_v24, %v6062_v10  ;;  %v5088_v29 = vcombine.low %v219_v25, %v6052_v4  ;;  %v226_v42 = vld [vmem:[%s6043_s28 + $0x38] sm:$0xe]  ;;  %v225_v43 = vld [vmem:[%s6043_s28 + $0x30] sm:$0xe]  ;;  %s5966_s26 = smov [#allocation2]  }
  0x2d   : > { %735 = vrot.lane.b32.xlu0 %v677_v0, %s5946_s29  ;;  %v726_v26 = vor.u32 %v725_v19, %v721_v18  ;;  %v5091_v34 = vcombine.low %v222_v31, %v6056_v6  ;;  %v5090_v10 = vcombine.low %v221_v32, %v6047_v1  ;;  %v5093_v39 = vcombine.low %v224_v37, %v6067_v15  ;;  %v6136_v45 = vld [vmem:[%s6043_s28 + $0x48] sm:$0xe]  ;;  %v6139_v46 = vld [vmem:[%s6043_s28 + $0xc] sm:$0xf]  ;;  %v6142_v15 = vld [vmem:[%s6043_s28 + $0x4] sm:$0xf] }
  0x2e   : > { %v719_v28 = vor.u32 %v718_v23, %v714_v22  ;;  %v788_v33 = vrot.slane %v5089_v27, 1  ;;  %v787_v36 = vrot.slane %v5088_v29, 1  ;;  %v5092_v40 = vcombine.low %v223_v38, %v6071_v21  ;;  %v6147_v49 = vld [vmem:[%s6043_s28 + $0x40] sm:$0xe]  ;;  %v6154_v52 = vld [vmem:[%s6043_s28 + $0x1c] sm:$0xf] }
  0x2f   : > { %v790_v4 = vrot.slane %v5091_v34, 1  ;;  %v789_v6 = vrot.slane %v5090_v10, 1  ;;  %v792_v1 = vrot.slane %v5093_v39, 1  ;;  %v5095_v44 = vcombine.low %v226_v42, %v6077_v30  ;;  %v6158_v55 = vld [vmem:[%s6043_s28 + $0x58] sm:$0xe]  ;;  %s5886_s27 = sshll.u32 %s5966_s26, 4  ;;  %s5887_s27 = int_to_ptr.vmem [resolvable:$false] %s5886_s27 }
  0x30   : > { %741 = vrot.lane.b32.xlu1 %v698_v7, %s5946_s29  ;;  %v791_v21 = vrot.slane %v5092_v40, 1  ;;  %v5094_v48 = vcombine.low %v225_v43, %v6081_v35  ;;  %v5097_v50 = vcombine.low %v6136_v45, %v6085_v41  ;;  %v5101_v30 = vcombine.low %v220_v24, %v6139_v46  ;;  %v6164_v57 = vld [vmem:[%s6043_s28 + $0x14] sm:$0xf]  ;;  %v6167_v41 = vld [vmem:[%s6043_s28 + $0x50] sm:$0xe] }
  0x31   : > { %739 = vrot.lane.b32.xlu0 %v691_v12, %s5946_s29  ;;  %v5100_v51 = vcombine.low %v219_v25, %v6142_v15  ;;  %v794_v54 = vrot.slane %v5095_v44, 1  ;;  %v5096_v56 = vcombine.low %v6147_v49, %v6092_v47  ;;  %v5103_v58 = vcombine.low %v222_v31, %v6154_v52  ;;  %v6173_v62 = vld [vmem:[%s6043_s28 + $0x2c] sm:$0xf]  ;;  %v6181_v8 = vld [vmem:[%s6043_s28 + $0x24] sm:$0xf] }
  0x32   : > { %v793_v35 = vrot.slane %v5094_v48, 1  ;;  %v796_v60 = vrot.slane %v5097_v50, 1  ;;  %v5099_v61 = vcombine.low %v6158_v55, %v6099_v53  ;;  %v868_v63 = vshrl.u32 %v5101_v30, 16  ;;  %v6185_v9 = vld [vmem:[%s6043_s28 + $0x3c] sm:$0xf] }
  0x33   : > { %v871_v0 = vshll.u32 %v5101_v30, 16  ;;  %v860_v47 = vshrl.u32 %v5100_v51, 16  ;;  %v863_v2 = vshll.u32 %v5100_v51, 16  ;;  %v5102_v3 = vcombine.low %v221_v32, %v6164_v57  ;;  %v6188_v14 = vld [vmem:[%s6043_s28 + $0x34] sm:$0xf] }
  0x34   : > { %745 = vrot.lane.b32.xlu1 %v712_v17, %s5946_s29  ;;  %v795_v5 = vrot.slane %v5096_v56, 1  ;;  %v5098_v7 = vcombine.low %v6167_v41, %v6103_v59  ;;  %v5105_v53 = vcombine.low %v224_v37, %v6173_v62  ;;  %v798_v11 = vrot.slane %v5099_v61, 1  ;;  %v6213_v51 = vld [vmem:[%s6043_s28 + $0x54] sm:$0xf] }
  0x35   : > { %743 = vrot.lane.b32.xlu0 %v705_v20, %s5946_s29  ;;  %v884_v12 = vshrl.u32 %v5103_v58, 16  ;;  %v887_v13 = vshll.u32 %v5103_v58, 16  ;;  %v870_v16 = vrot.slane %v868_v63, 1  ;;  %v873_v17 = vrot.slane %v871_v0, 2 }
  0x36   : > { %v862_v18 = vrot.slane %v860_v47, 1  ;;  %v865_v19 = vrot.slane %v863_v2, 2  ;;  %v5104_v59 = vcombine.low %v223_v38, %v6181_v8  ;;  %v797_v20 = vrot.slane %v5098_v7, 1  ;;  %v6201_v38 = vld [vmem:[%s6043_s28 + $0x44] sm:$0xf] }
  0x37   : > { %v876_v22 = vshrl.u32 %v5102_v3, 16  ;;  %v879_v23 = vshll.u32 %v5102_v3, 16  ;;  %v5107_v24 = vcombine.low %v226_v42, %v6185_v9  ;;  %v5106_v25 = vcombine.low %v225_v43, %v6188_v14  ;;  %v6206_v42 = vld [vmem:[%s6043_s28 + $0x5c] sm:$0xf] }
  0x38   : > { %749 = vrot.lane.b32.xlu1 %v726_v26, %s5946_s29  ;;  %v886_v26 = vrot.slane %v884_v12, 1  ;;  %v889_v27 = vrot.slane %v887_v13, 2  ;;  %v874_v29 = vor.u32 %v873_v17, %v870_v16  ;;  %v866_v31 = vor.u32 %v865_v19, %v862_v18 }
  0x39   : > { %747 = vrot.lane.b32.xlu0 %v719_v28, %s5946_s29  ;;  %v6196_v28 = vld [vmem:[%s6043_s28 + $0x4c] sm:$0xf]  ;;  %v900_v32 = vshrl.u32 %v5105_v53, 16  ;;  %v878_v34 = vrot.slane %v876_v22, 1  ;;  %v892_v10 = vshrl.u32 %v5104_v59, 16  ;;  %v895_v37 = vshll.u32 %v5104_v59, 16 }
  0x3a   : > { %v890_v39 = vor.u32 %v889_v27, %v886_v26  ;;  %v919_v40 = vshll.u32 %v5107_v24, 16  ;;  %v908_v44 = vshrl.u32 %v5106_v25, 16  ;;  %v5108_v48 = vcombine.low %v6147_v49, %v6201_v38 }
  0x3b   : > { %v902_v43 = vrot.slane %v900_v32, 1  ;;  %v897_v30 = vrot.slane %v895_v37, 2  ;;  %v5110_v49 = vcombine.low %v6167_v41, %v6213_v51  ;;  %v246_v32 = vld [vmem:[%s6043_s28 + $0x18] sm:$0xc] }
  0x3c   : > { %801 = vrot.lane.b32.xlu1 %v788_v33, %s5947_s30  ;;  %v903_v33 = vshll.u32 %v5105_v53, 16  ;;  %v921_v56 = vrot.slane %v919_v40, 2  ;;  %v910_v61 = vrot.slane %v908_v44, 1  ;;  %v924_v2 = vshrl.u32 %v5108_v48, 16  ;;  %v250_v40 = vld [vmem:[%s6043_s28 + $0x38] sm:$0xc] }
  0x3d   : > { %799 = vrot.lane.b32.xlu0 %v787_v36, %s5947_s30  ;;  %v881_v36 = vrot.slane %v879_v23, 2  ;;  %v927_v3 = vshll.u32 %v5108_v48, 16  ;;  %v940_v41 = vshrl.u32 %v5110_v49, 16  ;;  %v943_v17 = vshll.u32 %v5110_v49, 16  ;;  %v251_v48 = vld [vmem:[%s6043_s28 + $0x40] sm:$0xc] }
  0x3e   : > { %v926_v13 = vrot.slane %v924_v2, 1  ;;  %v4968_v49 = vld [vmem:[%s6043_s28 + $0x1c] sm:$0xf] }
  0x3f   : > { %v882_v50 = vor.u32 %v881_v36, %v878_v34  ;;  %v929_v16 = vrot.slane %v927_v3, 2  ;;  %v942_v22 = vrot.slane %v940_v41, 1  ;;  %v945_v23 = vrot.slane %v943_v17, 2  ;;  %v4945_v3 = vld [vmem:[%s6043_s28 + $0x24] sm:$0x7] }
  0x40   : > { %805 = vrot.lane.b32.xlu1 %v790_v4, %s5947_s30  ;;  %v5109_v4 = vcombine.low %v6136_v45, %v6196_v28  ;;  %v894_v45 = vrot.slane %v892_v10, 1  ;;  %v5115_v36 = vcombine.low %v246_v32, %v6154_v52  ;;  %v6278_v41 = vld [vmem:[%s6043_s28 + $0x20] sm:$0xf]  ;;  %v4993_v17 = vld [vmem:[%s6043_s28 + $0x24] sm:$0x3] }
  0x41   : > { %803 = vrot.lane.b32.xlu0 %v789_v6, %s5947_s30  ;;  %v916_v6 = vshrl.u32 %v5107_v24, 16  ;;  %v244_v24 = vld [vmem:[%s6043_s28 + $0x8] sm:$0xc]  ;;  %v4981_v32 = vld [vmem:[%s6043_s28 + $0x20] sm:$0xc] }
  0x42   : > { %v932_v58 = vshrl.u32 %v5109_v4, 16  ;;  %v935_v0 = vshll.u32 %v5109_v4, 16  ;;  %v898_v47 = vor.u32 %v897_v30, %v894_v45  ;;  %v5113_v27 = vcombine.low %v244_v24, %v6139_v46  ;;  %v248_v46 = vld [vmem:[%s6043_s28 + $0x28] sm:$0xc]  ;;  %v247_v4 = vld [vmem:[%s6043_s28 + $0x20] sm:$0xc] }
  0x43   : > { %v5116_v52 = vcombine.low %v247_v4, %v6181_v8  ;;  %v254_v30 = vld [vmem:[%s6043_s28 + $0x58] sm:$0xc]  ;;  %v5304_v24 = vcombine.low %v6278_v41, %v4993_v17  ;;  %v5053_v17 = vld [vmem:[%s6043_s28 + $0x28] sm:$0xc] }
  0x44   : > { %809 = vrot.lane.b32.xlu1 %v792_v1, %s5947_s30  ;;  %v905_v1 = vrot.slane %v903_v33, 2  ;;  %v934_v7 = vrot.slane %v932_v58, 1  ;;  %v937_v53 = vrot.slane %v935_v0, 2  ;;  %v245_v33 = vld [vmem:[%s6043_s28 + $0x10] sm:$0xc]  ;;  %v1016_v34 = vrot.slane %v5113_v27, 2 }
  0x45   : > { %807 = vrot.lane.b32.xlu0 %v791_v21, %s5947_s30  ;;  %v911_v21 = vshll.u32 %v5106_v25, 16  ;;  %v243_v25 = vld [vmem:[%s6043_s28] sm:$0xc]  ;;  %v5114_v37 = vcombine.low %v245_v33, %v6164_v57  ;;  %v1019_v44 = vrot.slane %v5116_v52, 2  ;;  %v4944_v58 = vld [vmem:[%s6043_s28 + $0x1c] sm:$0x7] }
  0x46   : > { %v938_v18 = vor.u32 %v937_v53, %v934_v7  ;;  %v4776_v0 = vld [vmem:[%s6043_s28 + $0x8] sm:$0xf]  ;;  %v4783_v53 = vld [vmem:[%s6043_s28 + $0x24] sm:$0x3] }
  0x47   : > { %v913_v63 = vrot.slane %v911_v21, 2  ;;  %v6293_v52 = vld [vmem:[%s6043_s28 + $0x28] sm:$0xf] }
  0x48   : > { %813 = vrot.lane.b32.xlu1 %v794_v54, %s5947_s30  ;;  %v5111_v54 = vcombine.low %v6158_v55, %v6206_v42 }
  0x49   : > { %811 = vrot.lane.b32.xlu0 %v793_v35, %s5947_s30  ;;  %v918_v35 = vrot.slane %v916_v6, 1  ;;  %v914_v55 = vor.u32 %v913_v63, %v910_v61  ;;  %v1017_v6 = vrot.slane %v5114_v37, 2  ;;  %v4779_v63 = vld [vmem:[%s6043_s28 + $0x14] sm:$0x3] }
  0x4a   : > { %v951_v12 = vshll.u32 %v5111_v54, 16 }
  0x4c   : > { %817 = vrot.lane.b32.xlu1 %v796_v60, %s5947_s30  ;;  %v906_v60 = vor.u32 %v905_v1, %v902_v43  ;;  %v953_v59 = vrot.slane %v951_v12, 2  ;;  %v249_v43 = vld [vmem:[%s6043_s28 + $0x30] sm:$0xc]  ;;  %v5119_v1 = vcombine.low %v250_v40, %v6185_v9  ;;  %v5120_v9 = vcombine.low %v251_v48, %v6201_v38  ;;  %v4995_v40 = vld [vmem:[%s6043_s28 + $0x2c] sm:$0x3] }
  0x4d   : > { %815 = vrot.lane.b32.xlu0 %v795_v5, %s5947_s30  ;;  %v922_v5 = vor.u32 %v921_v56, %v918_v35  ;;  %v5118_v21 = vcombine.low %v249_v43, %v6188_v14  ;;  %v5123_v35 = vcombine.low %v254_v30, %v6206_v42  ;;  %v4778_v38 = vld [vmem:[%s6043_s28 + $0x10] sm:$0xf]  ;;  %v5040_v30 = vld [vmem:[%s6043_s28 + $0x24] sm:$0xf] }
  0x4e   : > { %v1022_v8 = vrot.slane %v5119_v1, 2  ;;  %v5125_v7 = vcombine.low %v4778_v38, %v4779_v63 }
  0x4f   : > { %v1021_v45 = vrot.slane %v5118_v21, 2  ;;  %v1026_v61 = vrot.slane %v5123_v35, 2 }
  0x50   : > { %821 = vrot.lane.b32.xlu1 %v798_v11, %s5947_s30  ;;  %v948_v11 = vshrl.u32 %v5111_v54, 16  ;;  %v253_v54 = vld [vmem:[%s6043_s28 + $0x50] sm:$0xc] }
  0x51   : > { %819 = vrot.lane.b32.xlu0 %v797_v20, %s5947_s30  ;;  %v930_v20 = vor.u32 %v929_v16, %v926_v13  ;;  %v5122_v56 = vcombine.low %v253_v54, %v6213_v51  ;;  %v4777_v51 = vld [vmem:[%s6043_s28 + $0xc] sm:$0x3] }
  0x52   : > { %v950_v19 = vrot.slane %v948_v11, 1  ;;  %v5124_v12 = vcombine.low %v4776_v0, %v4777_v51 }
  0x53   : > { %v1025_v42 = vrot.slane %v5122_v56, 2  ;;  %v5052_v56 = vld [vmem:[%s6043_s28 + $0x20] sm:$0xc] }
  0x54   : > { %957 = vrot.lane.b32.xlu1 %v874_v29, %s5948_s4  ;;  %v954_v26 = vor.u32 %v953_v59, %v950_v19  ;;  %v946_v29 = vor.u32 %v945_v23, %v942_v22  ;;  %v4781_v19 = vld [vmem:[%s6043_s28 + $0x1c] sm:$0x3]  ;;  %v5352_v0 = vcombine.low %v5052_v56, %v5040_v30 }
  0x55   : > { %955 = vrot.lane.b32.xlu0 %v866_v31, %s5948_s4  ;;  %v5112_v31 = vcombine.low %v243_v25, %v6142_v15  ;;  %v1018_v15 = vrot.slane %v5115_v36, 2 }
  0x57   : > { %v1015_v10 = vrot.slane %v5112_v31, 2  ;;  %v4969_v31 = vld [vmem:[%s6043_s28 + $0x24] sm:$0xf] }
  0x58   : > { %961 = vrot.lane.b32.xlu1 %v890_v39, %s5948_s4  ;;  %v5117_v39 = vcombine.low %v248_v46, %v6173_v62  ;;  %v252_v62 = vld [vmem:[%s6043_s28 + $0x48] sm:$0xc] }
  0x59   : > { %959 = vrot.lane.b32.xlu0 %v882_v50, %s5948_s4  ;;  %v5121_v50 = vcombine.low %v252_v62, %v6196_v28  ;;  %v1023_v28 = vrot.slane %v5120_v9, 2 }
  0x5a   : > { %v1020_v57 = vrot.slane %v5117_v39, 2  ;;  %v5016_v39 = vld [vmem:[%s6043_s28 + $0x24] sm:$0x7] }
  0x5b   : > { %v1024_v14 = vrot.slane %v5121_v50, 2  ;;  %v5305_v50 = vcombine.low %v6293_v52, %v4995_v40  ;;  %v5316_v38 = vcombine.low %v6278_v41, %v5016_v39  ;;  %v5041_v41 = vld [vmem:[%s6043_s28 + $0x2c] sm:$0xf] }
  0x5c   : > { %965 = vrot.lane.b32.xlu1 %v906_v60, %s5948_s4  ;;  %v4956_v60 = vld [vmem:[%s6043_s28 + $0x18] sm:$0xe] }
  0x5d   : > { %963 = vrot.lane.b32.xlu0 %v898_v47, %s5948_s4  ;;  %v4980_v47 = vld [vmem:[%s6043_s28 + $0x18] sm:$0xc]  ;;  %v5268_v2 = vcombine.low %v4956_v60, %v4944_v58  ;;  %v5017_v58 = vld [vmem:[%s6043_s28 + $0x2c] sm:$0x7] }
  0x5e   : > { %v5292_v11 = vcombine.low %v4980_v47, %v4968_v49  ;;  %v3057_v47 = vshll.u32 %v5305_v50, 16 }
  0x5f   : > { %v2653_v13 = vshll.u32 %v5268_v2, 16 }
  0x60   : > { %969 = vrot.lane.b32.xlu1 %v922_v5, %s5948_s4  ;;  %v4957_v5 = vld [vmem:[%s6043_s28 + $0x20] sm:$0xe]  ;;  %v2867_v22 = vshrl.u32 %v5292_v11, 16  ;;  %v2870_v23 = vshll.u32 %v5292_v11, 16  ;;  %v3467_v11 = vshrl.u32 %v5352_v0, 16 }
  0x61   : > { %967 = vrot.lane.b32.xlu0 %v914_v55, %s5948_s4  ;;  %v4782_v55 = vld [vmem:[%s6043_s28 + $0x20] sm:$0xf]  ;;  %v5269_v16 = vcombine.low %v4957_v5, %v4945_v3  ;;  %v2655_v27 = vrot.slane %v2653_v13, 1  ;;  %v5281_v43 = vcombine.low %v4957_v5, %v4969_v31  ;;  %v4946_v3 = vld [vmem:[%s6043_s28 + $0x2c] sm:$0x7] }
  0x62   : > { %v5127_v59 = vcombine.low %v4782_v55, %v4783_v53  ;;  %v2872_v36 = vrot.slane %v2870_v23, 2  ;;  %v6312_v5 = vld [vmem:[%s6043_s28 + $0x28] sm:$0xe] }
  0x63   : > { %v2658_v46 = vshrl.u32 %v5269_v16, 16  ;;  %v2795_v54 = vrot.slane %v5281_v43, 1 }
  0x64   : > { %973 = vrot.lane.b32.xlu1 %v938_v18, %s5948_s4  ;;  %v4780_v18 = vld [vmem:[%s6043_s28 + $0x18] sm:$0xf] }
  0x65   : > { %971 = vrot.lane.b32.xlu0 %v930_v20, %s5948_s4  ;;  %v5280_v20 = vcombine.low %v4956_v60, %v4968_v49  ;;  %v5126_v25 = vcombine.low %v4780_v18, %v4781_v19  ;;  %v5029_v60 = vld [vmem:[%s6043_s28 + $0x28] sm:$0xe]  ;;  %v5270_v18 = vcombine.low %v6312_v5, %v4946_v3  ;;  %v4947_v3 = vld [vmem:[%s6043_s28 + $0x34] sm:$0x7] }
  0x67   : > { %v2794_v33 = vrot.slane %v5280_v20, 1 }
  0x68   : > { %977 = vrot.lane.b32.xlu1 %v954_v26, %s5948_s4  ;;  %v2651_v26 = vshrl.u32 %v5268_v2, 16  ;;  %v5329_v2 = vcombine.low %v5029_v60, %v5017_v58 }
  0x69   : > { %975 = vrot.lane.b32.xlu0 %v946_v29, %s5948_s4  ;;  %v2660_v29 = vshll.u32 %v5269_v16, 16 }
  0x6a   : > { %v2656_v37 = vor.u32 %v2655_v27, %v2651_v26  ;;  %v3260_v16 = vshll.u32 %v5329_v2, 16  ;;  %v5317_v26 = vcombine.low %v6293_v52, %v5017_v58  ;;  %v3258_v27 = vshrl.u32 %v5329_v2, 16 }
  0x6b   : > { %v2662_v4 = vrot.slane %v2660_v29, 1  ;;  %v2665_v52 = vshrl.u32 %v5270_v18, 16 }
  0x6c   : > { %1029 = vrot.lane.b32.xlu1 %v1016_v34, %s5949_s5  ;;  %v2869_v34 = vrot.slane %v2867_v22, 1  ;;  %v3469_v22 = vrot.slane %v3467_v11, 1  ;;  %v3262_v29 = vrot.slane %v3260_v16, 1 }
  0x6d   : > { %1027 = vrot.lane.b32.xlu0 %v1015_v10, %s5949_s5  ;;  %v3047_v10 = vshrl.u32 %v5304_v24, 16  ;;  %v2663_v62 = vor.u32 %v2662_v4, %v2658_v46 }
  0x6f   : > { %v3049_v1 = vrot.slane %v3047_v10, 7 }
  0x70   : > { %1033 = vrot.lane.b32.xlu1 %v1018_v15, %s5949_s5  ;;  %v5293_v15 = vcombine.low %v4981_v32, %v4969_v31  ;;  %v2667_v31 = vshll.u32 %v5270_v18, 16  ;;  %v4997_v32 = vld [vmem:[%s6043_s28 + $0x34] sm:$0x3]  ;;  %v6373_v18 = vld [vmem:[%s6043_s28 + $0x38] sm:$0xf] }
  0x71   : > { %1031 = vrot.lane.b32.xlu0 %v1017_v6, %s5949_s5  ;;  %v5028_v6 = vld [vmem:[%s6043_s28 + $0x20] sm:$0xe] }
  0x72   : > { %v5328_v21 = vcombine.low %v5028_v6, %v5016_v39  ;;  %v2875_v48 = vshrl.u32 %v5293_v15, 16  ;;  %v5340_v53 = vcombine.low %v5028_v6, %v5040_v30  ;;  %v3263_v6 = vor.u32 %v3262_v29, %v3258_v27 }
  0x73   : > { %v2669_v40 = vrot.slane %v2667_v31, 1 }
  0x74   : > { %1037 = vrot.lane.b32.xlu1 %v1020_v57, %s5949_s5  ;;  %v2873_v57 = vor.u32 %v2872_v36, %v2869_v34  ;;  %v3253_v9 = vshll.u32 %v5328_v21, 16  ;;  %v3394_v20 = vrot.slane %v5340_v53, 1  ;;  %v4970_v34 = vld [vmem:[%s6043_s28 + $0x2c] sm:$0xf]  ;;  %v4982_v36 = vld [vmem:[%s6043_s28 + $0x28] sm:$0xc] }
  0x75   : > { %1035 = vrot.lane.b32.xlu0 %v1019_v44, %s5949_s5  ;;  %v3050_v44 = vshll.u32 %v5304_v24, 16  ;;  %v5353_v24 = vcombine.low %v5053_v17, %v5041_v41  ;;  %v5294_v43 = vcombine.low %v4982_v36, %v4970_v34  ;;  %v5282_v30 = vcombine.low %v6312_v5, %v4970_v34  ;;  %v4959_v5 = vld [vmem:[%s6043_s28 + $0x30] sm:$0xe]  ;;  %v6386_v36 = vld [vmem:[%s6043_s28 + $0x3c] sm:$0x7] }
  0x76   : > { %v3255_v63 = vrot.slane %v3253_v9, 1  ;;  %v2670_v9 = vor.u32 %v2669_v40, %v2665_v52  ;;  %v5271_v17 = vcombine.low %v4959_v5, %v4947_v3  ;;  %v4960_v3 = vld [vmem:[%s6043_s28 + $0x38] sm:$0xe] }
  0x77   : > { %v3475_v4 = vshrl.u32 %v5353_v24, 16 }
  0x78   : > { %1041 = vrot.lane.b32.xlu1 %v1022_v8, %s5949_s5  ;;  %v2878_v8 = vshll.u32 %v5293_v15, 16  ;;  %v3478_v15 = vshll.u32 %v5353_v24, 16  ;;  %v4983_v24 = vld [vmem:[%s6043_s28 + $0x30] sm:$0xc] }
  0x79   : > { %1039 = vrot.lane.b32.xlu0 %v1021_v45, %s5949_s5  ;;  %v3052_v45 = vor.u32 %v3050_v44, %v3049_v1  ;;  %v6345_v1 = vld [vmem:[%s6043_s28 + $0x30] sm:$0xe] }
  0x7a   : > { %v2880_v35 = vrot.slane %v2878_v8, 2  ;;  %v3480_v8 = vrot.slane %v3478_v15, 2  ;;  %v2674_v15 = vshll.u32 %v5271_v17, 16 }
  0x7c   : > { %1045 = vrot.lane.b32.xlu1 %v1024_v14, %s5949_s5  ;;  %v2877_v14 = vrot.slane %v2875_v48, 1  ;;  %v3477_v48 = vrot.slane %v3475_v4, 1 }
  0x7d   : > { %1043 = vrot.lane.b32.xlu0 %v1023_v28, %s5949_s5  ;;  %v3054_v28 = vshrl.u32 %v5305_v50, 16 }
  0x7f   : > { %v3056_v49 = vrot.slane %v3054_v28, 7  ;;  %v5054_v28 = vld [vmem:[%s6043_s28 + $0x30] sm:$0xc] }
  0x80   : > { %1049 = vrot.lane.b32.xlu1 %v1026_v61, %s5949_s5  ;;  %v3251_v61 = vshrl.u32 %v5328_v21, 16 }
  0x81   : > { %1047 = vrot.lane.b32.xlu0 %v1025_v42, %s5949_s5  ;;  %v2881_v42 = vor.u32 %v2880_v35, %v2877_v14  ;;  %v3059_v13 = vor.u32 %v3057_v47, %v3056_v49  ;;  %v2886_v14 = vshll.u32 %v5294_v43, 16  ;;  %v5042_v35 = vld [vmem:[%s6043_s28 + $0x34] sm:$0xf] }
  0x82   : > { %v3256_v55 = vor.u32 %v3255_v63, %v3251_v61  ;;  %v5342_v27 = vcombine.low %v6345_v1, %v5042_v35 }
  0x83   : > { %v2888_v47 = vrot.slane %v2886_v14, 2 }
  0x84   : > { %1113 = vrot.lane.b32.xlu1 %v5125_v7, %s5950_s6 }
  0x85   : > { %1111 = vrot.lane.b32.xlu0 %v5124_v12, %s5950_s6  ;;  %v3470_v12 = vshll.u32 %v5352_v0, 16  ;;  %v5354_v0 = vcombine.low %v5054_v28, %v5042_v35 }
  0x87   : > { %v3472_v23 = vrot.slane %v3470_v12, 2  ;;  %v3486_v16 = vshll.u32 %v5354_v0, 16 }
  0x88   : > { %1117 = vrot.lane.b32.xlu1 %v5127_v59, %s5950_s6 }
  0x89   : > { %1115 = vrot.lane.b32.xlu0 %v5126_v25, %s5950_s6  ;;  %v6327_v25 = vld [vmem:[%s6043_s28 + $0x30] sm:$0xf]  ;;  %v3473_v46 = vor.u32 %v3472_v23, %v3469_v22  ;;  %v4971_v23 = vld [vmem:[%s6043_s28 + $0x34] sm:$0xf] }
  0x8a   : > { %v5306_v39 = vcombine.low %v6327_v25, %v4997_v32  ;;  %v3488_v32 = vrot.slane %v3486_v16, 2  ;;  %v5295_v4 = vcombine.low %v4983_v24, %v4971_v23  ;;  %v4951_v24 = vld [vmem:[%s6043_s28 + $0x54] sm:$0x7] }
  0x8c   : > { %2806 = vrot.lane.b32.xlu1 %v2794_v33, %s5947_s30  ;;  %v3061_v50 = vshrl.u32 %v5306_v39, 16 }
  0x8d   : > { %2734 = vrot.lane.b32.xlu0 %v2656_v37, %s5946_s29  ;;  %v5341_v37 = vcombine.low %v5029_v60, %v5041_v41  ;;  %v3064_v60 = vshll.u32 %v5306_v39, 16 }
  0x8e   : > { %v3063_v61 = vrot.slane %v3061_v50, 7  ;;  %v2894_v50 = vshll.u32 %v5295_v4, 16 }
  0x90   : > { %2962 = vrot.lane.b32.xlu1 %v2873_v57, %s5948_s4  ;;  %v6342_v57 = vld [vmem:[%s6043_s28 + $0x34] sm:$0x7]  ;;  %v3066_v11 = vor.u32 %v3064_v60, %v3063_v61 }
  0x91   : > { %2736 = vrot.lane.b32.xlu0 %v2663_v62, %s5946_s29  ;;  %v3395_v62 = vrot.slane %v5341_v37, 1  ;;  %v6389_v37 = vld [vmem:[%s6043_s28 + $0x38] sm:$0xe] }
  0x92   : > { %v5331_v52 = vcombine.low %v6389_v37, %v6386_v36 }
  0x94   : > { %3130 = vrot.lane.b32.xlu1 %v3052_v45, %s5949_s5  ;;  %v5330_v45 = vcombine.low %v6345_v1, %v6342_v57  ;;  %v5283_v1 = vcombine.low %v4959_v5, %v4971_v23 }
  0x95   : > { %2808 = vrot.lane.b32.xlu0 %v2795_v54, %s5947_s30  ;;  %v2883_v54 = vshrl.u32 %v5294_v43, 16  ;;  %v3396_v43 = vrot.slane %v5342_v27, 1  ;;  %v4963_v27 = vld [vmem:[%s6043_s28 + $0x50] sm:$0xe] }
  0x96   : > { %v6308_v51 = vpop.permute.xlu1 %731  ;;  %v3267_v63 = vshll.u32 %v5330_v45, 16  ;;  %v3265_v53 = vshrl.u32 %v5330_v45, 16  ;;  %v5055_v45 = vld [vmem:[%s6043_s28 + $0x38] sm:$0xc]  ;;  %v2797_v14 = vrot.slane %v5283_v1, 1 }
  0x97   : > { %v6314_v7 = vpop.permute.xlu0 %727  ;;  %v2885_v49 = vrot.slane %v2883_v54, 1  ;;  %v3274_v54 = vshll.u32 %v5331_v52, 16 }
  0x98   : > { %3190 = vrot.lane.b32.xlu1 %v5316_v38, %s5950_s6  ;;  %v3481_v38 = vor.u32 %v3480_v8, %v3477_v48  ;;  %v3269_v12 = vrot.slane %v3267_v63, 1  ;;  %v5043_v48 = vld [vmem:[%s6043_s28 + $0x3c] sm:$0xf]  ;;  %v2891_v8 = vshrl.u32 %v5295_v4, 16  ;;  %v2896_v63 = vrot.slane %v2894_v50, 2 }
  0x99   : > { %2964 = vrot.lane.b32.xlu0 %v2881_v42, %s5948_s4  ;;  %v2796_v42 = vrot.slane %v5282_v30, 1  ;;  %v2889_v41 = vor.u32 %v2888_v47, %v2885_v49  ;;  %v5355_v60 = vcombine.low %v5055_v45, %v5043_v48  ;;  %v4948_v47 = vld [vmem:[%s6043_s28 + $0x3c] sm:$0x7]  ;;  %v5319_v4 = vcombine.low %v6373_v18, %v6386_v36 }
  0x9a   : > { %v6321_v19 = vpop.permute.xlu1 %733  ;;  %v3270_v29 = vor.u32 %v3269_v12, %v3265_v53  ;;  %v2893_v61 = vrot.slane %v2891_v8, 1  ;;  %v3272_v53 = vshrl.u32 %v5331_v52, 16  ;;  %v4972_v8 = vld [vmem:[%s6043_s28 + $0x3c] sm:$0xf] }
  0x9b   : > { %8503 = vst [vmem:[#allocation5_spill] sm:$0xff] %v6321_v19  ;;  %v6323_v59 = vpop.permute.xlu0 %729  ;;  %v3494_v16 = vshll.u32 %v5355_v60, 16  ;;  %v6721_v19 = vld [vmem:[%s6043_s28 + $0x78] sm:$0xf] }
  0x9c   : > { %3334 = vrot.lane.b32.xlu1 %v3256_v55, %s5951_s7 }
  0x9d   : > { %3132 = vrot.lane.b32.xlu0 %v3059_v13, %s5949_s5  ;;  %v3483_v13 = vshrl.u32 %v5354_v0, 16  ;;  %v4950_v0 = vld [vmem:[%s6043_s28 + $0x4c] sm:$0x7] }
  0x9e   : > { %v6332_v33 = vpop.permute.xlu1 %737 }
  0x9f   : > { %8504 = vst [vmem:[#allocation6_spill] sm:$0xff] %v6332_v33  ;;  %v6336_v10 = vpop.permute.xlu0 %735  ;;  %v3485_v31 = vrot.slane %v3483_v13, 1  ;;  %v3491_v13 = vshrl.u32 %v5355_v60, 16  ;;  %v5284_v60 = vcombine.low %v4960_v3, %v4972_v8 }
  0xa0   : > { %8505 = vst [vmem:[#allocation7_spill] sm:$0xff] %v6336_v10  ;;  %3406 = vrot.lane.b32.xlu1 %v3394_v20, %s5952_s8  ;;  %v4999_v20 = vld [vmem:[%s6043_s28 + $0x3c] sm:$0x3]  ;;  %v5038_v10 = vld [vmem:[%s6043_s28 + $0x70] sm:$0xe] }
  0xa1   : > { %3192 = vrot.lane.b32.xlu0 %v5317_v26, %s5950_s6  ;;  %v5307_v34 = vcombine.low %v6373_v18, %v4999_v20  ;;  %v3489_v40 = vor.u32 %v3488_v32, %v3485_v31  ;;  %v5272_v20 = vcombine.low %v4960_v3, %v4948_v47  ;;  %v3493_v32 = vrot.slane %v3491_v13, 1 }
  0xa2   : > { %v6347_v44 = vpop.permute.xlu1 %741 }
  0xa3   : > { %8506 = vst [vmem:[#allocation8_spill] sm:$0xff] %v6347_v44  ;;  %v6349_v21 = vpop.permute.xlu0 %739  ;;  %v3071_v28 = vshll.u32 %v5307_v34, 16  ;;  %v2681_v52 = vshll.u32 %v5272_v20, 16  ;;  %v2679_v36 = vshrl.u32 %v5272_v20, 16  ;;  %v2798_v20 = vrot.slane %v5284_v60, 1 }
  0xa4   : > { %8507 = vst [vmem:[#allocation9_spill] sm:$0xff] %v6349_v21  ;;  %3562 = vrot.lane.b32.xlu1 %v3473_v46, %s5953_s9  ;;  %v5318_v46 = vcombine.low %v6327_v25, %v6342_v57  ;;  %v2672_v25 = vshrl.u32 %v5271_v17, 16  ;;  %v2676_v57 = vrot.slane %v2674_v15, 1  ;;  %v2897_v17 = vor.u32 %v2896_v63, %v2893_v61  ;;  %v4975_v61 = vld [vmem:[%s6043_s28 + $0x54] sm:$0xf] }
  0xa5   : > { %3336 = vrot.lane.b32.xlu0 %v3263_v6, %s5951_s7  ;;  %v5343_v15 = vcombine.low %v6389_v37, %v5043_v48  ;;  %v2683_v37 = vrot.slane %v2681_v52, 1  ;;  %v4984_v48 = vld [vmem:[%s6043_s28 + $0x38] sm:$0xc]  ;;  %v4987_v63 = vld [vmem:[%s6043_s28 + $0x50] sm:$0xc] }
  0xa6   : > { %v6358_v56 = vpop.permute.xlu1 %745  ;;  %v5299_v3 = vcombine.low %v4987_v63, %v4975_v61  ;;  %v5001_v52 = vld [vmem:[%s6043_s28 + $0x44] sm:$0x3]  ;;  %v5007_v60 = vld [vmem:[%s6043_s28 + $0x5c] sm:$0x3]  ;;  %v5005_v63 = vld [vmem:[%s6043_s28 + $0x54] sm:$0x3] }
  0xa7   : > { %8508 = vst [vmem:[#allocation10_spill] sm:$0xff] %v6358_v56  ;;  %v6360_v58 = vpop.permute.xlu0 %743  ;;  %v3397_v18 = vrot.slane %v5343_v15, 1  ;;  %v6465_v15 = vld [vmem:[%s6043_s28 + $0x40] sm:$0xf] }
  0xa8   : > { %8509 = vst [vmem:[#allocation11_spill] sm:$0xff] %v6360_v58  ;;  %3408 = vrot.lane.b32.xlu1 %v3395_v62, %s5952_s8  ;;  %v3068_v62 = vshrl.u32 %v5307_v34, 16  ;;  %v3496_v34 = vrot.slane %v3494_v16, 2  ;;  %v4986_v16 = vld [vmem:[%s6043_s28 + $0x48] sm:$0xc] }
  0xa9   : > { %2738 = vrot.lane.b32.xlu0 %v2670_v9, %s5946_s29  ;;  %v6605_v58 = vld [vmem:[%s6043_s28 + $0x60] sm:$0xe] }
  0xaa   : > { %v6364_v2 = vpop.permute.xlu1 %749  ;;  %v3070_v35 = vrot.slane %v3068_v62, 7  ;;  %v3497_v62 = vor.u32 %v3496_v34, %v3493_v32 }
  0xab   : > { %8510 = vst [vmem:[#allocation12_spill] sm:$0xff] %v6364_v2  ;;  %v6368_v55 = vpop.permute.xlu0 %747 }
  0xac   : > { %8511 = vst [vmem:[#allocation13_spill] sm:$0xff] %v6368_v55  ;;  %3564 = vrot.lane.b32.xlu1 %v3481_v38, %s5953_s9  ;;  %v2677_v38 = vor.u32 %v2676_v57, %v2672_v25  ;;  %v3073_v12 = vor.u32 %v3071_v28, %v3070_v35  ;;  %v5058_v55 = vld [vmem:[%s6043_s28 + $0x50] sm:$0xc] }
  0xad   : > { %2810 = vrot.lane.b32.xlu0 %v2796_v42, %s5947_s30  ;;  %v6412_v42 = vld [vmem:[%s6043_s28 + $0x48] sm:$0xe] }
  0xae   : > { %v6376_v22 = vpop.permute.xlu1 %801 }
  0xaf   : > { %v6380_v26 = vpop.permute.xlu0 %799 }
  0xb0   : > { %8512 = vst [vmem:[#allocation14_spill] sm:$0xff] %v6380_v26  ;;  %3134 = vrot.lane.b32.xlu1 %v3066_v11, %s5949_s5  ;;  %v3276_v11 = vrot.slane %v3274_v54, 1  ;;  %v4949_v54 = vld [vmem:[%s6043_s28 + $0x44] sm:$0x7] }
  0xb1   : > { %2966 = vrot.lane.b32.xlu0 %v2889_v41, %s5948_s4  ;;  %v5274_v41 = vcombine.low %v6412_v42, %v4950_v0  ;;  %v2684_v0 = vor.u32 %v2683_v37, %v2679_v36  ;;  %v5308_v36 = vcombine.low %v6465_v15, %v5001_v52  ;;  %v6475_v37 = vld [vmem:[%s6043_s28 + $0x58] sm:$0xf] }
  0xb2   : > { %v6394_v39 = vpop.permute.xlu1 %805  ;;  %v3277_v31 = vor.u32 %v3276_v11, %v3272_v53  ;;  %v4974_v11 = vld [vmem:[%s6043_s28 + $0x4c] sm:$0xf] }
  0xb3   : > { %8513 = vst [vmem:[#allocation15_spill] sm:$0xff] %v6394_v39  ;;  %v6396_v6 = vpop.permute.xlu0 %803  ;;  %v2693_v25 = vshrl.u32 %v5274_v41, 16 }
  0xb4   : > { %8514 = vst [vmem:[#allocation16_spill] sm:$0xff] %v6396_v6  ;;  %3338 = vrot.lane.b32.xlu1 %v3270_v29, %s5951_s7  ;;  %v5855_v6 = vld [vmem:[%s6043_s28 + $0x10] sm:$0xf] }
  0xb5   : > { %3194 = vrot.lane.b32.xlu0 %v5318_v46, %s5950_s6  ;;  %v2695_v46 = vshll.u32 %v5274_v41, 16 }
  0xb6   : > { %v6404_v9 = vpop.permute.xlu1 %809 }
  0xb7   : > { %8515 = vst [vmem:[#allocation17_spill] sm:$0xff] %v6404_v9  ;;  %v6406_v30 = vpop.permute.xlu0 %807  ;;  %v2697_v57 = vrot.slane %v2695_v46, 1  ;;  %v5298_v46 = vcombine.low %v4986_v16, %v4974_v11  ;;  %v3075_v16 = vshrl.u32 %v5308_v36, 16 }
  0xb8   : > { %8516 = vst [vmem:[#allocation18_spill] sm:$0xff] %v6406_v30  ;;  %3566 = vrot.lane.b32.xlu1 %v3489_v40, %s5953_s9  ;;  %v5275_v40 = vcombine.low %v4963_v27, %v4951_v24  ;;  %v5286_v24 = vcombine.low %v6412_v42, %v4974_v11  ;;  %v2926_v42 = vshll.u32 %v5299_v3, 16  ;;  %v4990_v30 = vld [vmem:[%s6043_s28 + $0x68] sm:$0xc] }
  0xb9   : > { %3410 = vrot.lane.b32.xlu0 %v3396_v43, %s5952_s8  ;;  %v2698_v28 = vor.u32 %v2697_v57, %v2693_v25  ;;  %v2923_v25 = vshrl.u32 %v5299_v3, 16  ;;  %v3077_v52 = vrot.slane %v3075_v16, 7 }
  0xba   : > { %v6414_v49 = vpop.permute.xlu1 %813  ;;  %v2702_v50 = vshll.u32 %v5275_v40, 16  ;;  %v2700_v47 = vshrl.u32 %v5275_v40, 16  ;;  %v2800_v57 = vrot.slane %v5286_v24, 1  ;;  %v4973_v24 = vld [vmem:[%s6043_s28 + $0x44] sm:$0xf] }
  0xbb   : > { %8517 = vst [vmem:[#allocation19_spill] sm:$0xff] %v6414_v49  ;;  %v6418_v5 = vpop.permute.xlu0 %811 }
  0xbc   : > { %8518 = vst [vmem:[#allocation20_spill] sm:$0xff] %v6418_v5  ;;  %2812 = vrot.lane.b32.xlu1 %v2797_v14, %s5947_s30  ;;  %v6446_v14 = vld [vmem:[%s6043_s28 + $0x40] sm:$0xe]  ;;  %v2704_v53 = vrot.slane %v2702_v50, 1  ;;  %v6695_v5 = vld [vmem:[%s6043_s28 + $0x74] sm:$0x7] }
  0xbd   : > { %2740 = vrot.lane.b32.xlu0 %v2677_v38, %s5946_s29  ;;  %v5296_v38 = vcombine.low %v4984_v48, %v4972_v8 }
  0xbe   : > { %v6423_v23 = vpop.permute.xlu1 %817  ;;  %v2705_v34 = vor.u32 %v2704_v53, %v2700_v47  ;;  %v2925_v47 = vrot.slane %v2923_v25, 1  ;;  %v2928_v53 = vrot.slane %v2926_v42, 2  ;;  %v5285_v25 = vcombine.low %v6446_v14, %v4973_v24 }
  0xbf   : > { %8519 = vst [vmem:[#allocation21_spill] sm:$0xff] %v6423_v23  ;;  %v6427_v29 = vpop.permute.xlu0 %815  ;;  %v2902_v32 = vshll.u32 %v5296_v38, 16 }
  0xc0   : > { %8520 = vst [vmem:[#allocation22_spill] sm:$0xff] %v6427_v29  ;;  %3136 = vrot.lane.b32.xlu1 %v3073_v12, %s5949_s5  ;;  %v5273_v12 = vcombine.low %v6446_v14, %v4949_v54  ;;  %v2915_v54 = vshrl.u32 %v5298_v46, 16  ;;  %v4953_v29 = vld [vmem:[%s6043_s28 + $0x64] sm:$0x7] }
  0xc1   : > { %2968 = vrot.lane.b32.xlu0 %v2897_v17, %s5948_s4  ;;  %v5287_v17 = vcombine.low %v4963_v27, %v4975_v61  ;;  %v6482_v61 = vld [vmem:[%s6043_s28 + $0x50] sm:$0xf] }
  0xc2   : > { %v6434_v43 = vpop.permute.xlu1 %821  ;;  %v2686_v48 = vshrl.u32 %v5273_v12, 16  ;;  %v2917_v3 = vrot.slane %v2915_v54, 1 }
  0xc3   : > { %8521 = vst [vmem:[#allocation23_spill] sm:$0xff] %v6434_v43  ;;  %v6436_v1 = vpop.permute.xlu0 %819 }
  0xc4   : > { %8522 = vst [vmem:[#allocation24_spill] sm:$0xff] %v6436_v1  ;;  %3340 = vrot.lane.b32.xlu1 %v3277_v31, %s5951_s7  ;;  %v2899_v31 = vshrl.u32 %v5296_v38, 16 }
  0xc5   : > { %3196 = vrot.lane.b32.xlu0 %v5319_v4, %s5950_s6  ;;  %v2688_v4 = vshll.u32 %v5273_v12, 16  ;;  %v5311_v12 = vcombine.low %v6475_v37, %v5007_v60 }
  0xc6   : > { %v6442_v45 = vpop.permute.xlu1 %957  ;;  %v2901_v8 = vrot.slane %v2899_v31, 1  ;;  %v5310_v31 = vcombine.low %v6482_v61, %v5005_v63 }
  0xc7   : > { %8523 = vst [vmem:[#allocation25_spill] sm:$0xff] %v6442_v45  ;;  %v6448_v35 = vpop.permute.xlu0 %955  ;;  %v2690_v50 = vrot.slane %v2688_v4, 1  ;;  %v2929_v4 = vor.u32 %v2928_v53, %v2925_v47  ;;  %v3096_v42 = vshrl.u32 %v5311_v12, 16  ;;  %v3099_v14 = vshll.u32 %v5311_v12, 16 }
  0xc8   : > { %8524 = vst [vmem:[#allocation26_spill] sm:$0xff] %v6448_v35  ;;  %3568 = vrot.lane.b32.xlu1 %v3497_v62, %s5953_s9  ;;  %v2801_v62 = vrot.slane %v5287_v17, 1  ;;  %v3092_v53 = vshll.u32 %v5310_v31, 16  ;;  %v4824_v35 = vld [vmem:[%s6043_s28 + $0xc] sm:$0xf] }
  0xc9   : > { %3412 = vrot.lane.b32.xlu0 %v3397_v18, %s5952_s8  ;;  %v2904_v18 = vrot.slane %v2902_v32, 2  ;;  %v2691_v17 = vor.u32 %v2690_v50, %v2686_v48 }
  0xca   : > { %v6456_v13 = vpop.permute.xlu1 %961 }
  0xcb   : > { %8525 = vst [vmem:[#allocation27_spill] sm:$0xff] %v6456_v13  ;;  %v6459_v41 = vpop.permute.xlu0 %959  ;;  %v2905_v11 = vor.u32 %v2904_v18, %v2901_v8  ;;  %v3089_v18 = vshrl.u32 %v5310_v31, 16  ;;  %v5011_v13 = vld [vmem:[%s6043_s28 + $0x6c] sm:$0x3] }
  0xcc   : > { %8526 = vst [vmem:[#allocation28_spill] sm:$0xff] %v6459_v41  ;;  %2746 = vrot.lane.b32.xlu1 %v2698_v28, %s5946_s29  ;;  %v2918_v28 = vshll.u32 %v5298_v46, 16 }
  0xcd   : > { %2742 = vrot.lane.b32.xlu0 %v2684_v0, %s5946_s29  ;;  %v3091_v47 = vrot.slane %v3089_v18, 7  ;;  %v5023_v18 = vld [vmem:[%s6043_s28 + $0x5c] sm:$0x7] }
  0xce   : > { %v6468_v40 = vpop.permute.xlu1 %965 }
  0xcf   : > { %8527 = vst [vmem:[#allocation29_spill] sm:$0xff] %v6468_v40  ;;  %v6470_v27 = vpop.permute.xlu0 %963  ;;  %v6638_v40 = vld [vmem:[%s6043_s28 + $0x68] sm:$0xf] }
  0xd0   : > { %8528 = vst [vmem:[#allocation30_spill] sm:$0xff] %v6470_v27  ;;  %2814 = vrot.lane.b32.xlu1 %v2798_v20, %s5947_s30  ;;  %v2920_v20 = vrot.slane %v2918_v28, 2  ;;  %v3098_v28 = vrot.slane %v3096_v42, 7  ;;  %v4966_v27 = vld [vmem:[%s6043_s28 + $0x68] sm:$0xe] }
  0xd1   : > { %2748 = vrot.lane.b32.xlu0 %v2705_v34, %s5946_s29  ;;  %v4985_v34 = vld [vmem:[%s6043_s28 + $0x40] sm:$0xc] }
  0xd2   : > { %v6479_v38 = vpop.permute.xlu1 %969  ;;  %v5297_v8 = vcombine.low %v4985_v34, %v4973_v24  ;;  %v5020_v24 = vld [vmem:[%s6043_s28 + $0x44] sm:$0x7]  ;;  %v3101_v12 = vor.u32 %v3099_v14, %v3098_v28  ;;  %v5022_v14 = vld [vmem:[%s6043_s28 + $0x54] sm:$0x7] }
  0xd3   : > { %8529 = vst [vmem:[#allocation31_spill] sm:$0xff] %v6479_v38  ;;  %v6485_v0 = vpop.permute.xlu0 %967 }
  0xd4   : > { %8530 = vst [vmem:[#allocation32_spill] sm:$0xff] %v6485_v0  ;;  %2820 = vrot.lane.b32.xlu1 %v2801_v62, %s5947_s30  ;;  %v3078_v62 = vshll.u32 %v5308_v36, 16  ;;  %v2799_v36 = vrot.slane %v5285_v25, 1  ;;  %v2907_v60 = vshrl.u32 %v5297_v8, 16  ;;  %v2910_v63 = vshll.u32 %v5297_v8, 16 }
  0xd5   : > { %2818 = vrot.lane.b32.xlu0 %v2800_v57, %s5947_s30  ;;  %v2921_v57 = vor.u32 %v2920_v20, %v2917_v3  ;;  %v5003_v3 = vld [vmem:[%s6043_s28 + $0x4c] sm:$0x3] }
  0xd6   : > { %v6492_v32 = vpop.permute.xlu1 %973  ;;  %v3080_v54 = vor.u32 %v3078_v62, %v3077_v52  ;;  %v2912_v31 = vrot.slane %v2910_v63, 2  ;;  %v3094_v52 = vor.u32 %v3092_v53, %v3091_v47  ;;  %v6522_v62 = vld [vmem:[%s6043_s28 + $0x58] sm:$0xe] }
  0xd7   : > { %8531 = vst [vmem:[#allocation33_spill] sm:$0xff] %v6492_v32  ;;  %v6495_v46 = vpop.permute.xlu0 %971  ;;  %v5335_v28 = vcombine.low %v6522_v62, %v5023_v18 }
  0xd8   : > { %8532 = vst [vmem:[#allocation34_spill] sm:$0xff] %v6495_v46  ;;  %2970 = vrot.lane.b32.xlu1 %v2905_v11, %s5948_s4  ;;  %v6507_v11 = vld [vmem:[%s6043_s28 + $0x40] sm:$0xe] }
  0xd9   : > { %2744 = vrot.lane.b32.xlu0 %v2691_v17, %s5946_s29  ;;  %v6512_v17 = vld [vmem:[%s6043_s28 + $0x48] sm:$0xf]  ;;  %v5332_v34 = vcombine.low %v6507_v11, %v5020_v24 }
  0xda   : > { %v6500_v48 = vpop.permute.xlu1 %977  ;;  %v5309_v25 = vcombine.low %v6512_v17, %v5003_v3 }
  0xdb   : > { %8533 = vst [vmem:[#allocation35_spill] sm:$0xff] %v6500_v48  ;;  %v6502_v50 = vpop.permute.xlu0 %975  ;;  %v3279_v48 = vshrl.u32 %v5332_v34, 16 }
  0xdc   : > { %8534 = vst [vmem:[#allocation36_spill] sm:$0xff] %v6502_v50  ;;  %2976 = vrot.lane.b32.xlu1 %v2929_v4, %s5948_s4  ;;  %v2909_v4 = vrot.slane %v2907_v60, 1  ;;  %v3082_v47 = vshrl.u32 %v5309_v25, 16 }
  0xdd   : > { %2974 = vrot.lane.b32.xlu0 %v2921_v57, %s5948_s4  ;;  %v6528_v57 = vld [vmem:[%s6043_s28 + $0x50] sm:$0xe] }
  0xde   : > { %v6509_v16 = vpop.permute.xlu1 %1029  ;;  %v2913_v60 = vor.u32 %v2912_v31, %v2909_v4  ;;  %v5334_v63 = vcombine.low %v6528_v57, %v5022_v14  ;;  %v5322_v4 = vcombine.low %v6482_v61, %v5022_v14  ;;  %v3084_v31 = vrot.slane %v3082_v47, 7  ;;  %v6558_v47 = vld [vmem:[%s6043_s28 + $0x48] sm:$0xe] }
  0xdf   : > { %8535 = vst [vmem:[#allocation37_spill] sm:$0xff] %v6509_v16  ;;  %v6515_v20 = vpop.permute.xlu0 %1027 }
  0xe0   : > { %8536 = vst [vmem:[#allocation38_spill] sm:$0xff] %v6515_v20  ;;  %3138 = vrot.lane.b32.xlu1 %v3080_v54, %s5949_s5  ;;  %v5320_v54 = vcombine.low %v6465_v15, %v5020_v24  ;;  %v3302_v24 = vshll.u32 %v5335_v28, 16  ;;  %v3295_v43 = vshll.u32 %v5334_v63, 16  ;;  %v3293_v61 = vshrl.u32 %v5334_v63, 16  ;;  %v5046_v63 = vld [vmem:[%s6043_s28 + $0x54] sm:$0xf] }
  0xe1   : > { %2816 = vrot.lane.b32.xlu0 %v2799_v36, %s5947_s30  ;;  %v3281_v36 = vshll.u32 %v5332_v34, 16  ;;  %v3300_v34 = vshrl.u32 %v5335_v28, 16 }
  0xe2   : > { %v6525_v42 = vpop.permute.xlu1 %1033  ;;  %v3297_v14 = vrot.slane %v3295_v43, 1 }
  0xe3   : > { %8537 = vst [vmem:[#allocation39_spill] sm:$0xff] %v6525_v42  ;;  %v6530_v8 = vpop.permute.xlu0 %1031  ;;  %v3283_v15 = vrot.slane %v3281_v36, 1  ;;  %v5056_v36 = vld [vmem:[%s6043_s28 + $0x40] sm:$0xc] }
  0xe4   : > { %8538 = vst [vmem:[#allocation40_spill] sm:$0xff] %v6530_v8  ;;  %3144 = vrot.lane.b32.xlu1 %v3101_v12, %s5949_s5  ;;  %v5323_v12 = vcombine.low %v6475_v37, %v5023_v18  ;;  %v3304_v18 = vrot.slane %v3302_v24, 1  ;;  %v5021_v24 = vld [vmem:[%s6043_s28 + $0x4c] sm:$0x7]  ;;  %v3298_v43 = vor.u32 %v3297_v14, %v3293_v61  ;;  %v5063_v8 = vld [vmem:[%s6043_s28 + $0x78] sm:$0xc] }
  0xe5   : > { %3142 = vrot.lane.b32.xlu0 %v3094_v52, %s5949_s5  ;;  %v3085_v52 = vshll.u32 %v5309_v25, 16  ;;  %v3284_v37 = vor.u32 %v3283_v15, %v3279_v48  ;;  %v5044_v25 = vld [vmem:[%s6043_s28 + $0x44] sm:$0xf]  ;;  %v5321_v14 = vcombine.low %v6512_v17, %v5021_v24 }
  0xe6   : > { %v6539_v53 = vpop.permute.xlu1 %1037  ;;  %v3305_v48 = vor.u32 %v3304_v18, %v3300_v34  ;;  %v5344_v28 = vcombine.low %v6507_v11, %v5044_v25  ;;  %v5356_v15 = vcombine.low %v5056_v36, %v5044_v25  ;;  %v5346_v11 = vcombine.low %v6528_v57, %v5046_v63 }
  0xe7   : > { %8539 = vst [vmem:[#allocation41_spill] sm:$0xff] %v6539_v53  ;;  %v6541_v3 = vpop.permute.xlu0 %1035  ;;  %v5358_v25 = vcombine.low %v5058_v55, %v5046_v63  ;;  %v5057_v55 = vld [vmem:[%s6043_s28 + $0x48] sm:$0xc] }
  0xe8   : > { %8540 = vst [vmem:[#allocation42_spill] sm:$0xff] %v6541_v3  ;;  %3198 = vrot.lane.b32.xlu1 %v5320_v54, %s5950_s6  ;;  %v3087_v54 = vor.u32 %v3085_v52, %v3084_v31  ;;  %v5333_v31 = vcombine.low %v6558_v47, %v5021_v24  ;;  %v5059_v52 = vld [vmem:[%s6043_s28 + $0x58] sm:$0xc]  ;;  %v3398_v34 = vrot.slane %v5344_v28, 1  ;;  %v3502_v61 = vshll.u32 %v5356_v15, 16 }
  0xe9   : > { %2972 = vrot.lane.b32.xlu0 %v2913_v60, %s5948_s4  ;;  %v3400_v32 = vrot.slane %v5346_v11, 1  ;;  %v3518_v23 = vshll.u32 %v5358_v25, 16 }
  0xea   : > { %v6547_v2 = vpop.permute.xlu1 %1041  ;;  %v3288_v36 = vshll.u32 %v5333_v31, 16  ;;  %v3286_v28 = vshrl.u32 %v5333_v31, 16 }
  0xeb   : > { %8541 = vst [vmem:[#allocation43_spill] sm:$0xff] %v6547_v2  ;;  %v6549_v50 = vpop.permute.xlu0 %1039 }
  0xec   : > { %8542 = vst [vmem:[#allocation44_spill] sm:$0xff] %v6549_v50  ;;  %3204 = vrot.lane.b32.xlu1 %v5323_v12, %s5950_s6  ;;  %v3290_v63 = vrot.slane %v3288_v36, 1  ;;  %v4954_v50 = vld [vmem:[%s6043_s28 + $0x6c] sm:$0x7] }
  0xed   : > { %3202 = vrot.lane.b32.xlu0 %v5322_v4, %s5950_s6  ;;  %v5047_v4 = vld [vmem:[%s6043_s28 + $0x5c] sm:$0xf] }
  0xee   : > { %v6555_v60 = vpop.permute.xlu1 %1045  ;;  %v5359_v18 = vcombine.low %v5059_v52, %v5047_v4  ;;  %v3515_v52 = vshrl.u32 %v5358_v25, 16  ;;  %v3520_v25 = vrot.slane %v3518_v23, 2 }
  0xef   : > { %8543 = vst [vmem:[#allocation45_spill] sm:$0xff] %v6555_v60  ;;  %v6560_v12 = vpop.permute.xlu0 %1043 }
  0xf0   : > { %8544 = vst [vmem:[#allocation46_spill] sm:$0xff] %v6560_v12  ;;  %3342 = vrot.lane.b32.xlu1 %v3284_v37, %s5951_s7  ;;  %v5347_v37 = vcombine.low %v6522_v62, %v5047_v4  ;;  %v6584_v62 = vld [vmem:[%s6043_s28 + $0x58] sm:$0xe]  ;;  %v5045_v4 = vld [vmem:[%s6043_s28 + $0x4c] sm:$0xf]  ;;  %v3523_v17 = vshrl.u32 %v5359_v18, 16 }
  0xf1   : > { %3140 = vrot.lane.b32.xlu0 %v3087_v54, %s5949_s5  ;;  %v3499_v54 = vshrl.u32 %v5356_v15, 16  ;;  %v3526_v24 = vshll.u32 %v5359_v18, 16  ;;  %v5357_v11 = vcombine.low %v5057_v55, %v5045_v4  ;;  %v3517_v36 = vrot.slane %v3515_v52, 1  ;;  %v6614_v52 = vld [vmem:[%s6043_s28 + $0x60] sm:$0xf] }
  0xf2   : > { %v6570_v1 = vpop.permute.xlu1 %1049  ;;  %v3525_v18 = vrot.slane %v3523_v17, 1 }
  0xf3   : > { %8545 = vst [vmem:[#allocation47_spill] sm:$0xff] %v6570_v1  ;;  %v6573_v60 = vpop.permute.xlu0 %1047  ;;  %v3501_v15 = vrot.slane %v3499_v54, 1  ;;  %v3528_v54 = vrot.slane %v3526_v24, 2  ;;  %v3521_v23 = vor.u32 %v3520_v25, %v3517_v36  ;;  %v4977_v25 = vld [vmem:[%s6043_s28 + $0x64] sm:$0xf] }
  0xf4   : > { %8546 = vst [vmem:[#allocation48_spill] sm:$0xff] %v6573_v60  ;;  %3348 = vrot.lane.b32.xlu1 %v3305_v48, %s5951_s7  ;;  %v4952_v60 = vld [vmem:[%s6043_s28 + $0x5c] sm:$0x7]  ;;  %v3401_v48 = vrot.slane %v5347_v37, 1 }
  0xf5   : > { %3346 = vrot.lane.b32.xlu0 %v3298_v43, %s5951_s7  ;;  %v3504_v43 = vrot.slane %v3502_v61, 2  ;;  %v5276_v56 = vcombine.low %v6584_v62, %v4952_v60  ;;  %v4976_v61 = vld [vmem:[%s6043_s28 + $0x5c] sm:$0xf]  ;;  %v4988_v60 = vld [vmem:[%s6043_s28 + $0x58] sm:$0xc] }
  0xf6   : > { %v6580_v1 = vpop.permute.xlu1 %1113 }
  0xf7   : > { %8547 = vst [vmem:[#allocation49_spill] sm:$0xff] %v6580_v1  ;;  %v6586_v57 = vpop.permute.xlu0 %1111  ;;  %v2709_v12 = vshll.u32 %v5276_v56, 16  ;;  %v2707_v17 = vshrl.u32 %v5276_v56, 16  ;;  %v4991_v1 = vld [vmem:[%s6043_s28 + $0x70] sm:$0xc] }
  0xf8   : > { %8548 = vst [vmem:[#allocation50_spill] sm:$0xff] %v6586_v57  ;;  %3414 = vrot.lane.b32.xlu1 %v3398_v34, %s5952_s8  ;;  %v3505_v34 = vor.u32 %v3504_v43, %v3501_v15  ;;  %v3507_v15 = vshrl.u32 %v5357_v11, 16  ;;  %v5300_v43 = vcombine.low %v4988_v60, %v4976_v61  ;;  %v4989_v60 = vld [vmem:[%s6043_s28 + $0x60] sm:$0xc] }
  0xf9   : > { %3200 = vrot.lane.b32.xlu0 %v5321_v14, %s5950_s6  ;;  %v3291_v14 = vor.u32 %v3290_v63, %v3286_v28  ;;  %v3510_v28 = vshll.u32 %v5357_v11, 16  ;;  %v2711_v24 = vrot.slane %v2709_v12, 1  ;;  %v5277_v63 = vcombine.low %v6605_v58, %v4953_v29 }
  0xfa   : > { %v6593_v37 = vpop.permute.xlu1 %1117  ;;  %v2934_v56 = vshll.u32 %v5300_v43, 16 }
  0xfb   : > { %8549 = vst [vmem:[#allocation51_spill] sm:$0xff] %v6593_v37  ;;  %v6595_v31 = vpop.permute.xlu0 %1115  ;;  %v5009_v37 = vld [vmem:[%s6043_s28 + $0x64] sm:$0x3]  ;;  %v3512_v11 = vrot.slane %v3510_v28, 2  ;;  %v2712_v29 = vor.u32 %v2711_v24, %v2707_v17  ;;  %v5301_v17 = vcombine.low %v4989_v60, %v4977_v25  ;;  %v5036_v24 = vld [vmem:[%s6043_s28 + $0x60] sm:$0xe] }
  0xfc   : > { %8550 = vst [vmem:[#allocation52_spill] sm:$0xff] %v6595_v31  ;;  %3420 = vrot.lane.b32.xlu1 %v3401_v48, %s5952_s8  ;;  %v5345_v48 = vcombine.low %v6558_v47, %v5045_v4  ;;  %v5312_v12 = vcombine.low %v6614_v52, %v5009_v37  ;;  %v2936_v37 = vrot.slane %v2934_v56, 2  ;;  %v4979_v31 = vld [vmem:[%s6043_s28 + $0x74] sm:$0xf] }
  0xfd   : > { %3418 = vrot.lane.b32.xlu0 %v3400_v32, %s5952_s8  ;;  %v3529_v32 = vor.u32 %v3528_v54, %v3525_v18  ;;  %v2931_v18 = vshrl.u32 %v5300_v43, 16  ;;  %v5288_v54 = vcombine.low %v6584_v62, %v4976_v61  ;;  %v5024_v43 = vld [vmem:[%s6043_s28 + $0x64] sm:$0x7]  ;;  %v2714_v61 = vshrl.u32 %v5277_v63, 16 }
  0xfe   : > { %v6601_v46 = vpop.permute.xlu1 %2806  ;;  %v3399_v4 = vrot.slane %v5345_v48, 1  ;;  %v3103_v28 = vshrl.u32 %v5312_v12, 16  ;;  %v5336_v56 = vcombine.low %v5036_v24, %v5024_v43 }
  0xff   : > { %v6607_v55 = vpop.permute.xlu0 %2734  ;;  %v2802_v62 = vrot.slane %v5288_v54, 1  ;;  %v2942_v54 = vshll.u32 %v5301_v17, 16 }
 0x100   : > { %3570 = vrot.lane.b32.xlu1 %v3505_v34, %s5953_s9  ;;  %v3509_v34 = vrot.slane %v3507_v15, 1 }
 0x101   : > { %3344 = vrot.lane.b32.xlu0 %v3291_v14, %s5951_s7  ;;  %v2716_v14 = vshll.u32 %v5277_v63, 16 }
 0x102   : > { %v6617_v53 = vpop.permute.xlu1 %2962  ;;  %v3513_v15 = vor.u32 %v3512_v11, %v3509_v34  ;;  %v3105_v11 = vrot.slane %v3103_v28, 7  ;;  %v2944_v28 = vrot.slane %v2942_v54, 2 }
 0x103   : > { %v6619_v47 = vpop.permute.xlu0 %2736 }
 0x104   : > { %3576 = vrot.lane.b32.xlu1 %v3529_v32, %s5953_s9  ;;  %v2933_v32 = vrot.slane %v2931_v18, 1  ;;  %v5289_v18 = vcombine.low %v6605_v58, %v4977_v25  ;;  %v5048_v58 = vld [vmem:[%s6043_s28 + $0x64] sm:$0xf] }
 0x105   : > { %3574 = vrot.lane.b32.xlu0 %v3521_v23, %s5953_s9  ;;  %v2718_v23 = vrot.slane %v2716_v14, 1  ;;  %v5313_v14 = vcombine.low %v6638_v40, %v5011_v13  ;;  %v5025_v13 = vld [vmem:[%s6043_s28 + $0x6c] sm:$0x7] }
 0x106   : > { %v6625_v36 = vpop.permute.xlu1 %3130  ;;  %v2937_v34 = vor.u32 %v2936_v37, %v2933_v32  ;;  %v3309_v32 = vshll.u32 %v5336_v56, 16  ;;  %v2803_v25 = vrot.slane %v5289_v18, 1 }
 0x107   : > { %v6629_v48 = vpop.permute.xlu0 %2808  ;;  %v2719_v63 = vor.u32 %v2718_v23, %v2714_v61  ;;  %v5060_v61 = vld [vmem:[%s6043_s28 + $0x60] sm:$0xc]  ;;  %v3113_v54 = vshll.u32 %v5313_v14, 16 }
 0x108   : > { %3416 = vrot.lane.b32.xlu1 %v3399_v4, %s5952_s8  ;;  %v3106_v4 = vshll.u32 %v5312_v12, 16  ;;  %v5360_v18 = vcombine.low %v5060_v61, %v5048_v58  ;;  %v5061_v61 = vld [vmem:[%s6043_s28 + $0x68] sm:$0xc] }
 0x109   : > { %2750 = vrot.lane.b32.xlu0 %v2712_v29, %s5946_s29  ;;  %v2939_v29 = vshrl.u32 %v5301_v17, 16  ;;  %v5037_v17 = vld [vmem:[%s6043_s28 + $0x68] sm:$0xe] }
 0x10a   : > { %v6635_v42 = vpop.permute.xlu1 %3190  ;;  %v5337_v3 = vcombine.low %v5037_v17, %v5025_v13 }
 0x10b   : > { %v6641_v9 = vpop.permute.xlu0 %2964  ;;  %v2941_v37 = vrot.slane %v2939_v29, 1 }
 0x10c   : > { %3572 = vrot.lane.b32.xlu1 %v3513_v15, %s5953_s9  ;;  %v3108_v15 = vor.u32 %v3106_v4, %v3105_v11  ;;  %v5324_v4 = vcombine.low %v6614_v52, %v5024_v43  ;;  %v3311_v11 = vrot.slane %v3309_v32, 1  ;;  %v5348_v43 = vcombine.low %v5036_v24, %v5048_v58  ;;  %v5049_v32 = vld [vmem:[%s6043_s28 + $0x6c] sm:$0xf] }
 0x10d   : > { %2822 = vrot.lane.b32.xlu0 %v2802_v62, %s5947_s30  ;;  %v3110_v62 = vshrl.u32 %v5313_v14, 16  ;;  %v3316_v14 = vshll.u32 %v5337_v3, 16 }
 0x10e   : > { %v6647_v60 = vpop.permute.xlu1 %3334  ;;  %v3402_v24 = vrot.slane %v5348_v43, 1  ;;  %v5349_v43 = vcombine.low %v5037_v17, %v5049_v32 }
 0x10f   : > { %v6649_v12 = vpop.permute.xlu0 %3132  ;;  %v3112_v29 = vrot.slane %v3110_v62, 7 }
 0x110   : > { %2978 = vrot.lane.b32.xlu1 %v2937_v34, %s5948_s4  ;;  %v3307_v34 = vshrl.u32 %v5336_v56, 16  ;;  %v3531_v56 = vshrl.u32 %v5360_v18, 16 }
 0x111   : > { %2752 = vrot.lane.b32.xlu0 %v2719_v63, %s5946_s29  ;;  %v2945_v63 = vor.u32 %v2944_v28, %v2941_v37  ;;  %v5278_v37 = vcombine.low %v4966_v27, %v4954_v50  ;;  %v6682_v50 = vld [vmem:[%s6043_s28 + $0x70] sm:$0xf] }
 0x112   : > { %v6655_v23 = vpop.permute.xlu1 %3406  ;;  %v3312_v52 = vor.u32 %v3311_v11, %v3307_v34  ;;  %v3533_v58 = vrot.slane %v3531_v56, 1  ;;  %v3314_v11 = vshrl.u32 %v5337_v3, 16 }
 0x113   : > { %v6659_v39 = vpop.permute.xlu0 %3192 }
 0x114   : > { %3146 = vrot.lane.b32.xlu1 %v3108_v15, %s5949_s5  ;;  %v3534_v15 = vshll.u32 %v5360_v18, 16  ;;  %v5325_v18 = vcombine.low %v6638_v40, %v5025_v13 }
 0x115   : > { %2824 = vrot.lane.b32.xlu0 %v2803_v25, %s5947_s30  ;;  %v3115_v25 = vor.u32 %v3113_v54, %v3112_v29  ;;  %v2723_v29 = vshll.u32 %v5278_v37, 16  ;;  %v5013_v54 = vld [vmem:[%s6043_s28 + $0x74] sm:$0x3] }
 0x116   : > { %v6664_v33 = vpop.permute.xlu1 %3562  ;;  %v3536_v34 = vrot.slane %v3534_v15, 2  ;;  %v5314_v40 = vcombine.low %v6682_v50, %v5013_v54 }
 0x117   : > { %v6668_v2 = vpop.permute.xlu0 %3336 }
 0x118   : > { %3206 = vrot.lane.b32.xlu1 %v5324_v4, %s5950_s6  ;;  %v5361_v4 = vcombine.low %v5061_v61, %v5049_v32  ;;  %v4978_v61 = vld [vmem:[%s6043_s28 + $0x6c] sm:$0xf]  ;;  %v3537_v3 = vor.u32 %v3536_v34, %v3533_v58  ;;  %v3403_v32 = vrot.slane %v5349_v43, 1  ;;  %v3117_v34 = vshrl.u32 %v5314_v40, 16 }
 0x119   : > { %2980 = vrot.lane.b32.xlu0 %v2945_v63, %s5948_s4  ;;  %v3318_v63 = vrot.slane %v3316_v14, 1  ;;  %v2725_v14 = vrot.slane %v2723_v29, 1  ;;  %v5302_v38 = vcombine.low %v4990_v30, %v4978_v61 }
 0x11a   : > { %v6674_v28 = vpop.permute.xlu1 %3408  ;;  %v3539_v56 = vshrl.u32 %v5361_v4, 16  ;;  %v3542_v15 = vshll.u32 %v5361_v4, 16  ;;  %v5290_v4 = vcombine.low %v4966_v27, %v4978_v61 }
 0x11b   : > { %v6676_v62 = vpop.permute.xlu0 %2738  ;;  %v3319_v13 = vor.u32 %v3318_v63, %v3314_v11  ;;  %v5338_v11 = vcombine.low %v5038_v10, %v6695_v5  ;;  %v2947_v63 = vshrl.u32 %v5302_v38, 16  ;;  %v2950_v29 = vshll.u32 %v5302_v38, 16  ;;  %v4967_v38 = vld [vmem:[%s6043_s28 + $0x70] sm:$0xe] }
 0x11c   : > { %3350 = vrot.lane.b32.xlu1 %v3312_v52, %s5951_s7  ;;  %v3544_v58 = vrot.slane %v3542_v15, 2  ;;  %v2804_v27 = vrot.slane %v5290_v4, 1  ;;  %v3120_v15 = vshll.u32 %v5314_v40, 16 }
 0x11d   : > { %3148 = vrot.lane.b32.xlu0 %v3115_v25, %s5949_s5  ;;  %v2721_v25 = vshrl.u32 %v5278_v37, 16  ;;  %v5062_v37 = vld [vmem:[%s6043_s28 + $0x70] sm:$0xc]  ;;  %v3323_v21 = vshll.u32 %v5338_v11, 16 }
 0x11e   : > { %v6685_v0 = vpop.permute.xlu1 %3564 }
 0x11f   : > { %v6689_v52 = vpop.permute.xlu0 %2810  ;;  %v2726_v30 = vor.u32 %v2725_v14, %v2721_v25  ;;  %v2952_v25 = vrot.slane %v2950_v29, 2  ;;  %v4955_v14 = vld [vmem:[%s6043_s28 + $0x74] sm:$0x7] }
 0x120   : > { %3422 = vrot.lane.b32.xlu1 %v3402_v24, %s5952_s8  ;;  %v3541_v24 = vrot.slane %v3539_v56, 1 }
 0x121   : > { %3208 = vrot.lane.b32.xlu0 %v5325_v18, %s5950_s6  ;;  %v5050_v18 = vld [vmem:[%s6043_s28 + $0x74] sm:$0xf] }
 0x122   : > { %v6698_v49 = vpop.permute.xlu1 %3134  ;;  %v5362_v61 = vcombine.low %v5062_v37, %v5050_v18  ;;  %v3545_v56 = vor.u32 %v3544_v58, %v3541_v24  ;;  %v3321_v24 = vshrl.u32 %v5338_v11, 16  ;;  %v3325_v58 = vrot.slane %v3323_v21, 1 }
 0x123   : > { %v6700_v17 = vpop.permute.xlu0 %2966 }
 0x124   : > { %3578 = vrot.lane.b32.xlu1 %v3537_v3, %s5953_s9  ;;  %v3119_v3 = vrot.slane %v3117_v34, 7  ;;  %v3547_v37 = vshrl.u32 %v5362_v61, 16  ;;  %v5279_v34 = vcombine.low %v4967_v38, %v4955_v14  ;;  %v3326_v11 = vor.u32 %v3325_v58, %v3321_v24  ;;  %v6740_v14 = vld [vmem:[%s6043_s28 + $0x78] sm:$0xe] }
 0x125   : > { %3352 = vrot.lane.b32.xlu0 %v3319_v13, %s5951_s7  ;;  %v2949_v13 = vrot.slane %v2947_v63, 1  ;;  %v5291_v24 = vcombine.low %v4967_v38, %v4979_v31 }
 0x126   : > { %v6707_v54 = vpop.permute.xlu1 %3338  ;;  %v3122_v40 = vor.u32 %v3120_v15, %v3119_v3  ;;  %v5350_v3 = vcombine.low %v5038_v10, %v5050_v18  ;;  %v2730_v15 = vshll.u32 %v5279_v34, 16  ;;  %v2728_v58 = vshrl.u32 %v5279_v34, 16 }
 0x127   : > { %v6709_v43 = vpop.permute.xlu0 %3194  ;;  %v2953_v63 = vor.u32 %v2952_v25, %v2949_v13  ;;  %v5303_v13 = vcombine.low %v4991_v1, %v4979_v31  ;;  %v6737_v25 = vld [vmem:[%s6043_s28 + $0x7c] sm:$0x7]  ;;  %v2805_v31 = vrot.slane %v5291_v24, 1 }
 0x128   : > { %3424 = vrot.lane.b32.xlu1 %v3403_v32, %s5952_s8  ;;  %v3550_v32 = vshll.u32 %v5362_v61, 16  ;;  %v3549_v61 = vrot.slane %v3547_v37, 1 }
 0x129   : > { %2754 = vrot.lane.b32.xlu0 %v2726_v30, %s5946_s29  ;;  %v5015_v30 = vld [vmem:[%s6043_s28 + $0x7c] sm:$0x3]  ;;  %v2955_v1 = vshrl.u32 %v5303_v13, 16 }
 0x12a   : > { %v6715_v44 = vpop.permute.xlu1 %3566  ;;  %v5315_v21 = vcombine.low %v6721_v19, %v5015_v30  ;;  %v2732_v30 = vrot.slane %v2730_v15, 1 }
 0x12b   : > { %v6717_v4 = vpop.permute.xlu0 %3410  ;;  %v2957_v15 = vrot.slane %v2955_v1, 1 }
 0x12c   : > { %3580 = vrot.lane.b32.xlu1 %v3545_v56, %s5953_s9  ;;  %v3552_v56 = vrot.slane %v3550_v32, 2  ;;  %v3404_v32 = vrot.slane %v5350_v3, 1  ;;  %v3127_v3 = vshll.u32 %v5315_v21, 16 }
 0x12d   : > { %2826 = vrot.lane.b32.xlu0 %v2804_v27, %s5947_s30  ;;  %v5326_v27 = vcombine.low %v6682_v50, %v6695_v5  ;;  %v5339_v5 = vcombine.low %v6740_v14, %v6737_v25  ;;  %v2958_v50 = vshll.u32 %v5303_v13, 16  ;;  %v4800_v13 = vld [vmem:[%s6043_s28 + $0xc] sm:$0x7] }
 0x12e   : > { %v6725_v29 = vpop.permute.xlu1 %2812  ;;  %v3553_v18 = vor.u32 %v3552_v56, %v3549_v61 }
 0x12f   : > { %v6729_v57 = vpop.permute.xlu0 %2740  ;;  %v3330_v38 = vshll.u32 %v5339_v5, 16 }
 0x130   : > { %3150 = vrot.lane.b32.xlu1 %v3122_v40, %s5949_s5  ;;  %v3124_v40 = vshrl.u32 %v5315_v21, 16 }
 0x131   : > { %2982 = vrot.lane.b32.xlu0 %v2953_v63, %s5948_s4  ;;  %v5051_v63 = vld [vmem:[%s6043_s28 + $0x7c] sm:$0xf] }
 0x132   : > { %v6742_v37 = vpop.permute.xlu1 %3136  ;;  %v3126_v56 = vrot.slane %v3124_v40, 7  ;;  %v5363_v34 = vcombine.low %v5063_v8, %v5051_v63  ;;  %v6764_v40 = vld [vmem:[%s6043_s28 + $0x14] sm:$0x7]  ;;  %v3332_v8 = vrot.slane %v3330_v38, 1 }
 0x133   : > { %v6744_v10 = vpop.permute.xlu0 %2968 }
 0x134   : > { %3354 = vrot.lane.b32.xlu1 %v3326_v11, %s5951_s7  ;;  %v2733_v11 = vor.u32 %v2732_v30, %v2728_v58  ;;  %v3129_v21 = vor.u32 %v3127_v3, %v3126_v56  ;;  %v3555_v24 = vshrl.u32 %v5363_v34, 16  ;;  %v5854_v58 = vld [vmem:[%s6043_s28 + $0x8] sm:$0xf]  ;;  %v5137_v56 = vcombine.low %v5855_v6, %v6764_v40 }
 0x135   : > { %3210 = vrot.lane.b32.xlu0 %v5326_v27, %s5950_s6  ;;  %v2960_v27 = vrot.slane %v2958_v50, 2  ;;  %v5136_v30 = vcombine.low %v5854_v58, %v4800_v13  ;;  %v4812_v50 = vld [vmem:[%s6043_s28 + $0x8] sm:$0xe] }
 0x136   : > { %v6752_v20 = vpop.permute.xlu1 %3340  ;;  %v1181_v6 = vshll.u32 %v5137_v56, 16 }
 0x137   : > { %v6754_v61 = vpop.permute.xlu0 %3196  ;;  %v2961_v1 = vor.u32 %v2960_v27, %v2957_v15  ;;  %v1174_v26 = vshll.u32 %v5136_v30, 16  ;;  %v5351_v15 = vcombine.low %v6740_v14, %v5051_v63  ;;  %v4813_v14 = vld [vmem:[%s6043_s28 + $0x10] sm:$0xe]  ;;  %v6792_v63 = vld [vmem:[%s6043_s28 + $0x14] sm:$0xf] }
 0x138   : > { %3582 = vrot.lane.b32.xlu1 %v3553_v18, %s5953_s9  ;;  %v3328_v18 = vshrl.u32 %v5339_v5, 16 }
 0x139   : > { %3426 = vrot.lane.b32.xlu0 %v3404_v32, %s5952_s8  ;;  %v3558_v32 = vshll.u32 %v5363_v34, 16  ;;  %v5160_v34 = vcombine.low %v4812_v50, %v4824_v35 }
 0x13a   : > { %v6759_v16 = vpop.permute.xlu1 %3568  ;;  %v3333_v5 = vor.u32 %v3332_v8, %v3328_v18  ;;  %v5148_v18 = vcombine.low %v4812_v50, %v4800_v13 }
 0x13b   : > { %v6761_v41 = vpop.permute.xlu0 %3412  ;;  %v3560_v38 = vrot.slane %v3558_v32, 2  ;;  %v1388_v8 = vshrl.u32 %v5160_v34, 16  ;;  %v1172_v32 = vshrl.u32 %v5136_v30, 16 }
 0x13c   : > { %2828 = vrot.lane.b32.xlu1 %v2805_v31, %s5947_s30  ;;  %v3557_v31 = vrot.slane %v3555_v24, 1  ;;  %v1391_v24 = vshll.u32 %v5160_v34, 16  ;;  %v1315_v13 = vrot.slane %v5148_v18, 1  ;;  %v4848_v34 = vld [vmem:[%s6043_s28 + $0x10] sm:$0xf]  ;;  %v5149_v18 = vcombine.low %v4813_v14, %v6764_v40  ;;  %s5960_s30 = smov 42  }
 0x13d   : > { %2756 = vrot.lane.b32.xlu0 %v2733_v11, %s5946_s29  ;;  %v5327_v11 = vcombine.low %v6721_v19, %v6737_v25  ;;  %v3405_v19 = vrot.slane %v5351_v15, 1  ;;  %v1390_v30 = vrot.slane %v1388_v8, 1  ;;  %s5888_s29 = scalar_lea.vmem %s5887_s27, 64 }
 0x13e   : > { %v6771_v45 = vpop.permute.xlu1 %2746  ;;  %v1393_v50 = vrot.slane %v1391_v24, 2  ;;  %v1316_v40 = vrot.slane %v5149_v18, 1 }
 0x13f   : > { %v6775_v3 = vpop.permute.xlu0 %2742 }
 0x140   : > { %3152 = vrot.lane.b32.xlu1 %v3129_v21, %s5949_s5  ;;  %v3561_v21 = vor.u32 %v3560_v38, %v3557_v31  ;;  %v4836_v31 = vld [vmem:[%s6043_s28 + $0x8] sm:$0xc]  ;;  %v5161_v38 = vcombine.low %v4813_v14, %v6792_v63  ;;  %v4849_v14 = vld [vmem:[%s6043_s28 + $0x14] sm:$0x3] }
 0x141   : > { %2984 = vrot.lane.b32.xlu0 %v2961_v1, %s5948_s4  ;;  %v1176_v1 = vrot.slane %v1174_v26, 1  ;;  %s5961_s4 = smov 45  }
 0x142   : > { %v6782_v27 = vpop.permute.xlu1 %2814 }
 0x143   : > { %8551 = vst [vmem:[#allocation53_spill] sm:$0xff] %v6782_v27  ;;  %v6784_v58 = vpop.permute.xlu0 %2748  ;;  %v1179_v27 = vshrl.u32 %v5137_v56, 16  ;;  %v1177_v26 = vor.u32 %v1176_v1, %v1172_v32  ;;  %v1396_v32 = vshrl.u32 %v5161_v38, 16  ;;  %v1399_v1 = vshll.u32 %v5161_v38, 16  ;;  %v4850_v38 = vld [vmem:[%s6043_s28 + $0x18] sm:$0xf] }
 0x144   : > { %8552 = vst [vmem:[#allocation54_spill] sm:$0xff] %v6784_v58  ;;  %3356 = vrot.lane.b32.xlu1 %v3333_v5, %s5951_s7  ;;  %v1183_v5 = vrot.slane %v1181_v6, 1  ;;  %v1394_v6 = vor.u32 %v1393_v50, %v1390_v30  ;;  %v6818_v50 = vld [vmem:[%s6043_s28 + $0x14] sm:$0xf] }
 0x145   : > { %3212 = vrot.lane.b32.xlu0 %v5327_v11, %s5950_s6  ;;  %v4872_v11 = vld [vmem:[%s6043_s28 + $0x14] sm:$0x7]  ;;  %v1398_v30 = vrot.slane %v1396_v32, 1 }
 0x146   : > { %v6788_v25 = vpop.permute.xlu1 %2820  ;;  %v5196_v8 = vcombine.low %v4848_v34, %v4872_v11  ;;  %v1184_v24 = vor.u32 %v1183_v5, %v1179_v27  ;;  %v1401_v27 = vrot.slane %v1399_v1, 2  ;;  %v4884_v5 = vld [vmem:[%s6043_s28 + $0x10] sm:$0xe] }
 0x147   : > { %8553 = vst [vmem:[#allocation55_spill] sm:$0xff] %v6788_v25  ;;  %v6794_v58 = vpop.permute.xlu0 %2818  ;;  %v5220_v32 = vcombine.low %v4884_v5, %v6818_v50 }
 0x148   : > { %8554 = vst [vmem:[#allocation56_spill] sm:$0xff] %v6794_v58  ;;  %3584 = vrot.lane.b32.xlu1 %v3561_v21, %s5953_s9  ;;  %v5172_v21 = vcombine.low %v4836_v31, %v4824_v35  ;;  %v4837_v31 = vld [vmem:[%s6043_s28 + $0x10] sm:$0xc]  ;;  %v1700_v18 = vshrl.u32 %v5196_v8, 16  ;;  %v1402_v1 = vor.u32 %v1401_v27, %v1398_v30  ;;  %v5856_v58 = vld [vmem:[%s6043_s28 + $0x18] sm:$0xf] }
 0x149   : > { %3428 = vrot.lane.b32.xlu0 %v3405_v19, %s5952_s8  ;;  %v4851_v27 = vld [vmem:[%s6043_s28 + $0x1c] sm:$0x3] }
 0x14a   : > { %v6802_v15 = vpop.permute.xlu1 %2970  ;;  %v1543_v35 = vrot.slane %v5172_v21, 2  ;;  %v5184_v21 = vcombine.low %v4848_v34, %v4849_v14  ;;  %v1919_v14 = vshll.u32 %v5220_v32, 16 }
 0x14b   : > { %8555 = vst [vmem:[#allocation57_spill] sm:$0xff] %v6802_v15  ;;  %v6804_v56 = vpop.permute.xlu0 %2744 }
 0x14c   : > { %8556 = vst [vmem:[#allocation58_spill] sm:$0xff] %v6804_v56  ;;  %1327 = vrot.lane.b32.xlu1 %v1315_v13, %s5952_s8  ;;  %v1702_v13 = vshll.u32 %v5196_v8, 16  ;;  %v5208_v8 = vcombine.low %v4884_v5, %v4872_v11 }
 0x14d   : > { %1255 = vrot.lane.b32.xlu0 %v1177_v26, %s5951_s7 }
 0x14e   : > { %v6809_v19 = vpop.permute.xlu1 %2976  ;;  %v1843_v11 = vrot.slane %v5208_v8, 1 }
 0x14f   : > { %8557 = vst [vmem:[#allocation59_spill] sm:$0xff] %v6809_v19  ;;  %v6811_v56 = vpop.permute.xlu0 %2974 }
 0x150   : > { %8558 = vst [vmem:[#allocation60_spill] sm:$0xff] %v6811_v56  ;;  %1483 = vrot.lane.b32.xlu1 %v1394_v6, %s5953_s9  ;;  %v6825_v56 = vld [vmem:[%s6043_s28 + $0x1c] sm:$0x7] }
 0x151   : > { %1257 = vrot.lane.b32.xlu0 %v1184_v24, %s5951_s7  ;;  %v6830_v6 = vld [vmem:[%s6043_s28 + $0x1c] sm:$0x7]  ;;  %v1704_v24 = vrot.slane %v1702_v13, 1  ;;  %v5197_v15 = vcombine.low %v4850_v38, %v6825_v56 }
 0x152   : > { %v6820_v26 = vpop.permute.xlu1 %3138  ;;  %v5138_v25 = vcombine.low %v5856_v58, %v6830_v6  ;;  %v6849_v58 = vld [vmem:[%s6043_s28 + $0x18] sm:$0xf] }
 0x153   : > { %8559 = vst [vmem:[#allocation61_spill] sm:$0xff] %v6820_v26  ;;  %v6827_v19 = vpop.permute.xlu0 %2816  ;;  %v5173_v26 = vcombine.low %v4837_v31, %v6792_v63  ;;  %v1705_v34 = vor.u32 %v1704_v24, %v1700_v18  ;;  %v1709_v13 = vshll.u32 %v5197_v15, 16  ;;  %v1707_v18 = vshrl.u32 %v5197_v15, 16 }
 0x154   : > { %8560 = vst [vmem:[#allocation62_spill] sm:$0xff] %v6827_v19  ;;  %1555 = vrot.lane.b32.xlu1 %v1543_v35, %s5954_s10 }
 0x155   : > { %1329 = vrot.lane.b32.xlu0 %v1316_v40, %s5952_s8  ;;  %v1916_v40 = vshrl.u32 %v5220_v32, 16  ;;  %v1544_v63 = vrot.slane %v5173_v26, 2  ;;  %v5185_v26 = vcombine.low %v4850_v38, %v4851_v27  ;;  %v1711_v24 = vrot.slane %v1709_v13, 1  ;;  %v4885_v32 = vld [vmem:[%s6043_s28 + $0x18] sm:$0xe] }
 0x156   : > { %v6837_v19 = vpop.permute.xlu1 %3144  ;;  %v5209_v15 = vcombine.low %v4885_v32, %v6825_v56  ;;  %v4908_v13 = vld [vmem:[%s6043_s28 + $0x10] sm:$0xc]  ;;  %v6879_v56 = vld [vmem:[%s6043_s28 + $0x20] sm:$0xf] }
 0x157   : > { %8561 = vst [vmem:[#allocation63_spill] sm:$0xff] %v6837_v19  ;;  %v6841_v35 = vpop.permute.xlu0 %3142  ;;  %v1918_v5 = vrot.slane %v1916_v40, 1  ;;  %v5857_v19 = vld [vmem:[%s6043_s28 + $0x1c] sm:$0x7]  ;;  %v4814_v40 = vld [vmem:[%s6043_s28 + $0x18] sm:$0xe] }
 0x158   : > { %8562 = vst [vmem:[#allocation64_spill] sm:$0xff] %v6841_v35  ;;  %1639 = vrot.lane.b32.xlu1 %v5184_v21, %s5955_s11  ;;  %v1188_v35 = vshll.u32 %v5138_v25, 16  ;;  %v1921_v21 = vrot.slane %v1919_v14, 2  ;;  %v1186_v14 = vshrl.u32 %v5138_v25, 16  ;;  %v5150_v25 = vcombine.low %v4814_v40, %v6830_v6 }
 0x159   : > { %1485 = vrot.lane.b32.xlu0 %v1402_v1, %s5953_s9  ;;  %v6857_v1 = vld [vmem:[%s6043_s28 + $0x1c] sm:$0xf] }
 0x15a   : > { %v6845_v30 = vpop.permute.xlu1 %3198  ;;  %v1922_v8 = vor.u32 %v1921_v21, %v1918_v5  ;;  %v5221_v38 = vcombine.low %v4885_v32, %v6857_v1  ;;  %v5858_v32 = vld [vmem:[%s6043_s28 + $0x24] sm:$0x7] }
 0x15b   : > { %8563 = vst [vmem:[#allocation65_spill] sm:$0xff] %v6845_v30  ;;  %v6851_v31 = vpop.permute.xlu0 %2972 }
 0x15c   : > { %8564 = vst [vmem:[#allocation66_spill] sm:$0xff] %v6851_v31  ;;  %1783 = vrot.lane.b32.xlu1 %v1705_v34, %s5956_s17  ;;  %v5256_v31 = vcombine.low %v6849_v58, %v5857_v19  ;;  %v1712_v19 = vor.u32 %v1711_v24, %v1707_v18  ;;  %v1927_v24 = vshll.u32 %v5221_v38, 16 }
 0x15d   : > { %1557 = vrot.lane.b32.xlu0 %v1544_v63, %s5954_s10  ;;  %v1190_v63 = vrot.slane %v1188_v35, 1  ;;  %v1844_v35 = vrot.slane %v5209_v15, 1 }
 0x15e   : > { %v6861_v30 = vpop.permute.xlu1 %3204  ;;  %v3588_v27 = vsel %vm2191_vm0, %v5256_v31, %v6607_v55  ;;  %v5232_v55 = vcombine.low %v4908_v13, %v6818_v50  ;;  %v1924_v31 = vshrl.u32 %v5221_v38, 16  ;;  %v1929_v13 = vrot.slane %v1927_v24, 2 }
 0x15f   : > { %v6863_v34 = vpop.permute.xlu0 %3202  ;;  %v3623_v21 = vsel %vm8500_vm1, %v3588_v27, %v6601_v46  ;;  %v4909_v27 = vld [vmem:[%s6043_s28 + $0x18] sm:$0xc] }
 0x160   : > { %8565 = vst [vmem:[#allocation67_spill] sm:$0xff] %v6863_v34  ;;  %1855 = vrot.lane.b32.xlu1 %v1843_v11, %s5957_s19  ;;  %v6876_v11 = vld [vmem:[%s6043_s28 + $0x1c] sm:$0xf]  ;;  %v3647_v6 = vsel %vm8499_vm2, %v3623_v21, %v6617_v53  ;;  %v2071_v53 = vrot.slane %v5232_v55, 2 }
 0x161   : > { %1641 = vrot.lane.b32.xlu0 %v5185_v26, %s5955_s11  ;;  %v1191_v26 = vor.u32 %v1190_v63, %v1186_v14  ;;  %v5162_v18 = vcombine.low %v4814_v40, %v6876_v11  ;;  %v3671_v46 = vsel %vm8498_vm3, %v3647_v6, %v6625_v36  ;;  %v1317_v40 = vrot.slane %v5150_v25, 1  ;;  %v4921_v14 = vld [vmem:[%s6043_s28 + $0x1c] sm:$0x3] }
 0x162   : > { %v6873_v34 = vpop.permute.xlu1 %3342  ;;  %v3695_v38 = vsel %vm8497_vm4, %v3671_v46, %v6635_v42  ;;  %v1926_v63 = vrot.slane %v1924_v31, 1  ;;  %v8488_v42 = vmov 0.0  }
 0x163   : > { %v6881_v5 = vpop.permute.xlu0 %3140  ;;  %v3719_v36 = vsel %vm8496_vm5, %v3695_v38, %v6647_v60  ;;  %v1404_v25 = vshrl.u32 %v5162_v18, 16  ;;  %v1407_v21 = vshll.u32 %v5162_v18, 16  ;;  %5433 = vmatprep.subr.bf16.mxu0 %v8488_v42  ;;  %5479 = vmatprep.subr.bf16.mxu1 %v8488_v42  ;;  %v4838_v18 = vld [vmem:[%s6043_s28 + $0x18] sm:$0xc] }
 0x164   : > { %8566 = vst [vmem:[#allocation68_spill] sm:$0xff] %v6881_v5  ;;  %2011 = vrot.lane.b32.xlu1 %v1922_v8, %s5958_s20  ;;  %v5257_v8 = vcombine.low %v6879_v56, %v5858_v32  ;;  %v1930_v6 = vor.u32 %v1929_v13, %v1926_v63  ;;  %v5174_v63 = vcombine.low %v4838_v18, %v6876_v11  ;;  %v6970_v13 = vld [vmem:[%s6043_s28 + $0x20] sm:$0xe] }
 0x165   : > { %1785 = vrot.lane.b32.xlu0 %v1712_v19, %s5956_s17  ;;  %v5797_v19 = vld [vmem:[%s8485_s1] sm:$0xff]   ;;  %v1406_v32 = vrot.slane %v1404_v25, 1  ;;  %v1409_v46 = vrot.slane %v1407_v21, 2  ;;  %5443 = vmatprep.mubr.msk.bf16.mxu0 %vm8490_vm10, %v8488_v42 }
 0x166   : > { %v6894_v50 = vpop.permute.xlu1 %3348  ;;  %5434 = vmatpush3.bf16.msra.mxu0 %v5797_v19  ;;  %5484 = vmatpush3.bf16.msra.mxu1 %v5797_v19  ;;  %v3591_v24 = vsel %vm2191_vm0, %v5257_v8, %v6619_v47  ;;  %v6949_v8 = vld [vmem:[%s6043_s28 + $0x28] sm:$0xf] }
 0x167   : > { %v6898_v15 = vpop.permute.xlu0 %3346  ;;  %5435 = vmatprep.subr.bf16.mxu0 %v8488_v42  ;;  %5480 = vmatprep.subr.bf16.mxu1 %v8488_v42 }
 0x168   : > { %8567 = vst [vmem:[#allocation69_spill] sm:$0xff] %v6898_v15  ;;  %1857 = vrot.lane.b32.xlu1 %v1844_v35, %s5957_s19  ;;  %v3743_v35 = vsel %vm2353_vm6, %v3719_v36, %v6655_v23  ;;  %v5244_v23 = vcombine.low %v6849_v58, %v4921_v14  ;;  %v6936_v58 = vld [vmem:[%s6043_s28 + $0x20] sm:$0xf]  ;;  %v5804_v36 = vld [vmem:[%s8485_s1 + $0x10] sm:$0xff]   ;;  %5463 = vmatprep.mubr.msk.bf16.mxu1 %vm8490_vm10, %v8488_v42  ;;  %vm8492_vm10 = vcmask 392192  }
 0x169   : > { %1259 = vrot.lane.b32.xlu0 %v1191_v26, %s5951_s7  ;;  %v6919_v60 = vsel %vm2378_vm7, %v3743_v35, %v6664_v33  ;;  %v5233_v26 = vcombine.low %v4909_v27, %v6857_v1  ;;  %v5801_v33 = vld [vmem:[%s8485_s1 + $0x8] sm:$0xff]   ;;  %v6939_v1 = vld [vmem:[%s6043_s28 + $0x24] sm:$0x7] }
 0x16a   : > { %v6914_v55 = vpop.permute.xlu1 %3414  ;;  %v3792_v38 = vshll.u32 %v6919_v60, 16  ;;  %5436 = vmatpush3.bf16.msra.mxu0 %v5801_v33  ;;  %5485 = vmatpush3.bf16.msra.mxu1 %v5801_v33  ;;  %v6973_v27 = vld [vmem:[%s6043_s28 + $0x24] sm:$0xf]  ;;  %v5859_v35 = vld [vmem:[%s6043_s28 + $0x2c] sm:$0x7]  ;;  %v1545_v33 = vrot.slane %v5174_v63, 2 }
 0x16b   : > { %v6921_v31 = vpop.permute.xlu0 %3200  ;;  %5437 = vmatprep.subr.bf16.mxu0 %v8488_v42  ;;  %v2072_v19 = vrot.slane %v5233_v26, 2  ;;  %5481 = vmatprep.subr.bf16.mxu1 %v8488_v42  ;;  %v4923_v63 = vld [vmem:[%s6043_s28 + $0x24] sm:$0x3] }
 0x16c   : > { %8568 = vst [vmem:[#allocation70_spill] sm:$0xff] %v6921_v31  ;;  %1331 = vrot.lane.b32.xlu1 %v1317_v40, %s5952_s8  ;;  %v3625_v40 = vsel %vm8500_vm1, %v3591_v24, %v6629_v48  ;;  %v3794_v25 = vrot.slane %v3792_v38, 1  ;;  %v4853_v24 = vld [vmem:[%s6043_s28 + $0x24] sm:$0x3] }
 0x16d   : > { %2083 = vrot.lane.b32.xlu0 %v2071_v53, %s5960_s30  ;;  %v3649_v47 = vsel %vm8499_vm2, %v3625_v40, %v6641_v9  ;;  %v6960_v9 = vcombine.low %v6936_v58, %v6939_v1 }
 0x16e   : > { %v6944_v14 = vpop.permute.xlu1 %3420  ;;  %v3673_v48 = vsel %vm8498_vm3, %v3649_v47, %v6649_v12  ;;  %v1410_v12 = vor.u32 %v1409_v46, %v1406_v32  ;;  %5438 = vmatpush3.bf16.msra.mxu0 %v5804_v36  ;;  %5486 = vmatpush3.bf16.msra.mxu1 %v5804_v36  ;;  %v5809_v46 = vld [vmem:[%s8485_s1 + $0x18] sm:$0xff]   ;;  %v5186_v47 = vcombine.low %v6936_v58, %v4853_v24 }
 0x16f   : > { %8569 = vst [vmem:[#allocation71_spill] sm:$0xff] %v6944_v14  ;;  %v6951_v53 = vpop.permute.xlu0 %3418  ;;  %v3697_v11 = vsel %vm8497_vm4, %v3673_v48, %v6659_v39  ;;  %5439 = vmatprep.subr.bf16.mxu0 %v8488_v42  ;;  %v1716_v32 = vshll.u32 %v6960_v9, 16  ;;  %5482 = vmatprep.subr.bf16.mxu1 %v8488_v42  ;;  %v1714_v48 = vshrl.u32 %v6960_v9, 16  ;;  %v8615_v14 = vld [vmem:[#allocation40_spill] sm:$0xff] }
 0x170   : > { %8570 = vst [vmem:[#allocation72_spill] sm:$0xff] %v6951_v53  ;;  %2167 = vrot.lane.b32.xlu1 %v5244_v23, %s5961_s4  ;;  %v3721_v21 = vsel %vm8496_vm5, %v3697_v11, %v6668_v2  ;;  %v5258_v23 = vcombine.low %v6949_v8, %v5859_v35  ;;  %v3790_v2 = vshrl.u32 %v6919_v60, 16  ;;  %v7000_v60 = vld [vmem:[%s6043_s28 + $0x24] sm:$0x7]  ;;  %v5860_v35 = vld [vmem:[%s6043_s28 + $0x20] sm:$0xf] }
 0x171   : > { %2013 = vrot.lane.b32.xlu0 %v1930_v6, %s5958_s20  ;;  %v3745_v39 = vsel %vm2353_vm6, %v3721_v21, %v6674_v28  ;;  %v5222_v28 = vcombine.low %v6970_v13, %v6973_v27  ;;  %v8616_v53 = vld [vmem:[#allocation50_spill] sm:$0xff] }
 0x172   : > { %v6979_v26 = vpop.permute.xlu1 %3570  ;;  %v3769_v6 = vsel %vm2378_vm7, %v3745_v39, %v6685_v0  ;;  %v3795_v40 = vor.u32 %v3794_v25, %v3790_v2  ;;  %v3594_v0 = vsel %vm2191_vm0, %v5258_v23, %v6676_v62  ;;  %5440 = vmatpush3.bf16.msra.mxu0 %v5809_v46  ;;  %v5811_v62 = vld [vmem:[%s8485_s1 + $0x20] sm:$0x3f]   ;;  %5487 = vmatpush3.bf16.msra.mxu1 %v5809_v46  ;;  %v1718_v25 = vrot.slane %v1716_v32, 1 }
 0x173   : > { %v6983_v18 = vpop.permute.xlu0 %3344  ;;  %v3627_v36 = vsel %vm8500_vm1, %v3594_v0, %v6689_v52  ;;  %5441 = vmatprep.subr.bf16.mxu0 %v8488_v42  ;;  %v1932_v52 = vshrl.u32 %v5222_v28, 16  ;;  %v1935_v21 = vshll.u32 %v5222_v28, 16  ;;  %5483 = vmatprep.subr.bf16.mxu1 %v8488_v42  ;;  %v5139_v23 = vcombine.low %v5860_v35, %v7000_v60  ;;  %v4790_v42 = vld [vmem:[%s6043_s28 + $0x40] sm:$0xf] }
 0x174   : > { %8571 = vst [vmem:[#allocation73_spill] sm:$0xff] %v6983_v18  ;;  %2085 = vrot.lane.b32.xlu1 %v2072_v19, %s5960_s30  ;;  %v3798_v19 = vshll.u32 %v3769_v6, 16  ;;  %v3651_v9 = vsel %vm8499_vm2, %v3627_v36, %v6700_v17  ;;  %v5245_v39 = vcombine.low %v6879_v56, %v4923_v63  ;;  %v1719_v56 = vor.u32 %v1718_v25, %v1714_v48  ;;  %v4910_v36 = vld [vmem:[%s6043_s28 + $0x20] sm:$0xc] }
 0x175   : > { %1487 = vrot.lane.b32.xlu0 %v1410_v12, %s5953_s9  ;;  %v5962_v12 = vmov 65535   ;;  %v1937_v0 = vrot.slane %v1935_v21, 2  ;;  %v1195_v63 = vshll.u32 %v5139_v23, 16  ;;  %v7371_v18 = vld [vmem:[%s6043_s28 + $0x40] sm:$0xf] }
 0x176   : > { %v7004_v38 = vpop.permute.xlu1 %3576  ;;  %v4337_v58 = vsel %vm4335_vm8, 4294967295, %v5962_v12  ;;  %v3800_v17 = vrot.slane %v3798_v19, 1  ;;  %v3796_v19 = vshrl.u32 %v3769_v6, 16  ;;  %vm2528_vm8 = vcmask 343040  }
 0x177   : > { %8572 = vst [vmem:[#allocation74_spill] sm:$0xff] %v7004_v38  ;;  %v7011_v11 = vpop.permute.xlu0 %3574  ;;  %v4338_v2 = vsel %vm4336_vm9, %v4337_v58, 0  ;;  %v1197_v25 = vrot.slane %v1195_v63, 1  ;;  %v7385_v38 = vld [vmem:[%s6043_s28 + $0x44] sm:$0x7]  ;;  %vm2553_vm9 = vcmask 367616  }
 0x178   : > { %8573 = vst [vmem:[#allocation75_spill] sm:$0xff] %v7011_v11  ;;  %1559 = vrot.lane.b32.xlu1 %v1545_v33, %s5954_s10  ;;  %v3675_v33 = vsel %vm8498_vm3, %v3651_v9, %v6698_v49  ;;  %v4340_v28 = vand.u32 %v5811_v62, %v4338_v2  ;;  %v5210_v49 = vcombine.low %v6970_v13, %v6939_v1  ;;  %v1193_v9 = vshrl.u32 %v5139_v23, 16  ;;  %v4925_v23 = vld [vmem:[%s6043_s28 + $0x2c] sm:$0x3] }
 0x179   : > { %3862 = vrot.lane.b32.xlu0 %v3795_v40, %s5963_s25  ;;  %v3699_v46 = vsel %vm8497_vm4, %v3675_v33, %v6709_v43  ;;  %v1934_v40 = vrot.slane %v1932_v52, 1  ;;  %v4815_v43 = vld [vmem:[%s6043_s28 + $0x20] sm:$0xe]  ;;  %v3801_v48 = vor.u32 %v3800_v17, %v3796_v19  ;;  %v5234_v13 = vcombine.low %v4910_v36, %v6973_v27 }
 0x17a   : > { %v7026_v24 = vpop.permute.xlu1 %3416  ;;  %5442 = vmatpush3.bf16.msra.mxu0 %v4340_v28  ;;  %5488 = vmatpush3.bf16.msra.mxu1 %v4340_v28  ;;  %v3723_v12 = vsel %vm8496_vm5, %v3699_v46, %v6707_v54  ;;  %v1845_v52 = vrot.slane %v5210_v49, 1  ;;  %v1198_v27 = vor.u32 %v1197_v25, %v1193_v9  ;;  %v5151_v2 = vcombine.low %v4815_v43, %v7000_v60  ;;  %v4887_v9 = vld [vmem:[%s6043_s28 + $0x28] sm:$0xe]  ;;  %v7086_v25 = vld [vmem:[%s6043_s28 + $0x2c] sm:$0xf] }
 0x17b   : > { %8574 = vst [vmem:[#allocation76_spill] sm:$0xff] %v7026_v24  ;;  %v7031_v32 = vpop.permute.xlu0 %2750  ;;  %v3747_v58 = vsel %vm2353_vm6, %v3723_v12, %v6717_v4  ;;  %v1938_v1 = vor.u32 %v1937_v0, %v1934_v40  ;;  %v5246_v0 = vcombine.low %v6949_v8, %v4925_v23 }
 0x17c   : > { %8575 = vst [vmem:[#allocation77_spill] sm:$0xff] %v7031_v32  ;;  %1643 = vrot.lane.b32.xlu1 %v5186_v47, %s5955_s11  ;;  %v4827_v47 = vld [vmem:[%s6043_s28 + $0x24] sm:$0xf]  ;;  %v3771_v35 = vsel %vm2378_vm7, %v3747_v58, %v6715_v44  ;;  %v4875_v44 = vld [vmem:[%s6043_s28 + $0x2c] sm:$0x7]  ;;  %v1318_v60 = vrot.slane %v5151_v2, 1  ;;  %v5223_v2 = vcombine.low %v4887_v9, %v7086_v25 }
 0x17d   : > { %2169 = vrot.lane.b32.xlu0 %v5245_v39, %s5961_s4  ;;  %v5163_v21 = vcombine.low %v4815_v43, %v4827_v47  ;;  %v2073_v39 = vrot.slane %v5234_v13, 2  ;;  %v3804_v28 = vshll.u32 %v3771_v35, 16  ;;  %v3802_v58 = vshrl.u32 %v3771_v35, 16 }
 0x17e   : > { %v7042_v62 = vpop.permute.xlu1 %3572  ;;  %v5211_v23 = vcombine.low %v4887_v9, %v4875_v44  ;;  %v4785_v9 = vld [vmem:[%s6043_s28 + $0x2c] sm:$0x3] }
 0x17f   : > { %8576 = vst [vmem:[#allocation78_spill] sm:$0xff] %v7042_v62  ;;  %v7050_v6 = vpop.permute.xlu0 %2822  ;;  %v1412_v17 = vshrl.u32 %v5163_v21, 16  ;;  %v1415_v33 = vshll.u32 %v5163_v21, 16  ;;  %v3806_v36 = vrot.slane %v3804_v28, 1  ;;  %v7096_v28 = vld [vmem:[%s6043_s28 + $0x3c] sm:$0x7] }
 0x180   : > { %8577 = vst [vmem:[#allocation79_spill] sm:$0xff] %v7050_v6  ;;  %1787 = vrot.lane.b32.xlu1 %v1719_v56, %s5956_s17  ;;  %v4854_v56 = vld [vmem:[%s6043_s28 + $0x28] sm:$0xf]  ;;  %v8609_v6 = vld [vmem:[#allocation16_spill] sm:$0xff]  ;;  %v5867_v62 = vld [vmem:[%s6043_s28 + $0x54] sm:$0x7] }
 0x181   : > { %3864 = vrot.lane.b32.xlu0 %v3801_v48, %s5963_s25  ;;  %v1414_v63 = vrot.slane %v1412_v17, 1  ;;  %v1417_v19 = vrot.slane %v1415_v33, 2  ;;  %v5199_v49 = vcombine.low %v4854_v56, %v4875_v44  ;;  %v4839_v48 = vld [vmem:[%s6043_s28 + $0x20] sm:$0xc]  ;;  %v3807_v21 = vor.u32 %v3806_v36, %v3802_v58  ;;  %v4784_v36 = vld [vmem:[%s6043_s28 + $0x28] sm:$0xf] }
 0x182   : > { %v7057_v54 = vpop.permute.xlu1 %2978  ;;  %v5175_v13 = vcombine.low %v4839_v48, %v4827_v47  ;;  %v1846_v44 = vrot.slane %v5211_v23, 1  ;;  %v1943_v48 = vshll.u32 %v5223_v2, 16 }
 0x183   : > { %8578 = vst [vmem:[#allocation80_spill] sm:$0xff] %v7057_v54  ;;  %v7061_v4 = vpop.permute.xlu0 %2752  ;;  %v1418_v8 = vor.u32 %v1417_v19, %v1414_v63  ;;  %v1721_v17 = vshrl.u32 %v5199_v49, 16 }
 0x184   : > { %8579 = vst [vmem:[#allocation81_spill] sm:$0xff] %v7061_v4  ;;  %2015 = vrot.lane.b32.xlu1 %v1938_v1, %s5958_s20  ;;  %v4855_v1 = vld [vmem:[%s6043_s28 + $0x2c] sm:$0x3]  ;;  %v1546_v47 = vrot.slane %v5175_v13, 2 }
 0x185   : > { %1859 = vrot.lane.b32.xlu0 %v1845_v52, %s5957_s19  ;;  %v1723_v52 = vshll.u32 %v5199_v49, 16  ;;  %v5187_v35 = vcombine.low %v4854_v56, %v4855_v1  ;;  %v4788_v56 = vld [vmem:[%s6043_s28 + $0x38] sm:$0xf]  ;;  %v1940_v49 = vshrl.u32 %v5223_v2, 16  ;;  %v4789_v1 = vld [vmem:[%s6043_s28 + $0x3c] sm:$0x3] }
 0x186   : > { %v7067_v46 = vpop.permute.xlu1 %3146  ;;  %v5142_v19 = vcombine.low %v4788_v56, %v7096_v28  ;;  %v1945_v2 = vrot.slane %v1943_v48, 2 }
 0x187   : > { %8580 = vst [vmem:[#allocation82_spill] sm:$0xff] %v7067_v46  ;;  %v7071_v40 = vpop.permute.xlu0 %2824  ;;  %v1725_v33 = vrot.slane %v1723_v52, 1  ;;  %v7116_v52 = vld [vmem:[%s6043_s28 + $0x44] sm:$0x7]  ;;  %v1942_v23 = vrot.slane %v1940_v49, 1 }
 0x188   : > { %8581 = vst [vmem:[#allocation83_spill] sm:$0xff] %v7071_v40  ;;  %2087 = vrot.lane.b32.xlu1 %v2073_v39, %s5960_s30  ;;  %v1214_v48 = vshrl.u32 %v5142_v19, 16  ;;  %v4890_v40 = vld [vmem:[%s6043_s28 + $0x40] sm:$0xe]  ;;  %v7341_v46 = vld [vmem:[%s6043_s28 + $0x38] sm:$0xf] }
 0x189   : > { %1261 = vrot.lane.b32.xlu0 %v1198_v27, %s5951_s7  ;;  %v1726_v58 = vor.u32 %v1725_v33, %v1721_v17  ;;  %v7123_v17 = vld [vmem:[%s6043_s28 + $0x30] sm:$0xf]  ;;  %v5128_v33 = vcombine.low %v4784_v36, %v4785_v9  ;;  %v1946_v49 = vor.u32 %v1945_v2, %v1942_v23  ;;  %v7148_v2 = vld [vmem:[%s6043_s28 + $0x34] sm:$0x7] }
 0x18a   : > { %v7076_v43 = vpop.permute.xlu1 %3206 }
 0x18b   : > { %8582 = vst [vmem:[#allocation84_spill] sm:$0xff] %v7076_v43  ;;  %v7079_v12 = vpop.permute.xlu0 %2980 }
 0x18c   : > { %8583 = vst [vmem:[#allocation85_spill] sm:$0xff] %v7079_v12  ;;  %2171 = vrot.lane.b32.xlu1 %v5246_v0, %s5961_s4  ;;  %v4911_v12 = vld [vmem:[%s6043_s28 + $0x28] sm:$0xc] }
 0x18d   : > { %1333 = vrot.lane.b32.xlu0 %v1318_v60, %s5952_s8  ;;  %v7101_v60 = vld [vmem:[%s6043_s28 + $0x2c] sm:$0x7]  ;;  %v5235_v23 = vcombine.low %v4911_v12, %v7086_v25  ;;  %v4786_v12 = vld [vmem:[%s6043_s28 + $0x30] sm:$0xf] }
 0x18e   : > { %v7088_v39 = vpop.permute.xlu1 %3350 }
 0x18f   : > { %8584 = vst [vmem:[#allocation86_spill] sm:$0xff] %v7088_v39  ;;  %v7090_v27 = vpop.permute.xlu0 %3148 }
 0x190   : > { %8585 = vst [vmem:[#allocation87_spill] sm:$0xff] %v7090_v27  ;;  %3866 = vrot.lane.b32.xlu1 %v3807_v21, %s5963_s25 }
 0x191   : > { %1489 = vrot.lane.b32.xlu0 %v1418_v8, %s5953_s9  ;;  %v5140_v8 = vcombine.low %v4784_v36, %v7101_v60 }
 0x192   : > { %v7098_v0 = vpop.permute.xlu1 %3422 }
 0x193   : > { %8586 = vst [vmem:[#allocation88_spill] sm:$0xff] %v7098_v0  ;;  %v7103_v63 = vpop.permute.xlu0 %3208  ;;  %v4791_v0 = vld [vmem:[%s6043_s28 + $0x44] sm:$0x3] }
 0x194   : > { %8587 = vst [vmem:[#allocation89_spill] sm:$0xff] %v7103_v63  ;;  %1645 = vrot.lane.b32.xlu1 %v5187_v35, %s5955_s11  ;;  %v5130_v35 = vcombine.low %v4788_v56, %v4789_v1  ;;  %v5143_v63 = vcombine.low %v4790_v42, %v7116_v52  ;;  %v5131_v36 = vcombine.low %v4790_v42, %v4791_v0 }
 0x195   : > { %1561 = vrot.lane.b32.xlu0 %v1546_v47, %s5954_s10  ;;  %v1216_v47 = vshll.u32 %v5142_v19, 16 }
 0x196   : > { %v7112_v13 = vpop.permute.xlu1 %3578  ;;  %v1221_v0 = vshrl.u32 %v5143_v63, 16 }
 0x197   : > { %8588 = vst [vmem:[#allocation90_spill] sm:$0xff] %v7112_v13  ;;  %v7118_v21 = vpop.permute.xlu0 %3352  ;;  %v1202_v13 = vshll.u32 %v5140_v8, 16  ;;  %v1218_v1 = vrot.slane %v1216_v47, 1 }
 0x198   : > { %8589 = vst [vmem:[#allocation91_spill] sm:$0xff] %v7118_v21  ;;  %1861 = vrot.lane.b32.xlu1 %v1846_v44, %s5957_s19  ;;  %v5861_v44 = vld [vmem:[%s6043_s28 + $0x34] sm:$0x7] }
 0x199   : > { %1789 = vrot.lane.b32.xlu0 %v1726_v58, %s5956_s17  ;;  %v5259_v56 = vcombine.low %v7123_v17, %v5861_v44  ;;  %v1200_v58 = vshrl.u32 %v5140_v8, 16  ;;  %v1204_v9 = vrot.slane %v1202_v13, 1  ;;  %v1219_v19 = vor.u32 %v1218_v1, %v1214_v48  ;;  %v4816_v13 = vld [vmem:[%s6043_s28 + $0x28] sm:$0xe]  ;;  %v7165_v48 = vld [vmem:[%s6043_s28 + $0x3c] sm:$0xf] }
 0x19a   : > { %v7127_v27 = vpop.permute.xlu1 %3424  ;;  %v5141_v44 = vcombine.low %v4786_v12, %v7148_v2  ;;  %v7170_v1 = vld [vmem:[%s6043_s28 + $0x2c] sm:$0xf] }
 0x19b   : > { %8590 = vst [vmem:[#allocation92_spill] sm:$0xff] %v7127_v27  ;;  %v7130_v21 = vpop.permute.xlu0 %2754  ;;  %v1223_v27 = vshll.u32 %v5143_v63, 16  ;;  %v1205_v42 = vor.u32 %v1204_v9, %v1200_v58  ;;  %v5152_v63 = vcombine.low %v4816_v13, %v7101_v60 }
 0x19c   : > { %8591 = vst [vmem:[#allocation93_spill] sm:$0xff] %v7130_v21  ;;  %1123 = vrot.lane.b32.xlu1 %v5130_v35, %s5950_s6  ;;  %v3597_v35 = vsel %vm2191_vm0, %v5259_v56, %v6729_v57  ;;  %v4819_v56 = vld [vmem:[%s6043_s28 + $0x40] sm:$0xe] }
 0x19d   : > { %1119 = vrot.lane.b32.xlu0 %v5128_v33, %s5950_s6  ;;  %v1225_v8 = vrot.slane %v1223_v27, 1  ;;  %v3629_v57 = vsel %vm8500_vm1, %v3597_v35, %v6725_v29  ;;  %v2074_v27 = vrot.slane %v5235_v23, 2  ;;  %v5155_v60 = vcombine.low %v4819_v56, %v7116_v52  ;;  %v7189_v52 = vld [vmem:[%s6043_s28 + $0x44] sm:$0xf] }
 0x19e   : > { %v7137_v39 = vpop.permute.xlu1 %3580  ;;  %v3653_v25 = vsel %vm8499_vm2, %v3629_v57, %v6744_v10  ;;  %v4818_v10 = vld [vmem:[%s6043_s28 + $0x38] sm:$0xe] }
 0x19f   : > { %8592 = vst [vmem:[#allocation94_spill] sm:$0xff] %v7137_v39  ;;  %v7139_v21 = vpop.permute.xlu0 %2826  ;;  %v3677_v58 = vsel %vm8498_vm3, %v3653_v25, %v6742_v37  ;;  %v5166_v23 = vcombine.low %v4818_v10, %v7165_v48  ;;  %v5154_v37 = vcombine.low %v4818_v10, %v7096_v28  ;;  %v5167_v28 = vcombine.low %v4819_v56, %v7189_v52 }
 0x1a0   : > { %8593 = vst [vmem:[#allocation95_spill] sm:$0xff] %v7139_v21  ;;  %2017 = vrot.lane.b32.xlu1 %v1946_v49, %s5958_s20  ;;  %v1226_v49 = vor.u32 %v1225_v8, %v1221_v0  ;;  %v3701_v35 = vsel %vm8497_vm4, %v3677_v58, %v6754_v61  ;;  %v5164_v0 = vcombine.low %v4816_v13, %v7170_v1  ;;  %v4927_v58 = vld [vmem:[%s6043_s28 + $0x34] sm:$0x3] }
 0x1a1   : > { %1125 = vrot.lane.b32.xlu0 %v5131_v36, %s5950_s6  ;;  %v4787_v36 = vld [vmem:[%s6043_s28 + $0x34] sm:$0x3]  ;;  %v3725_v61 = vsel %vm8496_vm5, %v3701_v35, %v6752_v20  ;;  %v1321_v10 = vrot.slane %v5154_v37, 1  ;;  %v1447_v37 = vshll.u32 %v5167_v28, 16 }
 0x1a2   : > { %v7150_v47 = vpop.permute.xlu1 %3150  ;;  %v5129_v8 = vcombine.low %v4786_v12, %v4787_v36  ;;  %v1436_v12 = vshrl.u32 %v5166_v23, 16  ;;  %v1439_v36 = vshll.u32 %v5166_v23, 16  ;;  %v1423_v20 = vshll.u32 %v5164_v0, 16 }
 0x1a3   : > { %8594 = vst [vmem:[#allocation96_spill] sm:$0xff] %v7150_v47  ;;  %v7154_v33 = vpop.permute.xlu0 %2982 }
 0x1a4   : > { %8595 = vst [vmem:[#allocation97_spill] sm:$0xff] %v7154_v33  ;;  %1267 = vrot.lane.b32.xlu1 %v1219_v19, %s5951_s7  ;;  %v1319_v19 = vrot.slane %v5152_v63, 1  ;;  %v1207_v63 = vshrl.u32 %v5141_v44, 16  ;;  %v1438_v23 = vrot.slane %v1436_v12, 1  ;;  %v5863_v33 = vld [vmem:[%s6043_s28] sm:$0xf] }
 0x1a5   : > { %1263 = vrot.lane.b32.xlu0 %v1205_v42, %s5951_s7  ;;  %v1209_v42 = vshll.u32 %v5141_v44, 16 }
 0x1a6   : > { %v7167_v29 = vpop.permute.xlu1 %3354 }
 0x1a7   : > { %8596 = vst [vmem:[#allocation98_spill] sm:$0xff] %v7167_v29  ;;  %v7176_v9 = vpop.permute.xlu0 %3210  ;;  %v1211_v13 = vrot.slane %v1209_v42, 1  ;;  %v1441_v42 = vrot.slane %v1439_v36, 2  ;;  %v184_v29 = vld [vmem:[%s6043_s28 + $0x4] sm:$0x3] }
 0x1a8   : > { %8597 = vst [vmem:[#allocation99_spill] sm:$0xff] %v7176_v9  ;;  %2089 = vrot.lane.b32.xlu1 %v2074_v27, %s5960_s30  ;;  %v1322_v27 = vrot.slane %v5155_v60, 1  ;;  %v5862_v9 = vld [vmem:[%s6043_s28 + $0x10] sm:$0xf]  ;;  %v5064_v21 = vcombine.low %v5863_v33, %v184_v29 }
 0x1a9   : > { %1269 = vrot.lane.b32.xlu0 %v1226_v49, %s5951_s7  ;;  %v3749_v49 = vsel %vm2353_vm6, %v3725_v61, %v6761_v41  ;;  %v1212_v41 = vor.u32 %v1211_v13, %v1207_v63  ;;  %v4840_v13 = vld [vmem:[%s6043_s28 + $0x28] sm:$0xc] }
 0x1aa   : > { %v7186_v57 = vpop.permute.xlu1 %3582  ;;  %v3773_v44 = vsel %vm2378_vm7, %v3749_v49, %v6759_v16 }
 0x1ab   : > { %8598 = vst [vmem:[#allocation100_spill] sm:$0xff] %v7186_v57  ;;  %v7193_v25 = vpop.permute.xlu0 %3426  ;;  %v1420_v57 = vshrl.u32 %v5164_v0, 16  ;;  %v1425_v0 = vrot.slane %v1423_v20, 2  ;;  %v3810_v61 = vshll.u32 %v3773_v44, 16  ;;  %v3808_v20 = vshrl.u32 %v3773_v44, 16 }
 0x1ac   : > { %8599 = vst [vmem:[#allocation101_spill] sm:$0xff] %v7193_v25  ;;  %1335 = vrot.lane.b32.xlu1 %v1319_v19, %s5952_s8  ;;  %v5247_v19 = vcombine.low %v7123_v17, %v4927_v58 }
 0x1ad   : > { %1121 = vrot.lane.b32.xlu0 %v5129_v8, %s5950_s6  ;;  %v1422_v56 = vrot.slane %v1420_v57, 1  ;;  %v1444_v8 = vshrl.u32 %v5167_v28, 16  ;;  %v1449_v57 = vrot.slane %v1447_v37, 2  ;;  %v3812_v12 = vrot.slane %v3810_v61, 1  ;;  %v4817_v28 = vld [vmem:[%s6043_s28 + $0x30] sm:$0xe] }
 0x1ae   : > { %v7201_v35 = vpop.permute.xlu1 %2828 }
 0x1af   : > { %8600 = vst [vmem:[#allocation102_spill] sm:$0xff] %v7201_v35  ;;  %v7205_v60 = vpop.permute.xlu0 %2756  ;;  %v1426_v17 = vor.u32 %v1425_v0, %v1422_v56  ;;  %v1446_v63 = vrot.slane %v1444_v8, 1  ;;  %v4843_v56 = vld [vmem:[%s6043_s28 + $0x40] sm:$0xc]  ;;  %v4842_v0 = vld [vmem:[%s6043_s28 + $0x38] sm:$0xc]  ;;  %v3813_v8 = vor.u32 %v3812_v12, %v3808_v20 }
 0x1b0   : > { %8601 = vst [vmem:[#allocation103_spill] sm:$0xff] %v7205_v60  ;;  %1341 = vrot.lane.b32.xlu1 %v1322_v27, %s5952_s8  ;;  %v1442_v27 = vor.u32 %v1441_v42, %v1438_v23  ;;  %v5153_v23 = vcombine.low %v4817_v28, %v7148_v2 }
 0x1b1   : > { %1339 = vrot.lane.b32.xlu0 %v1321_v10, %s5952_s8  ;;  %v7221_v10 = vld [vmem:[%s6043_s28 + $0x34] sm:$0xf] }
 0x1b2   : > { %v7210_v16 = vpop.permute.xlu1 %3152  ;;  %v5165_v42 = vcombine.low %v4817_v28, %v7221_v10  ;;  %v1320_v2 = vrot.slane %v5153_v23, 1  ;;  %v4856_v28 = vld [vmem:[%s6043_s28 + $0x30] sm:$0xf] }
 0x1b3   : > { %8602 = vst [vmem:[#allocation104_spill] sm:$0xff] %v7210_v16  ;;  %v7212_v49 = vpop.permute.xlu0 %2984  ;;  %v4861_v16 = vld [vmem:[%s6043_s28 + $0x44] sm:$0x3] }
 0x1b4   : > { %8603 = vst [vmem:[#allocation105_spill] sm:$0xff] %v7212_v49  ;;  %1265 = vrot.lane.b32.xlu1 %v1212_v41, %s5951_s7  ;;  %v5176_v41 = vcombine.low %v4840_v13, %v7170_v1  ;;  %v5179_v1 = vcombine.low %v4843_v56, %v7189_v52 }
 0x1b5   : > { %2173 = vrot.lane.b32.xlu0 %v5247_v19, %s5961_s4  ;;  %v1450_v19 = vor.u32 %v1449_v57, %v1446_v63  ;;  %v1428_v63 = vshrl.u32 %v5165_v42, 16  ;;  %v1431_v57 = vshll.u32 %v5165_v42, 16  ;;  %v7253_v42 = vld [vmem:[%s6043_s28 + $0x4c] sm:$0x7] }
 0x1b6   : > { %v7217_v36 = vpop.permute.xlu1 %3356  ;;  %v1547_v44 = vrot.slane %v5176_v41, 2  ;;  %v1550_v52 = vrot.slane %v5179_v1, 2  ;;  %v4857_v41 = vld [vmem:[%s6043_s28 + $0x34] sm:$0x3] }
 0x1b7   : > { %8604 = vst [vmem:[#allocation106_spill] sm:$0xff] %v7217_v36  ;;  %v7223_v58 = vpop.permute.xlu0 %3212  ;;  %v1433_v23 = vrot.slane %v1431_v57, 2  ;;  %v5188_v1 = vcombine.low %v4856_v28, %v4857_v41  ;;  %v4841_v36 = vld [vmem:[%s6043_s28 + $0x30] sm:$0xc] }
 0x1b8   : > { %8605 = vst [vmem:[#allocation107_spill] sm:$0xff] %v7223_v58  ;;  %1495 = vrot.lane.b32.xlu1 %v1442_v27, %s5953_s9  ;;  %v5178_v27 = vcombine.low %v4842_v0, %v7165_v48  ;;  %v7258_v0 = vld [vmem:[%s6043_s28 + $0x44] sm:$0x7]  ;;  %v5177_v41 = vcombine.low %v4841_v36, %v7221_v10 }
 0x1b9   : > { %1491 = vrot.lane.b32.xlu0 %v1426_v17, %s5953_s9  ;;  %v7241_v17 = vld [vmem:[%s6043_s28 + $0x34] sm:$0x7] }
 0x1ba   : > { %v7232_v37 = vpop.permute.xlu1 %3584  ;;  %v1549_v48 = vrot.slane %v5178_v27, 2  ;;  %v5200_v20 = vcombine.low %v4856_v28, %v7241_v17  ;;  %v4863_v27 = vld [vmem:[%s6043_s28 + $0x4c] sm:$0x3] }
 0x1bb   : > { %8606 = vst [vmem:[#allocation108_spill] sm:$0xff] %v7232_v37  ;;  %v7234_v61 = vpop.permute.xlu0 %3428  ;;  %v4860_v37 = vld [vmem:[%s6043_s28 + $0x40] sm:$0xf] }
 0x1bc   : > { %8607 = vst [vmem:[#allocation109_spill] sm:$0xff] %v7234_v61  ;;  %3868 = vrot.lane.b32.xlu1 %v3813_v8, %s5963_s25  ;;  %v5202_v61 = vcombine.low %v4860_v37, %v7258_v0  ;;  %v1728_v28 = vshrl.u32 %v5200_v20, 16 }
 0x1bd   : > { %1497 = vrot.lane.b32.xlu0 %v1450_v19, %s5953_s9  ;;  %v1430_v19 = vrot.slane %v1428_v63, 1  ;;  %v1730_v63 = vshll.u32 %v5200_v20, 16 }
 0x1be   : > { %v7243_v13 = vpop.permute.xlu1 %1327  ;;  %v1742_v10 = vshrl.u32 %v5202_v61, 16 }
 0x1bf   : > { %v7245_v12 = vpop.permute.xlu0 %1255  ;;  %v1434_v57 = vor.u32 %v1433_v23, %v1430_v19  ;;  %v1744_v19 = vshll.u32 %v5202_v61, 16 }
 0x1c0   : > { %1563 = vrot.lane.b32.xlu1 %v1547_v44, %s5954_s10  ;;  %v4862_v44 = vld [vmem:[%s6043_s28 + $0x48] sm:$0xf] }
 0x1c1   : > { %1337 = vrot.lane.b32.xlu0 %v1320_v2, %s5952_s8  ;;  %v5203_v2 = vcombine.low %v4862_v44, %v7253_v42  ;;  %v5191_v35 = vcombine.low %v4862_v44, %v4863_v27  ;;  %v1548_v44 = vrot.slane %v5177_v41, 2  ;;  %v7286_v27 = vld [vmem:[%s6043_s28 + $0x3c] sm:$0x7]  ;;  %v4891_v41 = vld [vmem:[%s6043_s28 + $0x48] sm:$0xe] }
 0x1c2   : > { %v7255_v56 = vpop.permute.xlu1 %1483 }
 0x1c3   : > { %v7260_v8 = vpop.permute.xlu0 %1257  ;;  %v1751_v60 = vshll.u32 %v5203_v2, 16 }
 0x1c4   : > { %1569 = vrot.lane.b32.xlu1 %v1550_v52, %s5954_s10  ;;  %v1732_v52 = vrot.slane %v1730_v63, 1  ;;  %v188_v63 = vld [vmem:[%s6043_s28 + $0x14] sm:$0x3] }
 0x1c5   : > { %1567 = vrot.lane.b32.xlu0 %v1549_v48, %s5954_s10  ;;  %v5190_v48 = vcombine.low %v4860_v37, %v4861_v16  ;;  %v1753_v36 = vrot.slane %v1751_v60, 1  ;;  %v1746_v16 = vrot.slane %v1744_v19, 1  ;;  %v4888_v37 = vld [vmem:[%s6043_s28 + $0x30] sm:$0xe]  ;;  %v4858_v60 = vld [vmem:[%s6043_s28 + $0x38] sm:$0xf]  ;;  %v5066_v47 = vcombine.low %v5862_v9, %v188_v63 }
 0x1c6   : > { %v7270_v58 = vpop.permute.xlu1 %1555  ;;  %v1733_v20 = vor.u32 %v1732_v52, %v1728_v28  ;;  %v7299_v52 = vcombine.low %v4858_v60, %v7286_v27  ;;  %v7325_v63 = vld [vmem:[%s6043_s28 + $0x4c] sm:$0xf] }
 0x1c7   : > { %v7273_v49 = vpop.permute.xlu0 %1329  ;;  %v1747_v19 = vor.u32 %v1746_v16, %v1742_v10 }
 0x1c8   : > { %1647 = vrot.lane.b32.xlu1 %v5188_v1, %s5955_s11  ;;  %v1749_v1 = vshrl.u32 %v5203_v2, 16  ;;  %v5212_v2 = vcombine.low %v4888_v37, %v7241_v17  ;;  %v7312_v17 = vld [vmem:[%s6043_s28 + $0x34] sm:$0xf]  ;;  %v1737_v29 = vshll.u32 %v7299_v52, 16 }
 0x1c9   : > { %1493 = vrot.lane.b32.xlu0 %v1434_v57, %s5953_s9  ;;  %v5224_v10 = vcombine.low %v4888_v37, %v7312_v17  ;;  %v7344_v37 = vld [vmem:[%s6043_s28 + $0x50] sm:$0xf] }
 0x1ca   : > { %v7278_v23 = vpop.permute.xlu1 %1639  ;;  %v1754_v61 = vor.u32 %v1753_v36, %v1749_v1  ;;  %v4859_v36 = vld [vmem:[%s6043_s28 + $0x3c] sm:$0x3]  ;;  %v1847_v33 = vrot.slane %v5212_v2, 1  ;;  %v5263_v24 = vcombine.low %v7344_v37, %v5867_v62 }
 0x1cb   : > { %v7280_v25 = vpop.permute.xlu0 %1485  ;;  %v5189_v16 = vcombine.low %v4858_v60, %v4859_v36  ;;  %v1739_v36 = vrot.slane %v1737_v29, 1  ;;  %v1951_v54 = vshll.u32 %v5224_v10, 16 }
 0x1cc   : > { %1653 = vrot.lane.b32.xlu1 %v5191_v35, %s5955_s11  ;;  %v186_v35 = vld [vmem:[%s6043_s28 + $0xc] sm:$0x3] }
 0x1cd   : > { %1651 = vrot.lane.b32.xlu0 %v5190_v48, %s5955_s11  ;;  %v7303_v48 = vld [vmem:[%s6043_s28 + $0x44] sm:$0xf] }
 0x1ce   : > { %v7289_v57 = vpop.permute.xlu1 %1783  ;;  %v5226_v9 = vcombine.low %v4890_v40, %v7303_v48 }
 0x1cf   : > { %v7293_v28 = vpop.permute.xlu0 %1557 }
 0x1d0   : > { %1791 = vrot.lane.b32.xlu1 %v1733_v20, %s5956_s17  ;;  %v5864_v20 = vld [vmem:[%s6043_s28 + $0x8] sm:$0xf] }
 0x1d1   : > { %1565 = vrot.lane.b32.xlu0 %v1548_v44, %s5954_s10  ;;  %v5065_v39 = vcombine.low %v5864_v20, %v186_v35  ;;  %v5215_v44 = vcombine.low %v4891_v41, %v7253_v42  ;;  %v5214_v35 = vcombine.low %v4890_v40, %v7258_v0  ;;  %v7329_v20 = vld [vmem:[%s6043_s28 + $0x4c] sm:$0x7]  ;;  %v2200_v42 = vsel %vm2191_vm0, %v5066_v47, %v6308_v51  ;;  %v4792_v47 = vld [vmem:[%s6043_s28 + $0x48] sm:$0xf] }
 0x1d2   : > { %v7309_v1 = vpop.permute.xlu1 %1855 }
 0x1d3   : > { %v7316_v43 = vpop.permute.xlu0 %1641  ;;  %v2197_v2 = vsel %vm2191_vm0, %v5065_v39, %v6323_v59  ;;  %v1850_v51 = vrot.slane %v5215_v44, 1  ;;  %v5227_v59 = vcombine.low %v4891_v41, %v7325_v63  ;;  %v1735_v39 = vshrl.u32 %v7299_v52, 16  ;;  %v5865_v41 = vld [vmem:[%s6043_s28 + $0x4c] sm:$0x7]  ;;  %v5866_v52 = vld [vmem:[%s6043_s28 + $0x3c] sm:$0x7] }
 0x1d4   : > { %1797 = vrot.lane.b32.xlu1 %v1754_v61, %s5956_s17  ;;  %v2194_v61 = vsel %vm2191_vm0, %v5064_v21, %v6314_v7  ;;  %v2232_v40 = vsel %vm8500_vm1, %v2197_v2, %v6376_v22  ;;  %v1964_v7 = vshrl.u32 %v5226_v9, 16  ;;  %v1967_v21 = vshll.u32 %v5226_v9, 16  ;;  %v8608_v2 = vld [vmem:[#allocation14_spill] sm:$0xff] }
 0x1d5   : > { %1795 = vrot.lane.b32.xlu0 %v1747_v19, %s5956_s17  ;;  %v7338_v19 = vld [vmem:[%s6043_s28 + $0x48] sm:$0xf]  ;;  %v7357_v22 = vcombine.low %v4792_v47, %v7329_v20  ;;  %v2230_v44 = vsel %vm8500_vm1, %v2194_v61, %v8608_v2  ;;  %v1849_v4 = vrot.slane %v5214_v35, 1  ;;  %v1948_v9 = vshrl.u32 %v5224_v10, 16  ;;  %v8611_v2 = vld [vmem:[#allocation26_spill] sm:$0xff] }
 0x1d6   : > { %v7346_v60 = vpop.permute.xlu1 %2011  ;;  %v5262_v32 = vcombine.low %v7338_v19, %v5865_v41  ;;  %v5260_v29 = vcombine.low %v7341_v46, %v5866_v52  ;;  %v8610_v35 = vld [vmem:[#allocation25_spill] sm:$0xff]  ;;  %v1966_v41 = vrot.slane %v1964_v7, 1  ;;  %v1969_v31 = vrot.slane %v1967_v21, 2 }
 0x1d7   : > { %v7350_v0 = vpop.permute.xlu0 %1785  ;;  %v2257_v10 = vsel %vm8499_vm2, %v2232_v40, %v8610_v35  ;;  %v1740_v52 = vor.u32 %v1739_v36, %v1735_v39  ;;  %v1230_v62 = vshll.u32 %v7357_v22, 16  ;;  %v1972_v5 = vshrl.u32 %v5227_v59, 16  ;;  %v8613_v21 = vld [vmem:[#allocation37_spill] sm:$0xff]  ;;  %v8614_v39 = vld [vmem:[#allocation38_spill] sm:$0xff] }
 0x1d8   : > { %1863 = vrot.lane.b32.xlu1 %v1847_v33, %s5957_s19  ;;  %v2234_v33 = vsel %vm8500_vm1, %v2200_v42, %v8609_v6  ;;  %v2255_v6 = vsel %vm8499_vm2, %v2230_v44, %v8611_v2  ;;  %v1975_v11 = vshll.u32 %v5227_v59, 16  ;;  %v1950_v44 = vrot.slane %v1948_v9, 1  ;;  %v8612_v2 = vld [vmem:[#allocation28_spill] sm:$0xff] }
 0x1d9   : > { %1649 = vrot.lane.b32.xlu0 %v5189_v16, %s5955_s11  ;;  %v4793_v16 = vld [vmem:[%s6043_s28 + $0x4c] sm:$0x3]  ;;  %v1953_v35 = vrot.slane %v1951_v54, 2  ;;  %v2259_v7 = vsel %vm8499_vm2, %v2234_v33, %v8612_v2  ;;  %v2280_v36 = vsel %vm8498_vm3, %v2255_v6, %v8614_v39  ;;  %v1228_v9 = vshrl.u32 %v7357_v22, 16  ;;  %v7434_v39 = vld [vmem:[%s6043_s28 + $0x3c] sm:$0xf] }
 0x1da   : > { %v7373_v61 = vpop.permute.xlu1 %1857  ;;  %v5132_v40 = vcombine.low %v4792_v47, %v4793_v16  ;;  %v7400_v15 = vsel %vm8498_vm3, %v2259_v7, %v8615_v14  ;;  %v1970_v47 = vor.u32 %v1969_v31, %v1966_v41  ;;  %v1232_v16 = vrot.slane %v1230_v62, 1  ;;  %v8617_v14 = vld [vmem:[#allocation49_spill] sm:$0xff]  ;;  %v4912_v41 = vld [vmem:[%s6043_s28 + $0x30] sm:$0xc]  ;;  %v4889_v62 = vld [vmem:[%s6043_s28 + $0x38] sm:$0xe] }
 0x1db   : > { %v7380_v42 = vpop.permute.xlu0 %1259  ;;  %v1977_v6 = vrot.slane %v1975_v11, 2  ;;  %v5965_v7 = vmov 1983009808   ;;  %v3927_v31 = vlaneseq  ;;  %v3606_v22 = vsel %vm2191_vm0, %v5262_v32, %v6771_v45 }
 0x1dc   : > { %1869 = vrot.lane.b32.xlu1 %v1850_v51, %s5957_s19  ;;  %v2282_v51 = vsel %vm8498_vm3, %v2257_v10, %v8613_v21  ;;  %v1974_v10 = vrot.slane %v1972_v5, 1  ;;  %v3925_v21 = vunpack.c.l.s4 %v5965_v7  ;;  %v5236_v32 = vcombine.low %v4912_v41, %v7312_v17  ;;  %v8622_v41 = vld [vmem:[#allocation57_spill] sm:$0xff] }
 0x1dd   : > { %1867 = vrot.lane.b32.xlu0 %v1849_v4, %s5957_s19  ;;  %v2305_v4 = vsel %vm8497_vm4, %v2280_v36, %v8616_v53  ;;  %v2307_v2 = vsel %vm8497_vm4, %v2282_v51, %v8617_v14  ;;  %v1954_v53 = vor.u32 %v1953_v35, %v1950_v44  ;;  %v3928_v51 = vshrl.u32 %v3927_v31, 7 }
 0x1de   : > { %v7396_v59 = vpop.permute.xlu1 %1331  ;;  %v2330_v33 = vsel %vm8496_vm5, %v2305_v4, %v7245_v12  ;;  %v3600_v12 = vsel %vm2191_vm0, %v5260_v29, %v6775_v3  ;;  %v1233_v3 = vor.u32 %v1232_v16, %v1228_v9  ;;  %v4915_v29 = vld [vmem:[%s6043_s28 + $0x48] sm:$0xc]  ;;  %v5213_v36 = vcombine.low %v4889_v62, %v7286_v27 }
 0x1df   : > { %v7404_v54 = vpop.permute.xlu0 %2083  ;;  %v5225_v14 = vcombine.low %v4889_v62, %v7434_v39 }
 0x1e0   : > { %1793 = vrot.lane.b32.xlu1 %v1740_v52, %s5956_s17  ;;  %v8618_v52 = vld [vmem:[#allocation54_spill] sm:$0xff] }
 0x1e1   : > { %1127 = vrot.lane.b32.xlu0 %v5132_v40, %s5950_s6  ;;  %v3609_v5 = vsel %vm2191_vm0, %v5263_v24, %v8618_v52  ;;  %v2355_v40 = vsel %vm2353_vm6, %v2330_v33, %v7243_v13  ;;  %v1978_v24 = vor.u32 %v1977_v6, %v1974_v10  ;;  %v3926_v13 = vunpack.c.0.s8 %v3925_v21  ;;  %v4914_v33 = vld [vmem:[%s6043_s28 + $0x40] sm:$0xc] }
 0x1e2   : > { %v2168_v11 = vpop.permute.xlu1 %2167  ;;  %v2380_v45 = vsel %vm2378_vm7, %v2355_v40, %v7255_v56  ;;  %v8619_v56 = vld [vmem:[#allocation53_spill] sm:$0xff]  ;;  %v5239_v10 = vcombine.low %v4915_v29, %v7325_v63  ;;  %v1848_v21 = vrot.slane %v5213_v36, 1  ;;  %v5238_v63 = vcombine.low %v4914_v33, %v7303_v48  ;;  %v8625_v36 = vld [vmem:[#allocation60_spill] sm:$0xff]  ;;  %v7502_v33 = vld [vmem:[%s6043_s28 + $0x54] sm:$0x7] }
 0x1e3   : > { %v7423_v44 = vpop.permute.xlu0 %2013  ;;  %v2405_v35 = vsel %vm2403_vm11, %v2380_v45, %v7270_v58  ;;  %v3631_v4 = vsel %vm8500_vm1, %v3600_v12, %v8619_v56  ;;  %v2332_v52 = vsel %vm8496_vm5, %v2307_v2, %v7260_v8  ;;  %v4795_v2 = vld [vmem:[%s6043_s28 + $0x54] sm:$0x3] }
 0x1e4   : > { %2023 = vrot.lane.b32.xlu1 %v1970_v47, %s5958_s20  ;;  %v8620_v47 = vld [vmem:[#allocation55_spill] sm:$0xff]  ;;  %v2430_v17 = vsel %vm2428_vm12, %v2405_v35, %v7278_v23  ;;  %v2075_v23 = vrot.slane %v5236_v32, 2  ;;  %v3655_v12 = vsel %vm8499_vm2, %v3631_v4, %v8622_v41  ;;  %v2357_v62 = vsel %vm2353_vm6, %v2332_v52, %v7273_v49  ;;  %v8623_v49 = vld [vmem:[#allocation61_spill] sm:$0xff]  ;;  %v7489_v35 = vld [vmem:[%s6043_s28 + $0x4c] sm:$0xf] }
 0x1e5   : > { %2019 = vrot.lane.b32.xlu0 %v1954_v53, %s5958_s20  ;;  %v3637_v9 = vsel %vm8500_vm1, %v3609_v5, %v8620_v47  ;;  %v2455_v16 = vsel %vm8495_vm13, %v2430_v17, %v7289_v57  ;;  %v4820_v53 = vld [vmem:[%s6043_s28 + $0x48] sm:$0xe]  ;;  %v7459_v57 = vsub.s32 %v3926_v13, %v3928_v51  ;;  %v2078_v45 = vrot.slane %v5239_v10, 2  ;;  %v8624_v13 = vld [vmem:[#allocation59_spill] sm:$0xff] }
 0x1e6   : > { %v7443_v58 = vpop.permute.xlu1 %2085  ;;  %v2480_v6 = vsel %vm8493_vm14, %v2455_v16, %v7309_v1  ;;  %v8621_v1 = vld [vmem:[#allocation56_spill] sm:$0xff]  ;;  %v1959_v32 = vshll.u32 %v5225_v14, 16  ;;  %v3661_v51 = vsel %vm8499_vm2, %v3637_v9, %v8624_v13  ;;  %v8626_v4 = vld [vmem:[#allocation65_spill] sm:$0xff] }
 0x1e7   : > { %v7448_v27 = vpop.permute.xlu0 %1487  ;;  %v2505_v7 = vsel %vm8494_vm15, %v2480_v6, %v7346_v60  ;;  %v3635_v31 = vsel %vm8500_vm1, %v3606_v22, %v8621_v1  ;;  %v5156_v22 = vcombine.low %v4820_v53, %v7329_v20 }
 0x1e8   : > { %1271 = vrot.lane.b32.xlu1 %v1233_v3, %s5951_s7  ;;  %v2530_v60 = vsel %vm2528_vm8, %v2505_v7, %v7404_v54  ;;  %v2382_v3 = vsel %vm2378_vm7, %v2357_v62, %v7280_v25  ;;  %v4794_v54 = vld [vmem:[%s6043_s28 + $0x50] sm:$0xf]  ;;  %v2077_v25 = vrot.slane %v5238_v63, 2  ;;  %v3659_v56 = vsel %vm8499_vm2, %v3635_v31, %v8625_v36  ;;  %v4929_v7 = vld [vmem:[%s6043_s28 + $0x3c] sm:$0x3] }
 0x1e9   : > { %2025 = vrot.lane.b32.xlu0 %v1978_v24, %s5958_s20  ;;  %v2555_v40 = vsel %vm2553_vm9, %v2530_v60, %v2168_v11  ;;  %v1956_v24 = vshrl.u32 %v5225_v14, 16  ;;  %v3679_v11 = vsel %vm8498_vm3, %v3655_v12, %v8623_v49  ;;  %v2407_v29 = vsel %vm2403_vm11, %v2382_v3, %v7293_v28  ;;  %v8628_v12 = vld [vmem:[#allocation64_spill] sm:$0xff] }
 0x1ea   : > { %v7470_v5 = vpop.permute.xlu1 %1559  ;;  %v3703_v47 = vsel %vm8497_vm4, %v3679_v11, %v8626_v4  ;;  %v2432_v28 = vsel %vm2428_vm12, %v2407_v29, %v7316_v43  ;;  %v1323_v6 = vrot.slane %v5156_v22, 1  ;;  %v5168_v43 = vcombine.low %v4820_v53, %v7489_v35  ;;  %v8630_v11 = vld [vmem:[#allocation67_spill] sm:$0xff] }
 0x1eb   : > { %v3863_v48 = vpop.permute.xlu0 %3862  ;;  %v3727_v16 = vsel %vm8496_vm5, %v3703_v47, %v6873_v34  ;;  %v2457_v10 = vsel %vm8495_vm13, %v2432_v28, %v7350_v0  ;;  %v1961_v63 = vrot.slane %v1959_v32, 2  ;;  %v7517_v0 = vcombine.low %v4794_v54, %v7502_v33  ;;  %v8629_v32 = vld [vmem:[#allocation52_spill] sm:$0xff] }
 0x1ec   : > { %v3888_v8 = vsel %vm8492_vm10, %v2555_v40, %v3863_v48  ;;  %2091 = vrot.lane.b32.xlu1 %v2075_v23, %s5960_s30  ;;  %v5133_v23 = vcombine.low %v4794_v54, %v4795_v2  ;;  %v2482_v14 = vsel %vm8493_vm14, %v2457_v10, %v7373_v61  ;;  %v8627_v61 = vld [vmem:[#allocation63_spill] sm:$0xff]  ;;  %v3683_v53 = vsel %vm8498_vm3, %v3659_v56, %v8628_v12 }
 0x1ed   : > { %v3930_v20 = vrot.slane %v3888_v8, %v7459_v57  ;;  %1865 = vrot.lane.b32.xlu0 %v1848_v21, %s5957_s19  ;;  %v1958_v21 = vrot.slane %v1956_v24, 1  ;;  %v2507_v1 = vsel %vm8494_vm15, %v2482_v14, %v7423_v44  ;;  %v3923_v34 = vcombine.high %v3888_v8, %v3888_v8  ;;  %v4933_v8 = vld [vmem:[%s6043_s28 + $0x4c] sm:$0x3] }
 0x1ee   : > { %v7499_v17 = vpop.permute.xlu1 %1643  ;;  %v3685_v41 = vsel %vm8498_vm3, %v3661_v51, %v8627_v61  ;;  %v3751_v52 = vsel %vm2353_vm6, %v3727_v16, %v6914_v55  ;;  %v2532_v44 = vsel %vm2528_vm8, %v2507_v1, %v7443_v58  ;;  %v5248_v22 = vcombine.low %v7341_v46, %v4929_v7  ;;  %v4935_v58 = vld [vmem:[%s6043_s28 + $0x54] sm:$0x3]  ;;  %v4913_v7 = vld [vmem:[%s6043_s28 + $0x38] sm:$0xc] }
 0x1ef   : > { %v2170_v9 = vpop.permute.xlu0 %2169  ;;  %v3938_v31 = vcombine.high %v3930_v20, %v3930_v20  ;;  %v3709_v62 = vsel %vm8497_vm4, %v3685_v41, %v6861_v30  ;;  %v7531_v40 = vsel %vm2378_vm7, %v3751_v52, %v6979_v26  ;;  %v1962_v55 = vor.u32 %v1961_v63, %v1958_v21  ;;  %v8634_v63 = vld [vmem:[#allocation74_spill] sm:$0xff]  ;;  %v8635_v61 = vld [vmem:[#allocation75_spill] sm:$0xff] }
 0x1f0   : > { %2097 = vrot.lane.b32.xlu1 %v2078_v45, %s5960_s30  ;;  %v2557_v48 = vsel %vm2553_vm9, %v2532_v44, %v2170_v9  ;;  %v1452_v54 = vshrl.u32 %v5168_v43, 16  ;;  %v1455_v2 = vshll.u32 %v5168_v43, 16  ;;  %v3937_v30 = vrot.slane %v3923_v34, %v7459_v57 }
 0x1f1   : > { %2095 = vrot.lane.b32.xlu0 %v2077_v25, %s5960_s30  ;;  %v4125_v24 = vcombine.low %v3930_v20, %v3938_v31  ;;  %v1237_v46 = vshll.u32 %v7517_v0, 16  ;;  %v2309_v49 = vsel %vm8497_vm4, %v7400_v15, %v8629_v32  ;;  %v3707_v29 = vsel %vm8497_vm4, %v3683_v53, %v8630_v11  ;;  %v8641_v32 = vld [vmem:[#allocation66_spill] sm:$0xff] }
 0x1f2   : > { %v1788_v60 = vpop.permute.xlu1 %1787  ;;  %v3733_v25 = vsel %vm8496_vm5, %v3709_v62, %v6894_v50  ;;  %v3816_v20 = vshll.u32 %v7531_v40, 16  ;;  %v2334_v51 = vsel %vm8496_vm5, %v2309_v49, %v7380_v42  ;;  %v5251_v4 = vcombine.low %v7344_v37, %v4935_v58  ;;  %v8631_v37 = vld [vmem:[#allocation69_spill] sm:$0xff]  ;;  %v4821_v62 = vld [vmem:[%s6043_s28 + $0x50] sm:$0xe] }
 0x1f3   : > { %v3865_v45 = vpop.permute.xlu0 %3864  ;;  %v5250_v47 = vcombine.low %v7338_v19, %v4933_v8  ;;  %v2359_v15 = vsel %vm2353_vm6, %v2334_v51, %v7396_v59  ;;  %v1454_v50 = vrot.slane %v1452_v54, 1  ;;  %v1457_v28 = vrot.slane %v1455_v2, 2  ;;  %v8632_v59 = vld [vmem:[#allocation71_spill] sm:$0xff]  ;;  %v8640_v2 = vld [vmem:[#allocation62_spill] sm:$0xff] }
 0x1f4   : > { %v7536_v3 = vsel %vm8492_vm10, %v2557_v48, %v3865_v45  ;;  %1343 = vrot.lane.b32.xlu1 %v1323_v6, %s5952_s8  ;;  %v1235_v16 = vshrl.u32 %v7517_v0, 16  ;;  %v2384_v42 = vsel %vm2378_vm7, %v2359_v15, %v7448_v27  ;;  %v4133_v10 = vrot.slane %v4125_v24, %v7459_v57  ;;  %v8633_v27 = vld [vmem:[#allocation72_spill] sm:$0xff]  ;;  %v7595_v48 = vld [vmem:[%s6043_s28 + $0x54] sm:$0xf]  ;;  %v8636_v45 = vld [vmem:[#allocation58_spill] sm:$0xff] }
 0x1f5   : > { %v7544_v26 = vrot.slane %v7536_v3, %v7459_v57  ;;  %1129 = vrot.lane.b32.xlu0 %v5133_v23, %s5950_s6  ;;  %v1239_v19 = vrot.slane %v1237_v46, 1  ;;  %v3731_v6 = vsel %vm8496_vm5, %v3707_v29, %v8631_v37  ;;  %v3757_v23 = vsel %vm2353_vm6, %v3733_v25, %v8632_v59  ;;  %v8642_v29 = vld [vmem:[#allocation68_spill] sm:$0xff]  ;;  %v8643_v15 = vld [vmem:[#allocation70_spill] sm:$0xff] }
 0x1f6   : > { %v2016_v13 = vpop.permute.xlu1 %2015  ;;  %v2409_v14 = vsel %vm2403_vm11, %v2384_v42, %v7470_v5  ;;  %vm4307_vm10 = vcmask 613376   ;;  %v3755_v21 = vsel %vm2353_vm6, %v3731_v6, %v8633_v27  ;;  %v3781_v1 = vsel %vm2378_vm7, %v3757_v23, %v8634_v63  ;;  %v8645_v6 = vld [vmem:[#allocation73_spill] sm:$0xff]  ;;  %v8646_v27 = vld [vmem:[#allocation76_spill] sm:$0xff] }
 0x1f7   : > { %v4126_v36 = vcombine.low %v3937_v30, %v7544_v26  ;;  %v1860_v56 = vpop.permute.xlu0 %1859  ;;  %v2434_v34 = vsel %vm2428_vm12, %v2409_v14, %v7499_v17  ;;  %v3779_v5 = vsel %vm2378_vm7, %v3755_v21, %v8635_v61  ;;  %v1458_v12 = vor.u32 %v1457_v28, %v1454_v50  ;;  %v8647_v61 = vld [vmem:[#allocation78_spill] sm:$0xff] }
 0x1f8   : > { %2175 = vrot.lane.b32.xlu1 %v5248_v22, %s5961_s4  ;;  %v2459_v41 = vsel %vm8495_vm13, %v2434_v34, %v1788_v60  ;;  %v3818_v53 = vrot.slane %v3816_v20, 1  ;;  %v1240_v44 = vor.u32 %v1239_v19, %v1235_v16  ;;  %v5237_v17 = vcombine.low %v4913_v7, %v7434_v39 }
 0x1f9   : > { %v4140_v9 = vrot.slane %v4126_v36, %v7459_v57  ;;  %2021 = vrot.lane.b32.xlu0 %v1962_v55, %s5958_s20  ;;  %v2484_v52 = vsel %vm8493_vm14, %v2459_v41, %v1860_v56  ;;  %v8637_v60 = vcombine.low %v7371_v18, %v7385_v38  ;;  %v3834_v55 = vshll.u32 %v3781_v1, 16 }
 0x1fa   : > { %v2088_v43 = vpop.permute.xlu1 %2087  ;;  %v3939_v58 = vcombine.high %v7536_v3, %v7536_v3  ;;  %v8638_v54 = vmov 0.0   ;;  %vm8639_vm14 = vmmov 0   ;;  %v3814_v30 = vshrl.u32 %v7531_v40, 16  ;;  %v4844_v3 = vld [vmem:[%s6043_s28 + $0x48] sm:$0xc] }
 0x1fb   : > { %v7583_v31 = vpop.permute.xlu0 %1261  ;;  %v4141_v0 = vcombine.low %v4133_v10, %v4140_v9  ;;  %v3603_v22 = vsel %vm2191_vm0, %v8637_v60, %v8636_v45  ;;  %v3828_v24 = vshll.u32 %v3779_v5, 16  ;;  %v2509_v49 = vsel %vm8494_vm15, %v2484_v52, %v2016_v13  ;;  %v196_v60 = vld [vmem:[%s6043_s28 + $0x34] sm:$0x3] }
 0x1fc   : > { %2181 = vrot.lane.b32.xlu1 %v5251_v4, %s5961_s4  ;;  %v3633_v39 = vsel %vm8500_vm1, %v3603_v22, %v8640_v2  ;;  %v5169_v11 = vcombine.low %v4821_v62, %v7595_v48  ;;  %v3819_v20 = vor.u32 %v3818_v53, %v3814_v30  ;;  %v2534_v51 = vsel %vm2528_vm8, %v2509_v49, %v2088_v43  ;;  %v7641_v43 = vld [vmem:[%s6043_s28 + $0x50] sm:$0xf]  ;;  %v198_v53 = vld [vmem:[%s6043_s28 + $0x3c] sm:$0x3]  ;;  %v4931_v2 = vld [vmem:[%s6043_s28 + $0x44] sm:$0x3] }
 0x1fd   : > { %2179 = vrot.lane.b32.xlu0 %v5250_v47, %s5961_s4  ;;  %5444 = vmatmul.mubr.msk.bf16.vlgmr.msra.gmra.mrb[0].mxu0 %vm4307_vm10, %v4141_v0  ;;  %v3657_v38 = vsel %vm8499_vm2, %v3633_v39, %v8641_v32  ;;  %v2076_v40 = vrot.slane %v5237_v17, 2  ;;  %v3836_v36 = vrot.slane %v3834_v55, 1  ;;  %v3953_v56 = vrot.slane %v3939_v58, %v7459_v57  ;;  %v5869_v39 = vld [vmem:[%s6043_s28 + $0x18] sm:$0xf] }
 0x1fe   : > { %v2172_v8 = vpop.permute.xlu1 %2171  ;;  %5447 = vmatprep.mubr.msk.bf16.mxu0 %vm8639_vm14, %v8638_v54  ;;  %v3681_v25 = vsel %vm8498_vm3, %v3657_v38, %v8642_v29  ;;  %v3954_v13 = vcombine.high %v7544_v26, %v7544_v26  ;;  %v3830_v28 = vrot.slane %v3828_v24, 1  ;;  %vm8644_vm15 = vcmask 392192   ;;  %v192_v24 = vld [vmem:[%s6043_s28 + $0x24] sm:$0x3]  ;;  %v5870_v32 = vld [vmem:[%s6043_s28 + $0x38] sm:$0xf] }
 0x1ff   : > { %v7609_v46 = vpop.permute.xlu0 %1333  ;;  %v2559_v4 = vsel %vm2553_vm9, %v2534_v51, %v2172_v8  ;;  %v3705_v50 = vsel %vm8497_vm4, %v3681_v25, %v8643_v15  ;;  %v5180_v10 = vcombine.low %v4844_v3, %v7489_v35  ;;  %v3832_v9 = vshrl.u32 %v3781_v1, 16  ;;  %v7644_v35 = vld [vmem:[%s6043_s28 + $0x54] sm:$0x7]  ;;  %v194_v3 = vld [vmem:[%s6043_s28 + $0x2c] sm:$0x3] }
 0x200   : > { %1499 = vrot.lane.b32.xlu1 %v1458_v12, %s5953_s9  ;;  %v1460_v19 = vshrl.u32 %v5169_v11, 16  ;;  %v1463_v37 = vshll.u32 %v5169_v11, 16  ;;  %v3729_v59 = vsel %vm8496_vm5, %v3705_v50, %v8645_v6  ;;  %v3826_v23 = vshrl.u32 %v3779_v5, 16  ;;  %v190_v12 = vld [vmem:[%s6043_s28 + $0x1c] sm:$0x3] }
 0x201   : > { %1273 = vrot.lane.b32.xlu0 %v1240_v44, %s5951_s7  ;;  %v5157_v14 = vcombine.low %v4821_v62, %v7502_v33  ;;  %v3837_v7 = vor.u32 %v3836_v36, %v3832_v9  ;;  %v3753_v21 = vsel %vm2353_vm6, %v3729_v59, %v8646_v27  ;;  %v4142_v63 = vcombine.low %v3954_v13, %v3953_v56  ;;  %v7683_v36 = vld [vmem:[%s6043_s28 + $0x58] sm:$0xf]  ;;  %v7686_v56 = vld [vmem:[%s6043_s28 + $0x5c] sm:$0x7]  ;;  %v5872_v13 = vld [vmem:[%s6043_s28 + $0x20] sm:$0xf] }
 0x202   : > { %v3867_v47 = vpop.permute.xlu1 %3866  ;;  %v3831_v0 = vor.u32 %v3830_v28, %v3826_v23  ;;  %v7652_v5 = vsel %vm2378_vm7, %v3753_v21, %v8647_v61  ;;  %v1551_v33 = vrot.slane %v5180_v10, 2  ;;  %v1462_v44 = vrot.slane %v1460_v19, 1  ;;  %v4865_v50 = vld [vmem:[%s6043_s28 + $0x54] sm:$0x3]  ;;  %v4845_v28 = vld [vmem:[%s6043_s28 + $0x50] sm:$0xc] }
 0x203   : > { %v7628_v16 = vsel %vm8644_vm15, %v2559_v4, %v3867_v47  ;;  %v7630_v42 = vpop.permute.xlu0 %1489  ;;  %v1465_v17 = vrot.slane %v1463_v37, 2  ;;  %v7661_v62 = vcombine.low %v7641_v43, %v7644_v35  ;;  %v1324_v45 = vrot.slane %v5157_v14, 1  ;;  %v8648_v10 = vld [vmem:[#allocation5_spill] sm:$0xff] }
 0x204   : > { %v3962_v26 = vrot.slane %v7628_v16, %v7459_v57  ;;  %3870 = vrot.lane.b32.xlu1 %v3819_v20, %s5963_s25  ;;  %v3822_v22 = vshll.u32 %v7652_v5, 16  ;;  %v4150_v55 = vrot.slane %v4142_v63, %v7459_v57  ;;  %v5067_v30 = vcombine.low %v5869_v39, %v190_v12  ;;  %v5871_v20 = vld [vmem:[%s6043_s28 + $0x30] sm:$0xf]  ;;  %v8650_v21 = vld [vmem:[#allocation9_spill] sm:$0xff]  ;;  %v7718_v12 = vld [vmem:[%s6043_s28 + $0x5c] sm:$0x7] }
 0x205   : > { %2093 = vrot.lane.b32.xlu0 %v2076_v40, %s5960_s30  ;;  %v5071_v38 = vcombine.low %v5870_v32, %v198_v53  ;;  %v1466_v29 = vor.u32 %v1465_v17, %v1462_v44  ;;  %v1758_v25 = vshll.u32 %v7661_v62, 16  ;;  %v5070_v51 = vcombine.low %v5871_v20, %v196_v60  ;;  %v8652_v53 = vld [vmem:[#allocation7_spill] sm:$0xff]  ;;  %v8653_v44 = vld [vmem:[#allocation20_spill] sm:$0xff]  ;;  %v8658_v20 = vld [vmem:[#allocation30_spill] sm:$0xff] }
 0x206   : > { %v3970_v1 = vcombine.high %v3962_v26, %v3962_v26  ;;  %v7648_v34 = vpop.permute.xlu1 %1645  ;;  %v5249_v40 = vcombine.low %v7371_v18, %v4931_v2  ;;  %v5068_v4 = vcombine.low %v5872_v13, %v192_v24  ;;  %v3824_v47 = vrot.slane %v3822_v22, 1  ;;  %v8649_v18 = vld [vmem:[#allocation8_spill] sm:$0xff]  ;;  %v8657_v39 = vld [vmem:[#allocation43_spill] sm:$0xff] }
 0x207   : > { %v7654_v41 = vpop.permute.xlu0 %1561  ;;  %v2203_v9 = vsel %vm2191_vm0, %v5067_v30, %v8648_v10  ;;  %v2215_v37 = vsel %vm2191_vm0, %v5071_v38, %v8649_v18  ;;  %v3820_v59 = vshrl.u32 %v7652_v5, 16  ;;  %v1756_v23 = vshrl.u32 %v7661_v62, 16  ;;  %v8654_v62 = vld [vmem:[#allocation31_spill] sm:$0xff] }
 0x208   : > { %v4143_v52 = vcombine.low %v3962_v26, %v3970_v1  ;;  %3876 = vrot.lane.b32.xlu1 %v3837_v7, %s5963_s25  ;;  %v5873_v26 = vld [vmem:[%s6043_s28 + $0x28] sm:$0xf]  ;;  %v1760_v14 = vrot.slane %v1758_v25, 1  ;;  %v4892_v7 = vld [vmem:[%s6043_s28 + $0x50] sm:$0xe]  ;;  %v7705_v27 = vcombine.low %v7683_v36, %v7686_v56  ;;  %v2212_v63 = vsel %vm2191_vm0, %v5070_v51, %v8650_v21  ;;  %v8651_v1 = vld [vmem:[#allocation19_spill] sm:$0xff] }
 0x209   : > { %3874 = vrot.lane.b32.xlu0 %v3831_v0, %s5963_s25  ;;  %v5069_v19 = vcombine.low %v5873_v26, %v194_v3  ;;  %v2244_v0 = vsel %vm8500_vm1, %v2215_v37, %v8651_v1  ;;  %v5192_v61 = vcombine.low %v7641_v43, %v4865_v50  ;;  %v5181_v5 = vcombine.low %v4845_v28, %v7595_v48  ;;  %v8655_v43 = vld [vmem:[#allocation18_spill] sm:$0xff]  ;;  %v7738_v24 = vld [vmem:[%s6043_s28 + $0x58] sm:$0xf]  ;;  %v5874_v26 = vld [vmem:[%s6043_s28 + $0x5c] sm:$0x7] }
 0x20a   : > { %v4157_v58 = vrot.slane %v4143_v52, %v7459_v57  ;;  %v7668_v8 = vpop.permute.xlu1 %1861  ;;  %v2206_v52 = vsel %vm2191_vm0, %v5068_v4, %v8652_v53  ;;  %v2242_v17 = vsel %vm8500_vm1, %v2212_v63, %v8653_v44  ;;  %v3825_v60 = vor.u32 %v3824_v47, %v3820_v59  ;;  %v8660_v47 = vld [vmem:[#allocation6_spill] sm:$0xff]  ;;  %v8663_v44 = vld [vmem:[#allocation17_spill] sm:$0xff] }
 0x20b   : > { %v7674_v49 = vpop.permute.xlu0 %1789  ;;  %v2238_v48 = vsel %vm8500_vm1, %v2206_v52, %v8655_v43  ;;  %v5216_v38 = vcombine.low %v4892_v7, %v7644_v35  ;;  %v1552_v35 = vrot.slane %v5181_v5, 2  ;;  %v2209_v50 = vsel %vm2191_vm0, %v5069_v19, %v8660_v47  ;;  %v8661_v28 = vld [vmem:[#allocation42_spill] sm:$0xff]  ;;  %v7779_v52 = vld [vmem:[%s6043_s28 + $0x5c] sm:$0xf]  ;;  %v8665_v43 = vld [vmem:[#allocation29_spill] sm:$0xff] }
 0x20c   : > { %1571 = vrot.lane.b32.xlu1 %v1551_v33, %s5954_s10  ;;  %v4158_v11 = vcombine.low %v4150_v55, %v4157_v58  ;;  %v7715_v33 = vld [vmem:[%s6043_s28 + $0x58] sm:$0xf]  ;;  %v7729_v55 = vld [vmem:[%s6043_s28 + $0x54] sm:$0xf]  ;;  %v8656_v58 = vld [vmem:[#allocation32_spill] sm:$0xff]  ;;  %v2263_v51 = vsel %vm8499_vm2, %v2238_v48, %v8658_v20  ;;  %v5264_v18 = vcombine.low %v7738_v24, %v5874_v26  ;;  %v1763_v1 = vshrl.u32 %v7705_v27, 16 }
 0x20d   : > { %1345 = vrot.lane.b32.xlu0 %v1324_v45, %s5952_s8  ;;  %v2269_v45 = vsel %vm8499_vm2, %v2244_v0, %v8654_v62  ;;  %v2267_v2 = vsel %vm8499_vm2, %v2242_v17, %v8656_v58  ;;  %v7746_v25 = vcombine.low %v7715_v33, %v7718_v12  ;;  %v5228_v4 = vcombine.low %v4892_v7, %v7729_v55  ;;  %v8662_v0 = vld [vmem:[#allocation15_spill] sm:$0xff]  ;;  %v4916_v20 = vld [vmem:[%s6043_s28 + $0x50] sm:$0xc] }
 0x20e   : > { %v1124_v15 = vpop.permute.xlu1 %1123  ;;  %5448 = vmatmul.mubr.msk.bf16.gmra.mrb[4].mxu0 %vm4307_vm10, %v4158_v11  ;;  %v2294_v30 = vsel %vm8498_vm3, %v2269_v45, %v8657_v39  ;;  %v1761_v11 = vor.u32 %v1760_v14, %v1756_v23  ;;  %v2288_v10 = vsel %vm8498_vm3, %v2263_v51, %v8661_v28  ;;  %v4867_v23 = vld [vmem:[%s6043_s28 + $0x5c] sm:$0x3]  ;;  %v7763_v14 = vld [vmem:[%s6043_s28 + $0x60] sm:$0xf]  ;;  %v1851_v63 = vrot.slane %v5216_v38, 1  ;;  %v8664_v45 = vld [vmem:[#allocation27_spill] sm:$0xff] }
 0x20f   : > { %v1120_v6 = vpop.permute.xlu0 %1119  ;;  %5451 = vmatprep.mubr.msk.bf16.mxu0 %vm8639_vm14, %v8638_v54  ;;  %v1244_v53 = vshll.u32 %v7746_v25, 16  ;;  %v1980_v17 = vshrl.u32 %v5228_v4, 16  ;;  %v1983_v62 = vshll.u32 %v5228_v4, 16  ;;  %v8666_v39 = vld [vmem:[#allocation39_spill] sm:$0xff]  ;;  %vm8685_vm15 = vcmask 293888  }
 0x210   : > { %1501 = vrot.lane.b32.xlu1 %v1466_v29, %s5953_s9  ;;  %v1765_v29 = vshll.u32 %v7705_v27, 16  ;;  %v2313_v21 = vsel %vm8497_vm4, %v2288_v10, %v1120_v6  ;;  %v7776_v6 = vld [vmem:[%s6043_s28 + $0x58] sm:$0xe]  ;;  %v2240_v27 = vsel %vm8500_vm1, %v2209_v50, %v8663_v44 }
 0x211   : > { %2177 = vrot.lane.b32.xlu0 %v5249_v40, %s5961_s4  ;;  %v8659_v40 = vld [vmem:[#allocation44_spill] sm:$0xff]  ;;  %v2265_v48 = vsel %vm8499_vm2, %v2240_v27, %v8665_v43  ;;  %v5229_v51 = vcombine.low %v7776_v6, %v7779_v52  ;;  %v1246_v4 = vrot.slane %v1244_v53, 1  ;;  %v8668_v47 = vld [vmem:[#allocation79_spill] sm:$0xff]  ;;  %v1982_v10 = vrot.slane %v1980_v17, 1  ;;  %v8673_v27 = vld [vmem:[#allocation82_spill] sm:$0xff] }
 0x212   : > { %v7726_v22 = vpop.permute.xlu1 %2017  ;;  %v2292_v13 = vsel %vm8498_vm3, %v2267_v2, %v8659_v40  ;;  %v4797_v2 = vld [vmem:[%s6043_s28 + $0x5c] sm:$0x3]  ;;  %v1985_v26 = vrot.slane %v1983_v62, 2 }
 0x213   : > { %v1126_v32 = vpop.permute.xlu0 %1125  ;;  %v2317_v37 = vsel %vm8497_vm4, %v2292_v13, %v1124_v15  ;;  %v1767_v15 = vrot.slane %v1765_v29, 1  ;;  %v5134_v28 = vcombine.low %v7715_v33, %v4797_v2  ;;  %v1988_v53 = vshrl.u32 %v5229_v51, 16  ;;  %v8675_v2 = vld [vmem:[#allocation83_spill] sm:$0xff] }
 0x214   : > { %v2319_v3 = vsel %vm8497_vm4, %v2294_v30, %v1126_v32  ;;  %3872 = vrot.lane.b32.xlu1 %v3825_v60, %s5963_s25  ;;  %v8667_v32 = vld [vmem:[#allocation77_spill] sm:$0xff]  ;;  %v1991_v44 = vshll.u32 %v5229_v51, 16 }
 0x215   : > { %1655 = vrot.lane.b32.xlu0 %v5192_v61, %s5955_s11  ;;  %v2236_v61 = vsel %vm8500_vm1, %v2203_v9, %v8662_v0  ;;  %v5193_v9 = vcombine.low %v7683_v36, %v4867_v23  ;;  %v3612_v38 = vsel %vm2191_vm0, %v5264_v18, %v8667_v32  ;;  %v1768_v13 = vor.u32 %v1767_v15, %v1763_v1  ;;  %v4822_v18 = vld [vmem:[%s6043_s28 + $0x58] sm:$0xe]  ;;  %v8672_v0 = vld [vmem:[#allocation81_spill] sm:$0xff] }
 0x216   : > { %v1268_v59 = vpop.permute.xlu1 %1267  ;;  %v2261_v60 = vsel %vm8499_vm2, %v2236_v61, %v8664_v45  ;;  %v3639_v50 = vsel %vm8500_vm1, %v3612_v38, %v8668_v47  ;;  %v8670_v23 = vld [vmem:[#allocation51_spill] sm:$0xff]  ;;  %v5240_v1 = vcombine.low %v4916_v20, %v7729_v55  ;;  %v1990_v51 = vrot.slane %v1988_v53, 1 }
 0x217   : > { %v7767_v7 = vsel %vm8496_vm5, %v2317_v37, %v1268_v59  ;;  %v1264_v19 = vpop.permute.xlu0 %1263  ;;  %v2286_v30 = vsel %vm8498_vm3, %v2261_v60, %v8666_v39  ;;  %v7810_v37 = vld [vmem:[%s6043_s28 + $0x5c] sm:$0xf]  ;;  %v8669_v59 = vld [vmem:[#allocation41_spill] sm:$0xff] }
 0x218   : > { %v2338_v5 = vsel %vm8496_vm5, %v2313_v21, %v1264_v19  ;;  %1799 = vrot.lane.b32.xlu1 %v1761_v11, %s5956_s17  ;;  %v5875_v11 = vld [vmem:[%s6043_s28 + $0x64] sm:$0x7]  ;;  %v2311_v21 = vsel %vm8497_vm4, %v2286_v30, %v8670_v23  ;;  %v5170_v45 = vcombine.low %v4822_v18, %v7810_v37  ;;  %v8674_v60 = vld [vmem:[#allocation84_spill] sm:$0xff]  ;;  %v8676_v30 = vld [vmem:[#allocation86_spill] sm:$0xff] }
 0x219   : > { %1573 = vrot.lane.b32.xlu0 %v1552_v35, %s5954_s10  ;;  %v5265_v36 = vcombine.low %v7763_v14, %v5875_v11  ;;  %v1242_v35 = vshrl.u32 %v7746_v25, 16  ;;  %v8671_v25 = vld [vmem:[#allocation80_spill] sm:$0xff]  ;;  %v2336_v43 = vsel %vm8496_vm5, %v2311_v21, %v7583_v31 }
 0x21a   : > { %v7789_v58 = vpop.permute.xlu1 %2089  ;;  %v3663_v19 = vsel %vm8499_vm2, %v3639_v50, %v8671_v25  ;;  %v2361_v38 = vsel %vm2353_vm6, %v2336_v43, %v7609_v46  ;;  %v1468_v46 = vshrl.u32 %v5170_v45, 16 }
 0x21b   : > { %v1270_v29 = vpop.permute.xlu0 %1269  ;;  %v3615_v33 = vsel %vm2191_vm0, %v5265_v36, %v8672_v0  ;;  %v1247_v62 = vor.u32 %v1246_v4, %v1242_v35  ;;  %v2079_v36 = vrot.slane %v5240_v1, 2  ;;  %v2386_v31 = vsel %vm2378_vm7, %v2361_v38, %v7630_v42  ;;  %v8677_v4 = vld [vmem:[#allocation85_spill] sm:$0xff]  ;;  %v8678_v42 = vld [vmem:[#allocation88_spill] sm:$0xff]  ;;  %v4917_v0 = vld [vmem:[%s6043_s28 + $0x58] sm:$0xc] }
 0x21c   : > { %v2344_v40 = vsel %vm8496_vm5, %v2319_v3, %v1270_v29  ;;  %1871 = vrot.lane.b32.xlu1 %v1851_v63, %s5957_s19  ;;  %v2290_v3 = vsel %vm8498_vm3, %v2265_v48, %v8669_v59  ;;  %v5217_v48 = vcombine.low %v7776_v6, %v7686_v56  ;;  %v3641_v39 = vsel %vm8500_vm1, %v3615_v33, %v8675_v2 }
 0x21d   : > { %1657 = vrot.lane.b32.xlu0 %v5193_v9, %s5955_s11  ;;  %v3687_v9 = vsel %vm8498_vm3, %v3663_v19, %v8673_v27  ;;  %v1993_v56 = vrot.slane %v1991_v44, 2  ;;  %v2411_v6 = vsel %vm2403_vm11, %v2386_v31, %v7654_v41  ;;  %v1471_v35 = vshll.u32 %v5170_v45, 16  ;;  %v8679_v41 = vld [vmem:[#allocation87_spill] sm:$0xff]  ;;  %v8683_v44 = vld [vmem:[#allocation92_spill] sm:$0xff] }
 0x21e   : > { %v1336_v63 = vpop.permute.xlu1 %1335  ;;  %v3711_v55 = vsel %vm8497_vm4, %v3687_v9, %v8674_v60  ;;  %v3665_v47 = vsel %vm8499_vm2, %v3641_v39, %v8677_v4  ;;  %v1852_v50 = vrot.slane %v5217_v48, 1  ;;  %v2436_v21 = vsel %vm2428_vm12, %v2411_v6, %v7648_v34  ;;  %v4939_v4 = vld [vmem:[%s6043_s28 + $0x64] sm:$0x3] }
 0x21f   : > { %v2363_v61 = vsel %vm2353_vm6, %v2338_v5, %v1336_v63  ;;  %v1122_v15 = vpop.permute.xlu0 %1121  ;;  %v1986_v5 = vor.u32 %v1985_v26, %v1982_v10  ;;  %v3735_v32 = vsel %vm8496_vm5, %v3711_v55, %v8676_v30  ;;  %v3689_v10 = vsel %vm8498_vm3, %v3665_v47, %v8679_v41  ;;  %v7892_v30 = vld [vmem:[%s6043_s28 + $0x68] sm:$0xf] }
 0x220   : > { %v2315_v17 = vsel %vm8497_vm4, %v2290_v3, %v1122_v15  ;;  %1801 = vrot.lane.b32.xlu1 %v1768_v13, %s5956_s17  ;;  %v8681_v3 = vld [vmem:[#allocation89_spill] sm:$0xff]  ;;  %v1470_v63 = vrot.slane %v1468_v46, 1  ;;  %v1473_v1 = vrot.slane %v1471_v35, 2  ;;  %v8682_v15 = vld [vmem:[#allocation91_spill] sm:$0xff]  ;;  %v5241_v43 = vcombine.low %v4917_v0, %v7779_v52  ;;  %v5876_v46 = vld [vmem:[%s6043_s28 + $0x6c] sm:$0x7] }
 0x221   : > { %1131 = vrot.lane.b32.xlu0 %v5134_v28, %s5950_s6  ;;  %v5158_v28 = vcombine.low %v4822_v18, %v7718_v12  ;;  %v3713_v23 = vsel %vm8497_vm4, %v3689_v10, %v8681_v3  ;;  %v2461_v12 = vsel %vm8495_vm13, %v2436_v21, %v7674_v49  ;;  %v1994_v18 = vor.u32 %v1993_v56, %v1990_v51  ;;  %v8684_v49 = vld [vmem:[#allocation94_spill] sm:$0xff]  ;;  %v8689_v0 = vld [vmem:[#allocation95_spill] sm:$0xff] }
 0x222   : > { %v1342_v11 = vpop.permute.xlu1 %1341  ;;  %v3737_v53 = vsel %vm8496_vm5, %v3713_v23, %v8682_v15  ;;  %v2486_v45 = vsel %vm8685_vm15, %v2461_v12, %v7668_v8  ;;  %vm8686_vm13 = vcmask 318464   ;;  %v1474_v8 = vor.u32 %v1473_v1, %v1470_v63 }
 0x223   : > { %v7843_v29 = vsel %vm2353_vm6, %v2344_v40, %v1342_v11  ;;  %v1340_v20 = vpop.permute.xlu0 %1339  ;;  %v3759_v40 = vsel %vm2353_vm6, %v3735_v32, %v8678_v42  ;;  %v1325_v34 = vrot.slane %v5158_v28, 1  ;;  %v3761_v27 = vsel %vm2353_vm6, %v3737_v53, %v8683_v44  ;;  %v7904_v11 = vld [vmem:[%s6043_s28 + $0x64] sm:$0x7]  ;;  %v4894_v42 = vld [vmem:[%s6043_s28 + $0x60] sm:$0xe] }
 0x224   : > { %v2367_v13 = vsel %vm2353_vm6, %v7767_v7, %v1340_v20  ;;  %1275 = vrot.lane.b32.xlu1 %v1247_v62, %s5951_s7  ;;  %v8680_v7 = vld [vmem:[#allocation90_spill] sm:$0xff]  ;;  %v7877_v62 = vsel %vm2378_vm7, %v3761_v27, %v8684_v49  ;;  %v2511_v48 = vsel %vm8686_vm13, %v2486_v45, %v7726_v22  ;;  %v4846_v22 = vld [vmem:[%s6043_s28 + $0x58] sm:$0xc]  ;;  %vm8687_vm13 = vcmask 392192   ;;  %v7944_v44 = vld [vmem:[%s6043_s28 + $0x64] sm:$0x7] }
 0x225   : > { %2027 = vrot.lane.b32.xlu0 %v1986_v5, %s5958_s20  ;;  %v3783_v26 = vsel %vm2378_vm7, %v3759_v40, %v8680_v7  ;;  %v3955_v5 = vcombine.high %v7628_v16, %v7628_v16  ;;  %v2536_v32 = vsel %vm2528_vm8, %v2511_v48, %v7789_v58  ;;  %v3846_v31 = vshll.u32 %v7877_v62, 16  ;;  %v7922_v40 = vld [vmem:[%s6043_s28 + $0x64] sm:$0xf] }
 0x226   : > { %v1266_v59 = vpop.permute.xlu1 %1265  ;;  %v3840_v33 = vshll.u32 %v3783_v26, 16  ;;  %v2080_v51 = vrot.slane %v5241_v43, 2  ;;  %v5266_v35 = vcombine.low %v7892_v30, %v5876_v46  ;;  %v5182_v47 = vcombine.low %v4846_v22, %v7810_v37 }
 0x227   : > { %v2340_v25 = vsel %vm8496_vm5, %v2315_v17, %v1266_v59  ;;  %v2174_v19 = vpop.permute.xlu0 %2173  ;;  %v4937_v17 = vld [vmem:[%s6043_s28 + $0x5c] sm:$0x3]  ;;  %v5253_v23 = vcombine.low %v7763_v14, %v4939_v4  ;;  %v5230_v21 = vcombine.low %v4894_v42, %v7922_v40  ;;  %v4869_v14 = vld [vmem:[%s6043_s28 + $0x64] sm:$0x3]  ;;  %v3844_v27 = vshrl.u32 %v7877_v62, 16 }
 0x228   : > { %2099 = vrot.lane.b32.xlu1 %v2079_v36, %s5960_s30  ;;  %v3842_v39 = vrot.slane %v3840_v33, 1  ;;  %v5252_v52 = vcombine.low %v7738_v24, %v4937_v17  ;;  %v2561_v16 = vsel %vm2553_vm9, %v2536_v32, %v2174_v19  ;;  %v3838_v36 = vshrl.u32 %v3783_v26, 16  ;;  %v8688_v19 = vld [vmem:[#allocation93_spill] sm:$0xff]  ;;  %v8691_v32 = vld [vmem:[#allocation96_spill] sm:$0xff] }
 0x229   : > { %1873 = vrot.lane.b32.xlu0 %v1852_v50, %s5957_s19  ;;  %v3969_v24 = vrot.slane %v3955_v5, %v7459_v57  ;;  %v3618_v12 = vsel %vm2191_vm0, %v5266_v35, %v8688_v19  ;;  %v1553_v63 = vrot.slane %v5182_v47, 2  ;;  %v1996_v43 = vshrl.u32 %v5230_v21, 16  ;;  %v4799_v35 = vld [vmem:[%s6043_s28 + $0x64] sm:$0x3]  ;;  %v4823_v4 = vld [vmem:[%s6043_s28 + $0x60] sm:$0xe] }
 0x22a   : > { %v1496_v9 = vpop.permute.xlu1 %1495  ;;  %v3843_v28 = vor.u32 %v3842_v39, %v3838_v36  ;;  %v3643_v33 = vsel %vm8500_vm1, %v3618_v12, %v8689_v0  ;;  %v1999_v5 = vshll.u32 %v5230_v21, 16  ;;  %v7980_v47 = vld [vmem:[%s6043_s28 + $0x64] sm:$0xf]  ;;  %v8695_v12 = vld [vmem:[#allocation100_spill] sm:$0xff]  ;;  %vm8708_vm15 = vcmask 269312  }
 0x22b   : > { %v7882_v60 = vsel %vm2378_vm7, %v2367_v13, %v1496_v9  ;;  %v1492_v55 = vpop.permute.xlu0 %1491  ;;  %v8690_v9 = vld [vmem:[#allocation97_spill] sm:$0xff]  ;;  %v5171_v21 = vcombine.low %v4823_v4, %v7980_v47 }
 0x22c   : > { %v2388_v2 = vsel %vm2378_vm7, %v2363_v61, %v1492_v55  ;;  %2029 = vrot.lane.b32.xlu1 %v1994_v18, %s5958_s20  ;;  %v7901_v61 = vld [vmem:[%s6043_s28 + $0x60] sm:$0xf]  ;;  %v3848_v18 = vrot.slane %v3846_v31, 1  ;;  %v3667_v17 = vsel %vm8499_vm2, %v3643_v33, %v8690_v9  ;;  %v5218_v55 = vcombine.low %v4894_v42, %v7904_v11  ;;  %v8693_v42 = vld [vmem:[#allocation98_spill] sm:$0xff] }
 0x22d   : > { %1347 = vrot.lane.b32.xlu0 %v1325_v34, %s5952_s8  ;;  %v5206_v50 = vcombine.low %v7901_v61, %v7904_v11  ;;  %v4798_v34 = vld [vmem:[%s6043_s28 + $0x60] sm:$0xf]  ;;  %v5194_v48 = vcombine.low %v7901_v61, %v4869_v14  ;;  %v1476_v14 = vshrl.u32 %v5171_v21, 16 }
 0x22e   : > { %v3869_v38 = vpop.permute.xlu1 %3868  ;;  %v5147_v62 = vcombine.low %v4798_v34, %v7944_v44  ;;  %v3849_v39 = vor.u32 %v3848_v18, %v3844_v27  ;;  %v1853_v31 = vrot.slane %v5218_v55, 1  ;;  %v200_v55 = vld [vmem:[%s6043_s28 + $0x44] sm:$0x3] }
 0x22f   : > { %v3894_v58 = vsel %vm8687_vm13, %v2561_v16, %v3869_v38  ;;  %v1498_v20 = vpop.permute.xlu0 %1497  ;;  %v1772_v1 = vshll.u32 %v5206_v50, 16  ;;  %v8692_v38 = vld [vmem:[#allocation99_spill] sm:$0xff]  ;;  %vm8709_vm13 = vmmov %vm8708_vm15 }
 0x230   : > { %v3971_v56 = vcombine.high %v3894_v58, %v3894_v58  ;;  %v3978_v6 = vrot.slane %v3894_v58, %v7459_v57  ;;  %v7912_v13 = vsel %vm2378_vm7, %v7843_v29, %v1498_v20  ;;  %1503 = vrot.lane.b32.xlu1 %v1474_v8, %s5953_s9  ;;  %v1998_v58 = vrot.slane %v1996_v43, 1  ;;  %v8697_v43 = vld [vmem:[#allocation102_spill] sm:$0xff] }
 0x231   : > { %2183 = vrot.lane.b32.xlu0 %v5252_v52, %s5961_s4  ;;  %v1774_v8 = vrot.slane %v1772_v1, 1  ;;  %v3691_v52 = vsel %vm8498_vm3, %v3667_v17, %v8691_v32  ;;  %v2001_v20 = vrot.slane %v1999_v5, 2  ;;  %v8696_v1 = vld [vmem:[#allocation103_spill] sm:$0xff]  ;;  %v4870_v17 = vld [vmem:[%s6043_s28 + $0x68] sm:$0xf] }
 0x232   : > { %v3985_v29 = vrot.slane %v3971_v56, %v7459_v57  ;;  %v3986_v41 = vcombine.high %v3978_v6, %v3978_v6  ;;  %v4159_v10 = vcombine.low %v3969_v24, %v3978_v6  ;;  %v1564_v7 = vpop.permute.xlu1 %1563  ;;  %v3715_v22 = vsel %vm8497_vm4, %v3691_v52, %v8692_v38  ;;  %v4918_v56 = vld [vmem:[%s6043_s28 + $0x60] sm:$0xc] }
 0x233   : > { %v2413_v26 = vsel %vm2403_vm11, %v2388_v2, %v1564_v7  ;;  %v1338_v59 = vpop.permute.xlu0 %1337  ;;  %v1770_v2 = vshrl.u32 %v5206_v50, 16  ;;  %v1251_v6 = vshll.u32 %v5147_v62, 16  ;;  %v3739_v50 = vsel %vm8496_vm5, %v3715_v22, %v8693_v42  ;;  %v4847_v52 = vld [vmem:[%s6043_s28 + $0x60] sm:$0xc] }
 0x234   : > { %v4160_v3 = vcombine.low %v3986_v41, %v3985_v29  ;;  %v2365_v37 = vsel %vm2353_vm6, %v2340_v25, %v1338_v59  ;;  %3878 = vrot.lane.b32.xlu1 %v3843_v28, %s5963_s25  ;;  %v4167_v15 = vrot.slane %v4159_v10, %v7459_v57  ;;  %v8694_v29 = vld [vmem:[#allocation101_spill] sm:$0xff]  ;;  %v5877_v10 = vld [vmem:[%s6043_s28 + $0x74] sm:$0x7]  ;;  %v5242_v59 = vcombine.low %v4918_v56, %v7922_v40  ;;  %v5878_v38 = vld [vmem:[%s6043_s28 + $0x40] sm:$0xf] }
 0x235   : > { %2101 = vrot.lane.b32.xlu0 %v2080_v51, %s5960_s30  ;;  %v7971_v51 = vld [vmem:[%s6043_s28 + $0x70] sm:$0xf]  ;;  %v1775_v24 = vor.u32 %v1774_v8, %v1770_v2  ;;  %v3763_v41 = vsel %vm2353_vm6, %v3739_v50, %v8694_v29  ;;  %v8698_v2 = vld [vmem:[#allocation105_spill] sm:$0xff]  ;;  %v5072_v22 = vcombine.low %v5878_v38, %v200_v55  ;;  %v5183_v42 = vcombine.low %v4847_v52, %v7980_v47  ;;  %v4871_v29 = vld [vmem:[%s6043_s28 + $0x6c] sm:$0x3] }
 0x236   : > { %v4174_v25 = vrot.slane %v4160_v3, %v7459_v57  ;;  %v7939_v53 = vpop.permute.xlu1 %1569  ;;  %v5267_v7 = vcombine.low %v7971_v51, %v5877_v10  ;;  %v5135_v3 = vcombine.low %v4798_v34, %v4799_v35  ;;  %v3787_v18 = vsel %vm2378_vm7, %v3763_v41, %v8695_v12  ;;  %v8700_v35 = vld [vmem:[#allocation107_spill] sm:$0xff]  ;;  %v8705_v55 = vld [vmem:[#allocation34_spill] sm:$0xff] }
 0x237   : > { %v7949_v49 = vpop.permute.xlu0 %1567  ;;  %v2081_v0 = vrot.slane %v5242_v59, 2  ;;  %v1479_v34 = vshll.u32 %v5171_v21, 16  ;;  %v3852_v27 = vshll.u32 %v3787_v18, 16  ;;  %v8703_v21 = vld [vmem:[#allocation106_spill] sm:$0xff] }
 0x238   : > { %2185 = vrot.lane.b32.xlu1 %v5253_v23, %s5961_s4  ;;  %v4175_v45 = vcombine.low %v4167_v15, %v4174_v25  ;;  %v1253_v23 = vrot.slane %v1251_v6, 1  ;;  %v3621_v40 = vsel %vm2191_vm0, %v5267_v7, %v8696_v1  ;;  %v4941_v15 = vld [vmem:[%s6043_s28 + $0x6c] sm:$0x3]  ;;  %v5159_v25 = vcombine.low %v4823_v4, %v7944_v44  ;;  %v8701_v7 = vld [vmem:[#allocation11_spill] sm:$0xff] }
 0x239   : > { %1575 = vrot.lane.b32.xlu0 %v1553_v63, %s5954_s10  ;;  %v3645_v5 = vsel %vm8500_vm1, %v3621_v40, %v8697_v43  ;;  %v5254_v8 = vcombine.low %v7892_v30, %v4941_v15  ;;  %v1481_v32 = vrot.slane %v1479_v34, 2  ;;  %v3850_v30 = vshrl.u32 %v3787_v18, 16  ;;  %v8704_v18 = vld [vmem:[#allocation109_spill] sm:$0xff] }
 0x23a   : > { %v1648_v16 = vpop.permute.xlu1 %1647  ;;  %5452 = vmatmul.mubr.msk.bf16.gmra.mrb[8].mxu0 %vm4307_vm10, %v4175_v45  ;;  %v4883_v45 = vld [vmem:[%s6043_s28 + $0x6c] sm:$0x7]  ;;  %v3669_v44 = vsel %vm8499_vm2, %v3645_v5, %v8698_v2  ;;  %v5195_v40 = vcombine.low %v4870_v17, %v4871_v29 }
 0x23b   : > { %v7962_v61 = vsel %vm2428_vm12, %v2413_v26, %v1648_v16  ;;  %v1494_v11 = vpop.permute.xlu0 %1493  ;;  %5455 = vmatprep.mubr.msk.bf16.mxu0 %vm8639_vm14, %v8638_v54  ;;  %v2002_v26 = vor.u32 %v2001_v20, %v1998_v58  ;;  %v5207_v16 = vcombine.low %v4870_v17, %v4883_v45  ;;  %v4895_v58 = vld [vmem:[%s6043_s28 + $0x68] sm:$0xe]  ;;  %v4907_v20 = vld [vmem:[%s6043_s28 + $0x6c] sm:$0xf] }
 0x23c   : > { %v7967_v36 = vsel %vm2378_vm7, %v2365_v37, %v1494_v11  ;;  %3880 = vrot.lane.b32.xlu1 %v3849_v39, %s5963_s25  ;;  %v1249_v37 = vshrl.u32 %v5147_v62, 16  ;;  %v1326_v62 = vrot.slane %v5159_v25, 1  ;;  %v1478_v39 = vrot.slane %v1476_v14, 1  ;;  %v4919_v14 = vld [vmem:[%s6043_s28 + $0x68] sm:$0xc]  ;;  %v8706_v2 = vld [vmem:[#allocation46_spill] sm:$0xff] }
 0x23d   : > { %1659 = vrot.lane.b32.xlu0 %v5194_v48, %s5955_s11  ;;  %v3854_v11 = vrot.slane %v3852_v27, 1  ;;  %v1779_v41 = vshll.u32 %v5207_v16, 16  ;;  %v5231_v10 = vcombine.low %v4895_v58, %v4907_v20  ;;  %v1777_v15 = vshrl.u32 %v5207_v16, 16 }
 0x23e   : > { %v7975_v46 = vpop.permute.xlu1 %1653  ;;  %v1254_v33 = vor.u32 %v1253_v23, %v1249_v37  ;;  %v1482_v50 = vor.u32 %v1481_v32, %v1478_v39  ;;  %v8702_v37 = vld [vmem:[#allocation22_spill] sm:$0xff]  ;;  %v5243_v32 = vcombine.low %v4919_v14, %v4907_v20 }
 0x23f   : > { %v7984_v28 = vpop.permute.xlu0 %1651  ;;  %v3855_v59 = vor.u32 %v3854_v11, %v3850_v30  ;;  %v1781_v25 = vrot.slane %v1779_v41, 1  ;;  %v2004_v34 = vshrl.u32 %v5231_v10, 16  ;;  %v2007_v27 = vshll.u32 %v5231_v10, 16 }
 0x240   : > { %1875 = vrot.lane.b32.xlu1 %v1853_v31, %s5957_s19 }
 0x241   : > { %1803 = vrot.lane.b32.xlu0 %v1775_v24, %s5956_s17  ;;  %v8699_v24 = vld [vmem:[#allocation104_spill] sm:$0xff]  ;;  %v1782_v52 = vor.u32 %v1781_v25, %v1777_v15  ;;  %v2006_v16 = vrot.slane %v2004_v34, 1  ;;  %v2009_v38 = vrot.slane %v2007_v27, 2 }
 0x242   : > { %v7994_v19 = vpop.permute.xlu1 %1791  ;;  %v3693_v56 = vsel %vm8498_vm3, %v3669_v44, %v8699_v24  ;;  %v2082_v24 = vrot.slane %v5243_v32, 2 }
 0x243   : > { %v7998_v63 = vpop.permute.xlu0 %1565  ;;  %v3717_v4 = vsel %vm8497_vm4, %v3693_v56, %v8700_v35  ;;  %v2010_v56 = vor.u32 %v2009_v38, %v2006_v16 }
 0x244   : > { %2031 = vrot.lane.b32.xlu1 %v2002_v26, %s5958_s20  ;;  %v2218_v26 = vsel %vm2191_vm0, %v5072_v22, %v8701_v7  ;;  %v3741_v12 = vsel %vm8496_vm5, %v3717_v4, %v8703_v21  ;;  %v4943_v4 = vld [vmem:[%s6043_s28 + $0x74] sm:$0x3] }
 0x245   : > { %1133 = vrot.lane.b32.xlu0 %v5135_v3, %s5950_s6  ;;  %v2246_v23 = vsel %vm8500_vm1, %v2218_v26, %v8702_v37  ;;  %v3765_v1 = vsel %vm2353_vm6, %v3741_v12, %v8704_v18  ;;  %v5255_v29 = vcombine.low %v7971_v51, %v4943_v4 }
 0x246   : > { %v8006_v9 = vpop.permute.xlu1 %1797  ;;  %v2271_v43 = vsel %vm8499_vm2, %v2246_v23, %v8705_v55  ;;  %vm8713_vm2 = vcmask 318464  }
 0x247   : > { %v8013_v48 = vpop.permute.xlu0 %1795  ;;  %v2296_v44 = vsel %vm8498_vm3, %v2271_v43, %v8706_v2 }
 0x248   : > { %2103 = vrot.lane.b32.xlu1 %v2081_v0, %s5960_s30  ;;  %v1554_v0 = vrot.slane %v5183_v42, 2 }
 0x249   : > { %1277 = vrot.lane.b32.xlu0 %v1254_v33, %s5951_s7  ;;  %v5219_v33 = vcombine.low %v4895_v58, %v4883_v45 }
 0x24a   : > { %v8022_v31 = vpop.permute.xlu1 %1863 }
 0x24b   : > { %v8028_v6 = vpop.permute.xlu0 %1649  ;;  %v1854_v39 = vrot.slane %v5219_v33, 1  ;;  %v2417_v33 = vsel %vm2403_vm11, %v7882_v60, %v7949_v49 }
 0x24c   : > { %2187 = vrot.lane.b32.xlu1 %v5254_v8, %s5961_s4  ;;  %v8707_v8 = vld [vmem:[#allocation108_spill] sm:$0xff]  ;;  %v2442_v25 = vsel %vm2428_vm12, %v2417_v33, %v7984_v28 }
 0x24d   : > { %1349 = vrot.lane.b32.xlu0 %v1326_v62, %s5952_s8  ;;  %v3789_v17 = vsel %vm2378_vm7, %v3765_v1, %v8707_v8  ;;  %v2467_v27 = vsel %vm8709_vm13, %v2442_v25, %v8013_v48 }
 0x24e   : > { %v8038_v3 = vpop.permute.xlu1 %1869  ;;  %v3858_v22 = vshll.u32 %v3789_v17, 16 }
 0x24f   : > { %v8044_v47 = vpop.permute.xlu0 %1867 }
 0x250   : > { %3882 = vrot.lane.b32.xlu1 %v3855_v59, %s5963_s25  ;;  %v3860_v30 = vrot.slane %v3858_v22, 1 }
 0x251   : > { %1505 = vrot.lane.b32.xlu0 %v1482_v50, %s5953_s9  ;;  %v3856_v50 = vshrl.u32 %v3789_v17, 16 }
 0x252   : > { %v8053_v5 = vpop.permute.xlu1 %1793 }
 0x253   : > { %v1128_v62 = vpop.permute.xlu0 %1127  ;;  %v3861_v41 = vor.u32 %v3860_v30, %v3856_v50 }
 0x254   : > { %v2321_v45 = vsel %vm8497_vm4, %v2296_v44, %v1128_v62  ;;  %1661 = vrot.lane.b32.xlu1 %v5195_v40, %s5955_s11  ;;  %vm8711_vm4 = vmmov %vm8709_vm13 }
 0x255   : > { %1577 = vrot.lane.b32.xlu0 %v1554_v0, %s5954_s10  ;;  %v2419_v0 = vsel %vm2403_vm11, %v7912_v13, %v7939_v53  ;;  %v2463_v60 = vsel %vm8711_vm4, %v7962_v61, %v7994_v19  ;;  %vm8716_vm13 = vmmov %vm8713_vm2  ;;  %s5397_s10 = sshll.u32 %s6008_s16, 5 }
 0x256   : > { %v2024_v11 = vpop.permute.xlu1 %2023  ;;  %v2444_v15 = vsel %vm2428_vm12, %v2419_v0, %v7975_v46 }
 0x257   : > { %v2020_v58 = vpop.permute.xlu0 %2019  ;;  %v2469_v14 = vsel %vm8708_vm15, %v2444_v15, %v8006_v9  ;;  %vm8715_vm15 = vmmov %vm8713_vm2 }
 0x258   : > { %1877 = vrot.lane.b32.xlu1 %v1854_v39, %s5957_s19 }
 0x259   : > { %1805 = vrot.lane.b32.xlu0 %v1782_v52, %s5956_s17 }
 0x25a   : > { %v1272_v35 = vpop.permute.xlu1 %1271 }
 0x25b   : > { %v8066_v42 = vsel %vm8496_vm5, %v2321_v45, %v1272_v35  ;;  %v2026_v20 = vpop.permute.xlu0 %2025  ;;  %vm8710_vm5 = vcmask 293888  }
 0x25c   : > { %2105 = vrot.lane.b32.xlu1 %v2082_v24, %s5960_s30  ;;  %v2494_v13 = vsel %vm8710_vm5, %v2469_v14, %v8038_v3  ;;  %vm8712_vm3 = vmmov %vm8710_vm5  ;;  %s8441_s30 = scalar_lea.hbm %s8487_s3, %s5397_s10 }
 0x25d   : > { %2033 = vrot.lane.b32.xlu0 %v2010_v56, %s5958_s20  ;;  %v2492_v49 = vsel %vm8712_vm3, %v2467_v27, %v8044_v47  ;;  %v2519_v46 = vsel %vm8713_vm2, %v2494_v13, %v2026_v20  ;;  %vm8714_vm1 = vmmov %vm8712_vm3  ;;  %vm8717_vm3 = vcmask 392192  }
 0x25e   : > { %v2092_v10 = vpop.permute.xlu1 %2091  ;;  %v2488_v28 = vsel %vm8714_vm1, %v2463_v60, %v8022_v31  ;;  %v2517_v9 = vsel %vm8715_vm15, %v2492_v49, %v2024_v11  ;;  %vm8718_vm1 = vmmov %vm8717_vm3  ;;  %v2415_v11 = vsel %vm2403_vm11, %v7967_v36, %v7998_v63 }
 0x25f   : > { %v1866_v7 = vpop.permute.xlu0 %1865  ;;  %v2513_v55 = vsel %vm8716_vm13, %v2488_v28, %v2020_v58  ;;  %vm8719_vm2 = vmmov %vm8718_vm1  ;;  %v2440_v56 = vsel %vm2428_vm12, %v2415_v11, %v8028_v6 }
 0x260   : > { %3884 = vrot.lane.b32.xlu1 %v3861_v41, %s5963_s25  ;;  %v2538_v61 = vsel %vm2528_vm8, %v2513_v55, %v2092_v10  ;;  %v2465_v35 = vsel %vm8711_vm4, %v2440_v56, %v8053_v5  ;;  %vm8720_vm15 = vmmov %vm8716_vm13 }
 0x261   : > { %2189 = vrot.lane.b32.xlu0 %v5255_v29, %s5961_s4  ;;  %v2490_v29 = vsel %vm8710_vm5, %v2465_v35, %v1866_v7  ;;  %vm8721_vm13 = vmmov %vm8718_vm1  ;;  %v8725_v35 = vld [vmem:[#allocation33_spill] sm:$0xff] }
 0x262   : > { %v2098_v26 = vpop.permute.xlu1 %2097 }
 0x263   : > { %v2096_v59 = vpop.permute.xlu0 %2095  ;;  %v2544_v48 = vsel %vm2528_vm8, %v2519_v46, %v2098_v26 }
 0x264   : > { %v2542_v3 = vsel %vm2528_vm8, %v2517_v9, %v2096_v59 }
 0x266   : > { %v8073_v37 = vpop.permute.xlu1 %1343 }
 0x267   : > { %v8075_v23 = vpop.permute.xlu0 %1129 }
 0x26a   : > { %v2176_v21 = vpop.permute.xlu1 %2175 }
 0x26b   : > { %v2022_v12 = vpop.permute.xlu0 %2021  ;;  %v2563_v31 = vsel %vm2553_vm9, %v2538_v61, %v2176_v21 }
 0x26c   : > { %v2515_v41 = vsel %vm8720_vm15, %v2490_v29, %v2022_v12  ;;  %vm8730_vm15 = vcmask 121856  }
 0x26e   : > { %v2182_v18 = vpop.permute.xlu1 %2181 }
 0x26f   : > { %v2180_v1 = vpop.permute.xlu0 %2179  ;;  %v2569_v43 = vsel %vm2553_vm9, %v2544_v48, %v2182_v18 }
 0x270   : > { %v2567_v19 = vsel %vm2553_vm9, %v2542_v3, %v2180_v1 }
 0x272   : > { %v8077_v40 = vpop.permute.xlu1 %1499 }
 0x273   : > { %v8079_v51 = vpop.permute.xlu0 %1273 }
 0x276   : > { %v3871_v34 = vpop.permute.xlu1 %3870 }
 0x277   : > { %v2094_v53 = vpop.permute.xlu0 %2093  ;;  %v3896_v45 = vsel %vm8719_vm2, %v2563_v31, %v3871_v34  ;;  %vm8727_vm2 = vmmov %vm8711_vm4  ;;  %vm8729_vm4 = vcmask 97280  }
 0x278   : > { %v3994_v58 = vrot.slane %v3896_v45, %v7459_v57  ;;  %v3987_v10 = vcombine.high %v3896_v45, %v3896_v45  ;;  %v2540_v6 = vsel %vm2528_vm8, %v2515_v41, %v2094_v53  ;;  %v2371_v45 = vsel %vm2353_vm6, %v8066_v42, %v8073_v37 }
 0x27a   : > { %v3877_v2 = vpop.permute.xlu1 %3876  ;;  %v4002_v26 = vcombine.high %v3994_v58, %v3994_v58  ;;  %v4001_v7 = vrot.slane %v3987_v10, %v7459_v57 }
 0x27b   : > { %v3902_v47 = vsel %vm8717_vm3, %v2569_v43, %v3877_v2  ;;  %v3875_v44 = vpop.permute.xlu0 %3874  ;;  %vm8724_vm3 = vcmask 48128  }
 0x27c   : > { %v4035_v8 = vcombine.high %v3902_v47, %v3902_v47  ;;  %v4042_v17 = vrot.slane %v3902_v47, %v7459_v57  ;;  %v3900_v62 = vsel %vm8718_vm1, %v2567_v19, %v3875_v44  ;;  %v4176_v33 = vcombine.low %v3994_v58, %v4002_v26  ;;  %v202_v44 = vld [vmem:[%s6043_s28 + $0x4c] sm:$0x3] }
 0x27d   : > { %v4019_v39 = vcombine.high %v3900_v62, %v3900_v62  ;;  %v4026_v20 = vrot.slane %v3900_v62, %v7459_v57  ;;  %vm8726_vm1 = vcmask 72704  }
 0x27e   : > { %v4049_v32 = vrot.slane %v4035_v8, %v7459_v57  ;;  %v4050_v52 = vcombine.high %v4042_v17, %v4042_v17  ;;  %v8118_v16 = vpop.permute.xlu1 %1571  ;;  %v4184_v60 = vrot.slane %v4176_v33, %v7459_v57 }
 0x27f   : > { %v4033_v38 = vrot.slane %v4019_v39, %v7459_v57  ;;  %v8121_v22 = vpop.permute.xlu0 %1345  ;;  %v4034_v21 = vcombine.high %v4026_v20, %v4026_v20 }
 0x280   : > { %v4211_v24 = vcombine.low %v4050_v52, %v4049_v32  ;;  %v2396_v32 = vsel %vm2378_vm7, %v2371_v45, %v8077_v40  ;;  %v8742_v45 = vld [vmem:[#allocation48_spill] sm:$0xff] }
 0x281   : > { %v4210_v30 = vcombine.low %v4033_v38, %v4042_v17  ;;  %v4194_v25 = vcombine.low %v4026_v20, %v4034_v21  ;;  %v5879_v17 = vld [vmem:[%s6043_s28 + $0x48] sm:$0xf]  ;;  %v8722_v38 = vld [vmem:[#allocation10_spill] sm:$0xff]  ;;  %v2421_v58 = vsel %vm2403_vm11, %v2396_v32, %v8118_v16 }
 0x282   : > { %v4225_v4 = vrot.slane %v4211_v24, %v7459_v57  ;;  %v8133_v50 = vpop.permute.xlu1 %1501  ;;  %v5073_v62 = vcombine.low %v5879_v17, %v202_v44  ;;  %v8723_v24 = vld [vmem:[#allocation21_spill] sm:$0xff] }
 0x283   : > { %v4218_v36 = vrot.slane %v4210_v30, %v7459_v57  ;;  %v2178_v63 = vpop.permute.xlu0 %2177  ;;  %v4208_v28 = vrot.slane %v4194_v25, %v7459_v57  ;;  %v8728_v20 = vld [vmem:[#allocation45_spill] sm:$0xff] }
 0x284   : > { %v2565_v5 = vsel %vm2553_vm9, %v2540_v6, %v2178_v63  ;;  %v2221_v11 = vsel %vm2191_vm0, %v5073_v62, %v8722_v38 }
 0x285   : > { %v4226_v59 = vcombine.low %v4218_v36, %v4225_v4  ;;  %v2248_v56 = vsel %vm8724_vm3, %v2221_v11, %v8723_v24  ;;  %vm8732_vm3 = vcmask 146432  }
 0x286   : > { %v3873_v18 = vpop.permute.xlu1 %3872  ;;  %v2273_v4 = vsel %vm8726_vm1, %v2248_v56, %v8725_v35  ;;  %vm8733_vm1 = vcmask 392192  }
 0x287   : > { %v3898_v1 = vsel %vm8721_vm13, %v2565_v5, %v3873_v18  ;;  %5464 = vmatmul.mubr.msk.bf16.vlgmr.msra.gmra.mrb[0].mxu1 %vm4307_vm10, %v4226_v59  ;;  %v1656_v0 = vpop.permute.xlu0 %1655  ;;  %v2298_v40 = vsel %vm8729_vm4, %v2273_v4, %v8728_v20  ;;  %vm8731_vm13 = vcmask 318464   ;;  %vm8734_vm4 = vmmov %vm8710_vm5 }
 0x288   : > { %v4003_v15 = vcombine.high %v3898_v1, %v3898_v1  ;;  %v4010_v12 = vrot.slane %v3898_v1, %v7459_v57  ;;  %5467 = vmatprep.mubr.msk.bf16.mxu1 %vm8639_vm14, %v8638_v54  ;;  %v2446_v30 = vsel %vm2428_vm12, %v2421_v58, %v1656_v0  ;;  %v2323_v16 = vsel %vm8730_vm15, %v2298_v40, %v8075_v23  ;;  %vm8736_vm15 = vmmov %vm8733_vm1  ;;  %v5881_v40 = vld [vmem:[%s6043_s28 + $0x58] sm:$0xf] }
 0x289   : > { %v2348_v41 = vsel %vm8732_vm3, %v2323_v16, %v8079_v51  ;;  %vm8741_vm3 = vcmask 72704  }
 0x28a   : > { %v4017_v14 = vrot.slane %v4003_v15, %v7459_v57  ;;  %v4018_v34 = vcombine.high %v4010_v12, %v4010_v12  ;;  %v4177_v27 = vcombine.low %v4001_v7, %v4010_v12  ;;  %v1800_v13 = vpop.permute.xlu1 %1799  ;;  %v2373_v26 = vsel %vm2353_vm6, %v2348_v41, %v8121_v22  ;;  %v204_v22 = vld [vmem:[%s6043_s28 + $0x54] sm:$0x3]  ;;  %v8748_v41 = vld [vmem:[#allocation12_spill] sm:$0xff] }
 0x28b   : > { %v1574_v53 = vpop.permute.xlu0 %1573  ;;  %v2471_v42 = vsel %vm8727_vm2, %v2446_v30, %v1800_v13  ;;  %v2398_v21 = vsel %vm2378_vm7, %v2373_v26, %v8133_v50  ;;  %v206_v30 = vld [vmem:[%s6043_s28 + $0x5c] sm:$0x3]  ;;  %v8750_v26 = vld [vmem:[#allocation23_spill] sm:$0xff] }
 0x28c   : > { %v4191_v49 = vrot.slane %v4177_v27, %v7459_v57  ;;  %v4193_v46 = vcombine.low %v4018_v34, %v4017_v14  ;;  %v2423_v18 = vsel %vm2403_vm11, %v2398_v21, %v1574_v53  ;;  %v5880_v34 = vld [vmem:[%s6043_s28 + $0x50] sm:$0xf]  ;;  %v8752_v21 = vld [vmem:[#allocation35_spill] sm:$0xff]  ;;  %s5489_s28 = smul.u32 72, %s6037_s24  ;;  %s169_s24 = sand.u32 1, %s5936_s13  }
 0x28d   : > { %v5074_v27 = vcombine.low %v5880_v34, %v204_v22  ;;  %s4772_s9 = sshll.u32 %s169_s24, 1  ;;  %s4668_s4 = scalar_lea.sflag [#allocation3], %s169_s24 }
 0x28e   : > { %v4201_v9 = vrot.slane %v4193_v46, %v7459_v57  ;;  %v1872_v48 = vpop.permute.xlu1 %1871  ;;  %v4192_v55 = vcombine.low %v4184_v60, %v4191_v49  ;;  %s8261_s8 = scalar_lea.vmem %s8486_s2, %s5489_s28  ;;  %s171_s11 = scalar_lea.vmem [#allocation2], %s4772_s9 }
 0x28f   : > { %v1658_v3 = vpop.permute.xlu0 %1657  ;;  %v2496_v29 = vsel %vm8710_vm5, %v2471_v42, %v1872_v48  ;;  %vm8735_vm5 = vmmov %vm8731_vm13  ;;  %v8737_v48 = vld [vmem:[#allocation13_spill] sm:$0xff]  ;;  %s4684_s17 = sshll.u32 %s171_s11, 4  ;;  %s8443_s17 = int_to_ptr.vmem [resolvable:$true] %s4684_s17 }
 0x290   : > { %5456 = vmatmul.mubr.msk.bf16.gmra.mrb[12].mxu0 %vm4307_vm10, %v4192_v55  ;;  %v4209_v43 = vcombine.low %v4201_v9, %v4208_v28  ;;  %v2448_v51 = vsel %vm2428_vm12, %v2423_v18, %v1658_v3  ;;  %v2224_v55 = vsel %vm2191_vm0, %v5074_v27, %v8737_v48  ;;  %s5882_s16 = scalar_lea.vmem %s8443_s17, 32  ;;  %p5889_p0 = scmp.lt.s32.totalorder %s8443_s17, %s5887_s27 }
 0x291   : > { %5459 = vmatprep.mubr.msk.bf16.mxu0 %vm8639_vm14, %v8638_v54  ;;  %p5883_p11 = scmp.ne.s32.totalorder %s8443_s17, %s5882_s16  ;;  %p5890_p1 = scmp.lt.s32.totalorder %s5888_s29, %s5882_s16 }
 0x292   : > { %v1802_v2 = vpop.permute.xlu1 %1801 }
 0x293   : > { %v8154_v61 = vpop.permute.xlu0 %1131  ;;  %v2473_v0 = vsel %vm8727_vm2, %v2448_v51, %v1802_v2  ;;  %v8738_v2 = vld [vmem:[#allocation24_spill] sm:$0xff]  ;;  %vm8744_vm2 = vcmask 121856   ;;  %p5884_p12 = pnand %p5883_p11, %p6025_p5  ;;  %p5891_p2 = por %p5890_p1, %p5889_p0 }
 0x295   : > { %p5885_p13 = pneg %p5884_p12 }
 0x296   : > { %v8156_v19 = vpop.permute.xlu1 %1275 }
 0x297   : > { %v2028_v47 = vpop.permute.xlu0 %2027  ;;  %p5892_p3 = pnand %p5891_p2, %p5885_p13 }
 0x298   : > { %5460 = vmatmul.mubr.msk.bf16.gmra.mrb[16].mxu0 %vm4307_vm10, %v4209_v43  ;;  %v2521_v63 = vsel %vm8731_vm13, %v2496_v29, %v2028_v47  ;;  %vm8739_vm13 = vcmask 48128   ;;  %v5075_v29 = vcombine.low %v5881_v40, %v206_v30 }
 0x299   : > { %v2250_v47 = vsel %vm8739_vm13, %v2224_v55, %v8738_v2  ;;  %vm8749_vm13 = vcmask 318464  }
 0x29a   : > { %v2100_v31 = vpop.permute.xlu1 %2099 }
 0x29b   : > { %v1874_v8 = vpop.permute.xlu0 %1873  ;;  %v2546_v10 = vsel %vm2528_vm8, %v2521_v63, %v2100_v31  ;;  %v8740_v31 = vld [vmem:[#allocation36_spill] sm:$0xff] }
 0x29c   : > { %v2498_v33 = vsel %vm8734_vm4, %v2473_v0, %v1874_v8  ;;  %v2275_v8 = vsel %vm8741_vm3, %v2250_v47, %v8740_v31  ;;  %vm8745_vm4 = vcmask 146432   ;;  %vm8751_vm3 = vcmask 48128   ;;  %v8754_v0 = vld [vmem:[#allocation47_spill] sm:$0xff] }
 0x29e   : > { %v2030_v39 = vpop.permute.xlu1 %2029 }
 0x29f   : > { %v1348_v52 = vpop.permute.xlu0 %1347  ;;  %v2523_v12 = vsel %vm8735_vm5, %v2498_v33, %v2030_v39  ;;  %vm8746_vm5 = vcmask 269312  }
 0x2a2   : > { %v1504_v37 = vpop.permute.xlu1 %1503 }
 0x2a3   : > { %v2184_v36 = vpop.permute.xlu0 %2183 }
 0x2a4   : > { %v2571_v6 = vsel %vm2553_vm9, %v2546_v10, %v2184_v36 }
 0x2a6   : > { %v3879_v59 = vpop.permute.xlu1 %3878 }
 0x2a7   : > { %v3904_v5 = vsel %vm8733_vm1, %v2571_v6, %v3879_v59  ;;  %v2102_v23 = vpop.permute.xlu0 %2101  ;;  %vm8743_vm1 = vcmask 97280  }
 0x2a8   : > { %v4058_v1 = vrot.slane %v3904_v5, %v7459_v57  ;;  %v4051_v25 = vcombine.high %v3904_v5, %v3904_v5  ;;  %v2548_v14 = vsel %vm2528_vm8, %v2523_v12, %v2102_v23  ;;  %v2300_v39 = vsel %vm8743_vm1, %v2275_v8, %v8742_v45 }
 0x2a9   : > { %v2325_v32 = vsel %vm8744_vm2, %v2300_v39, %v8154_v61  ;;  %vm8753_vm1 = vcmask 72704   ;;  %vm8755_vm2 = vcmask 97280  }
 0x2aa   : > { %v2186_v7 = vpop.permute.xlu1 %2185  ;;  %v4066_v50 = vcombine.high %v4058_v1, %v4058_v1  ;;  %v4065_v46 = vrot.slane %v4051_v25, %v7459_v57  ;;  %v2350_v58 = vsel %vm8745_vm4, %v2325_v32, %v8156_v19  ;;  %vm8757_vm4 = vcmask 121856  }
 0x2ab   : > { %v1576_v15 = vpop.permute.xlu0 %1575  ;;  %v2573_v13 = vsel %vm2553_vm9, %v2548_v14, %v2186_v7  ;;  %v2375_v56 = vsel %vm2353_vm6, %v2350_v58, %v1348_v52 }
 0x2ac   : > { %v4227_v28 = vcombine.low %v4058_v1, %v4066_v50  ;;  %v2400_v35 = vsel %vm2378_vm7, %v2375_v56, %v1504_v37  ;;  %v2227_v37 = vsel %vm2191_vm0, %v5075_v29, %v8748_v41  ;;  %vm8756_vm0 = vcmask 392192  }
 0x2ad   : > { %v2425_v4 = vsel %vm2403_vm11, %v2400_v35, %v1576_v15  ;;  %v2252_v6 = vsel %vm8751_vm3, %v2227_v37, %v8750_v26 }
 0x2ae   : > { %v3881_v53 = vpop.permute.xlu1 %3880  ;;  %v4235_v17 = vrot.slane %v4227_v28, %v7459_v57  ;;  %v2277_v5 = vsel %vm8753_vm1, %v2252_v6, %v8752_v21 }
 0x2af   : > { %v3906_v60 = vsel %vm8736_vm15, %v2573_v13, %v3881_v53  ;;  %v1660_v49 = vpop.permute.xlu0 %1659  ;;  %vm8747_vm15 = vcmask 293888   ;;  %v2302_v7 = vsel %vm8755_vm2, %v2277_v5, %v8754_v0 }
 0x2b0   : > { %v4074_v9 = vrot.slane %v3906_v60, %v7459_v57  ;;  %v2450_v61 = vsel %vm2428_vm12, %v2425_v4, %v1660_v49  ;;  %v4067_v36 = vcombine.high %v3906_v60, %v3906_v60 }
 0x2b2   : > { %v4228_v3 = vcombine.low %v4065_v46, %v4074_v9  ;;  %v1876_v43 = vpop.permute.xlu1 %1875  ;;  %v4081_v23 = vrot.slane %v4067_v36, %v7459_v57  ;;  %v4082_v18 = vcombine.high %v4074_v9, %v4074_v9 }
 0x2b3   : > { %v1804_v44 = vpop.permute.xlu0 %1803 }
 0x2b4   : > { %v4242_v62 = vrot.slane %v4228_v3, %v7459_v57  ;;  %v2475_v19 = vsel %vm8746_vm5, %v2450_v61, %v1804_v44  ;;  %vm8758_vm5 = vcmask 146432   ;;  %v4244_v50 = vcombine.low %v4082_v18, %v4081_v23 }
 0x2b5   : > { %v2500_v16 = vsel %vm8747_vm15, %v2475_v19, %v1876_v43  ;;  %vm8759_vm15 = vcmask 269312  }
 0x2b6   : > { %v2032_v38 = vpop.permute.xlu1 %2031  ;;  %v4243_v11 = vcombine.low %v4235_v17, %v4242_v62  ;;  %v4252_v46 = vrot.slane %v4244_v50, %v7459_v57 }
 0x2b7   : > { %v1134_v24 = vpop.permute.xlu0 %1133  ;;  %v2525_v10 = vsel %vm8749_vm13, %v2500_v16, %v2032_v38 }
 0x2b8   : > { %5468 = vmatmul.mubr.msk.bf16.gmra.mrb[4].mxu1 %vm4307_vm10, %v4243_v11  ;;  %v2327_v15 = vsel %vm8757_vm4, %v2302_v7, %v1134_v24 }
 0x2b9   : > { %5471 = vmatprep.mubr.msk.bf16.mxu1 %vm8639_vm14, %v8638_v54 }
 0x2ba   : > { %v2104_v42 = vpop.permute.xlu1 %2103 }
 0x2bb   : > { %v1278_v20 = vpop.permute.xlu0 %1277  ;;  %v2550_v59 = vsel %vm2528_vm8, %v2525_v10, %v2104_v42 }
 0x2bc   : > { %v2352_v25 = vsel %vm8758_vm5, %v2327_v15, %v1278_v20 }
 0x2be   : > { %v2188_v52 = vpop.permute.xlu1 %2187 }
 0x2bf   : > { %v1350_v63 = vpop.permute.xlu0 %1349  ;;  %v2575_v1 = vsel %vm2553_vm9, %v2550_v59, %v2188_v52 }
 0x2c0   : > { %v2377_v14 = vsel %vm2353_vm6, %v2352_v25, %v1350_v63  ;;  %vm8760_vm6 = vcmask 293888  }
 0x2c2   : > { %v3883_v51 = vpop.permute.xlu1 %3882 }
 0x2c3   : > { %v3908_v22 = vsel %vm8756_vm0, %v2575_v1, %v3883_v51  ;;  %v1506_v33 = vpop.permute.xlu0 %1505 }
 0x2c4   : > { %v4090_v12 = vrot.slane %v3908_v22, %v7459_v57  ;;  %v2402_v13 = vsel %vm2378_vm7, %v2377_v14, %v1506_v33  ;;  %vm8761_vm7 = vmmov %vm8749_vm13  ;;  %v4083_v45 = vcombine.high %v3908_v22, %v3908_v22 }
 0x2c6   : > { %v4098_v34 = vcombine.high %v4090_v12, %v4090_v12  ;;  %v1662_v27 = vpop.permute.xlu1 %1661  ;;  %v4097_v42 = vrot.slane %v4083_v45, %v7459_v57 }
 0x2c7   : > { %v1578_v53 = vpop.permute.xlu0 %1577 }
 0x2c8   : > { %v4245_v60 = vcombine.low %v4090_v12, %v4098_v34  ;;  %v2427_v49 = vsel %vm2403_vm11, %v2402_v13, %v1578_v53  ;;  %vm4519_vm11 = vcmask 257024  }
 0x2c9   : > { %v2452_v48 = vsel %vm2428_vm12, %v2427_v49, %v1662_v27  ;;  %vm4538_vm12 = vcmask 261120  }
 0x2ca   : > { %v4259_v28 = vrot.slane %v4245_v60, %v7459_v57  ;;  %v1878_v9 = vpop.permute.xlu1 %1877 }
 0x2cb   : > { %v1806_v55 = vpop.permute.xlu0 %1805 }
 0x2cc   : > { %v2477_v3 = vsel %vm8759_vm15, %v2452_v48, %v1806_v55  ;;  %v4260_v43 = vcombine.low %v4252_v46, %v4259_v28 }
 0x2cd   : > { %v2502_v47 = vsel %vm8760_vm6, %v2477_v3, %v1878_v9 }
 0x2ce   : > { %v2106_v2 = vpop.permute.xlu1 %2105  ;;  %5472 = vmatmul.mubr.msk.bf16.gmra.mrb[8].mxu1 %vm4307_vm10, %v4260_v43 }
 0x2cf   : > { %v2034_v44 = vpop.permute.xlu0 %2033  ;;  %5475 = vmatprep.mubr.msk.bf16.mxu1 %vm8639_vm14, %v8638_v54  ;;  %vm8762_vm14 = vmmov %vm8756_vm0 }
 0x2d0   : > { %v2527_v31 = vsel %vm8761_vm7, %v2502_v47, %v2034_v44  ;;  %v8263_v8 = vpop.f32.mrb[0].mxu0 }
 0x2d1   : > { %v5401_v17 = vpack.c.bf16 %v8263_v8, %v8263_v8  ;;  %v5445_v62 = vpop.f32.mrb[1].mxu0  ;;  %v4539_v32 = vsel %vm4538_vm12, %v8263_v8, 0.0  ;;  %v2552_v58 = vsel %vm2528_vm8, %v2527_v31, %v2106_v2  ;;  %vm4660_vm8 = vcmask 254976  }
 0x2d2   : > { %v8267_v39 = vpop.f32.mrb[2].mxu0  ;;  %v3885_v54 = vpop.permute.xlu1 %3884 }
 0x2d3   : > { %4520 = vst.msk [vmem:[%s8261_s8] sm:$0xf] %vm4519_vm11, %v5401_v17  ;;  %v5402_v38 = vpack.c.bf16 %v8267_v39, %v8267_v39  ;;  %v4540_v11 = vsel %vm4538_vm12, %v8267_v39, 0.0  ;;  %v2190_v24 = vpop.permute.xlu0 %2189  ;;  %v5446_v56 = vpop.f32.mrb[3].mxu0 }
 0x2d4   : > { %v4541_v30 = vadd.f32 %v4540_v11, %v4539_v32  ;;  %v2577_v35 = vsel %vm2553_vm9, %v2552_v58, %v2190_v24 }
 0x2d5   : > { %4521 = vst.msk [vmem:[%s8261_s8 + $0x4] sm:$0xf] %vm4519_vm11, %v5402_v38  ;;  %v3910_v4 = vsel %vm8762_vm14, %v2577_v35, %v3885_v54 }
 0x2d6   : > { %v4099_v61 = vcombine.high %v3910_v4, %v3910_v4  ;;  %v4106_v20 = vrot.slane %v3910_v4, %v7459_v57 }
 0x2d8   : > { %v4113_v40 = vrot.slane %v4099_v61, %v7459_v57  ;;  %v4114_v29 = vcombine.high %v4106_v20, %v4106_v20  ;;  %v4261_v19 = vcombine.low %v4097_v42, %v4106_v20 }
 0x2da   : > { %v4262_v36 = vcombine.low %v4114_v29, %v4113_v40  ;;  %v4269_v52 = vrot.slane %v4261_v19, %v7459_v57 }
 0x2dc   : > { %v4276_v16 = vrot.slane %v4262_v36, %v7459_v57 }
 0x2de   : > { %v4277_v63 = vcombine.low %v4269_v52, %v4276_v16 }
 0x2e0   : > { %5476 = vmatmul.mubr.msk.bf16.gmra.mrb[12].mxu1 %vm4307_vm10, %v4277_v63  ;;  %vm4658_vm10 = vcmask 1040384  }
 0x2e1   : > { %v8288_v41 = vpop.f32.mrb[4].mxu0 }
 0x2e2   : > { %v5403_v37 = vpack.c.bf16 %v8288_v41, %v8288_v41  ;;  %v4542_v10 = vsel %vm4538_vm12, %v8288_v41, 0.0  ;;  %v5449_v26 = vpop.f32.mrb[5].mxu0 }
 0x2e3   : > { %v4543_v6 = vadd.f32 %v4542_v10, %v4541_v30  ;;  %v8294_v59 = vpop.f32.mrb[6].mxu0 }
 0x2e4   : > { %4522 = vst.msk [vmem:[%s8261_s8 + $0x8] sm:$0xf] %vm4519_vm11, %v5403_v37  ;;  %v5404_v57 = vpack.c.bf16 %v8294_v59, %v8294_v59  ;;  %v4544_v21 = vsel %vm4538_vm12, %v8294_v59, 0.0  ;;  %v5450_v5 = vpop.f32.mrb[7].mxu0 }
 0x2e5   : > { %v4545_v23 = vadd.f32 %v4544_v21, %v4543_v6 }
 0x2e6   : > { %4523 = vst.msk [vmem:[%s8261_s8 + $0xc] sm:$0xf] %vm4519_vm11, %v5404_v57 }
 0x30d   : > { %v8304_v18 = vpop.f32.mrb[8].mxu0 }
 0x30e   : > { %v5405_v1 = vpack.c.bf16 %v8304_v18, %v8304_v18  ;;  %v4546_v51 = vsel %vm4538_vm12, %v8304_v18, 0.0  ;;  %v5453_v0 = vpop.f32.mrb[9].mxu0 }
 0x30f   : > { %v4547_v7 = vadd.f32 %v4546_v51, %v4545_v23  ;;  %v8310_v22 = vpop.f32.mrb[10].mxu0 }
 0x310   : > { %4524 = vst.msk [vmem:[%s8261_s8 + $0x10] sm:$0xf] %vm4519_vm11, %v5405_v1  ;;  %v5406_v33 = vpack.c.bf16 %v8310_v22, %v8310_v22  ;;  %v4548_v15 = vsel %vm4538_vm12, %v8310_v22, 0.0  ;;  %v5454_v12 = vpop.f32.mrb[11].mxu0 }
 0x311   : > { %v4549_v25 = vadd.f32 %v4548_v15, %v4547_v7 }
 0x312   : > { %4525 = vst.msk [vmem:[%s8261_s8 + $0x14] sm:$0xf] %vm4519_vm11, %v5406_v33 }
 0x35a   : > { %v8320_v50 = vpop.f32.mrb[0].mxu1 }
 0x35b   : > { %v5411_v14 = vpack.c.bf16 %v8320_v50, %v8320_v50  ;;  %v5465_v34 = vpop.f32.mrb[1].mxu1  ;;  %v4558_v58 = vsel %vm4538_vm12, %v8320_v50, 0.0 }
 0x35c   : > { %v8324_v27 = vpop.f32.mrb[2].mxu1 }
 0x35d   : > { %4530 = vst.msk [vmem:[%s8261_s8 + $0x28] sm:$0xf] %vm4519_vm11, %v5411_v14  ;;  %v5412_v13 = vpack.c.bf16 %v8324_v27, %v8324_v27  ;;  %v5466_v53 = vpop.f32.mrb[3].mxu1  ;;  %v4560_v56 = vsel %vm4538_vm12, %v8324_v27, 0.0 }
 0x35f   : > { %4531 = vst.msk [vmem:[%s8261_s8 + $0x2c] sm:$0xf] %vm4519_vm11, %v5412_v13 }
 0x363   : > { %v8332_v60 = vpop.f32.mrb[12].mxu0 }
 0x364   : > { %v5407_v49 = vpack.c.bf16 %v8332_v60, %v8332_v60  ;;  %v4550_v46 = vsel %vm4538_vm12, %v8332_v60, 0.0  ;;  %v5457_v28 = vpop.f32.mrb[13].mxu0 }
 0x365   : > { %v4551_v9 = vadd.f32 %v4550_v46, %v4549_v25  ;;  %v8338_v48 = vpop.f32.mrb[14].mxu0 }
 0x366   : > { %4526 = vst.msk [vmem:[%s8261_s8 + $0x18] sm:$0xf] %vm4519_vm11, %v5407_v49  ;;  %v5408_v55 = vpack.c.bf16 %v8338_v48, %v8338_v48  ;;  %v4552_v3 = vsel %vm4538_vm12, %v8338_v48, 0.0  ;;  %v5458_v43 = vpop.f32.mrb[15].mxu0 }
 0x367   : > { %v4553_v2 = vadd.f32 %v4552_v3, %v4551_v9 }
 0x368   : > { %4527 = vst.msk [vmem:[%s8261_s8 + $0x1c] sm:$0xf] %vm4519_vm11, %v5408_v55 }
 0x36b   : > { %v8348_v47 = vpop.f32.mrb[16].mxu0 }
 0x36c   : > { %v5409_v44 = vpack.c.bf16 %v8348_v47, %v8348_v47  ;;  %v4554_v31 = vsel %vm4538_vm12, %v8348_v47, 0.0  ;;  %v5461_v17 = vpop.f32.mrb[17].mxu0 }
 0x36d   : > { %v4555_v62 = vadd.f32 %v4554_v31, %v4553_v2  ;;  %v8354_v45 = vpop.f32.mrb[18].mxu0 }
 0x36e   : > { %4528 = vst.msk [vmem:[%s8261_s8 + $0x20] sm:$0xf] %vm4519_vm11, %v5409_v44  ;;  %v5410_v54 = vpack.c.bf16 %v8354_v45, %v8354_v45  ;;  %v4556_v32 = vsel %vm4538_vm12, %v8354_v45, 0.0  ;;  %v5462_v38 = vpop.f32.mrb[19].mxu0 }
 0x36f   : > { %v4557_v11 = vadd.f32 %v4556_v32, %v4555_v62 }
 0x370   : > { %4529 = vst.msk [vmem:[%s8261_s8 + $0x24] sm:$0xf] %vm4519_vm11, %v5410_v54 }
 0x371   : > { %v4559_v24 = vadd.f32 %v4558_v58, %v4557_v11 }
 0x373   : > { %v4561_v30 = vadd.f32 %v4560_v56, %v4559_v24 }
 0x38b   : > { %v4424_v35 = vpop.f32.mrb[4].mxu1 }
 0x38c   : > { %v5413_v4 = vpack.c.bf16 %v4424_v35, %v4424_v35  ;;  %v4562_v42 = vsel %vm4538_vm12, %v4424_v35, 0.0  ;;  %v5469_v61 = vpop.f32.mrb[5].mxu1 }
 0x38d   : > { %v4563_v20 = vadd.f32 %v4562_v42, %v4561_v30  ;;  %v4427_v40 = vpop.f32.mrb[6].mxu1 }
 0x38e   : > { %4532 = vst.msk [vmem:[%s8261_s8 + $0x30] sm:$0xf] %vm4519_vm11, %v5413_v4  ;;  %v5414_v29 = vpack.c.bf16 %v4427_v40, %v4427_v40  ;;  %v4564_v19 = vsel %vm4538_vm12, %v4427_v40, 0.0  ;;  %v5470_v36 = vpop.f32.mrb[7].mxu1 }
 0x38f   : > { %v4565_v52 = vadd.f32 %v4564_v19, %v4563_v20 }
 0x390   : > { %4533 = vst.msk [vmem:[%s8261_s8 + $0x34] sm:$0xf] %vm4519_vm11, %v5414_v29 }
 0x3a1   : > { %v4432_v16 = vpop.f32.mrb[8].mxu1 }
 0x3a2   : > { %v5415_v63 = vpack.c.bf16 %v4432_v16, %v4432_v16  ;;  %v4566_v37 = vsel %vm4538_vm12, %v4432_v16, 0.0  ;;  %v5473_v10 = vpop.f32.mrb[9].mxu1 }
 0x3a3   : > { %v4567_v26 = vadd.f32 %v4566_v37, %v4565_v52  ;;  %v4435_v6 = vpop.f32.mrb[10].mxu1 }
 0x3a4   : > { %4534 = vst.msk [vmem:[%s8261_s8 + $0x38] sm:$0xf] %vm4519_vm11, %v5415_v63  ;;  %v5416_v57 = vpack.c.bf16 %v4435_v6, %v4435_v6  ;;  %v4568_v21 = vsel %vm4538_vm12, %v4435_v6, 0.0  ;;  %v5474_v5 = vpop.f32.mrb[11].mxu1 }
 0x3a5   : > { %v4569_v23 = vadd.f32 %v4568_v21, %v4567_v26 }
 0x3a6   : > { %4535 = vst.msk [vmem:[%s8261_s8 + $0x3c] sm:$0xf] %vm4519_vm11, %v5416_v57 }
 0x3b3   : > { %v4440_v1 = vpop.f32.mrb[12].mxu1 }
 0x3b4   : > { %v5417_v51 = vpack.c.bf16 %v4440_v1, %v4440_v1  ;;  %v4570_v0 = vsel %vm4538_vm12, %v4440_v1, 0.0  ;;  %v5477_v7 = vpop.f32.mrb[13].mxu1 }
 0x3b5   : > { %v4571_v33 = vadd.f32 %v4570_v0, %v4569_v23  ;;  %v4443_v15 = vpop.f32.mrb[14].mxu1 }
 0x3b6   : > { %4536 = vst.msk [vmem:[%s8261_s8 + $0x40] sm:$0xf] %vm4519_vm11, %v5417_v51  ;;  %v5418_v12 = vpack.c.bf16 %v4443_v15, %v4443_v15  ;;  %v4572_v25 = vsel %vm4538_vm12, %v4443_v15, 0.0  ;;  %v5478_v14 = vpop.f32.mrb[15].mxu1 }
 0x3b7   : > { %v4573_v34 = vadd.f32 %v4572_v25, %v4571_v33 }
 0x3b8   : > { %4537 = vst.msk [vmem:[%s8261_s8 + $0x44] sm:$0xf] %vm4519_vm11, %v5418_v12 }
 0x3b9   : > { %v4574_v13 = vrot.slane %v4573_v34, 4 }
 0x3bb   : > { %v4575_v53 = vadd.f32 %v4574_v13, %v4573_v34 }
 0x3bd   : > { %v4576_v49 = vrot.slane %v4575_v53, 2 }
 0x3bf   : > { %v4577_v46 = vadd.f32 %v4576_v49, %v4575_v53 }
 0x3c1   : > { %v4578_v28 = vrot.slane %v4577_v46, 1 }
 0x3c3   : > { %v4579_v9 = vadd.f32 %v4578_v28, %v4577_v46 }
 0x3c5   : > { %v8386_v55 = vmul.f32 0.0069444445, %v4579_v9 }
 0x3c7   : > { %v4581_v3 = vsub.f32 %v8263_v8, %v8386_v55  ;;  %v4582_v43 = vsub.f32 %v8267_v39, %v8386_v55  ;;  %v4583_v2 = vsub.f32 %v8288_v41, %v8386_v55  ;;  %v4584_v44 = vsub.f32 %v8294_v59, %v8386_v55 }
 0x3c8   : > { %v4585_v31 = vsub.f32 %v8304_v18, %v8386_v55  ;;  %v4586_v17 = vsub.f32 %v8310_v22, %v8386_v55  ;;  %v4587_v62 = vsub.f32 %v8332_v60, %v8386_v55  ;;  %v4588_v8 = vsub.f32 %v8338_v48, %v8386_v55 }
 0x3c9   : > { %v4589_v39 = vsub.f32 %v8348_v47, %v8386_v55  ;;  %v4590_v41 = vsub.f32 %v8354_v45, %v8386_v55  ;;  %v4591_v59 = vsub.f32 %v8320_v50, %v8386_v55  ;;  %v4592_v18 = vsub.f32 %v8324_v27, %v8386_v55 }
 0x3ca   : > { %v4593_v22 = vsub.f32 %v4424_v35, %v8386_v55  ;;  %v4594_v54 = vsub.f32 %v4427_v40, %v8386_v55  ;;  %v4595_v60 = vsub.f32 %v4432_v16, %v8386_v55  ;;  %v4596_v48 = vsub.f32 %v4435_v6, %v8386_v55 }
 0x3cb   : > { %v4597_v32 = vsub.f32 %v4440_v1, %v8386_v55  ;;  %v4598_v47 = vsub.f32 %v4443_v15, %v8386_v55  ;;  %v4599_v38 = vmul.f32 %v4581_v3, %v4581_v3  ;;  %v4600_v45 = vmul.f32 %v4582_v43, %v4582_v43 }
 0x3cc   : > { %v4601_v11 = vmul.f32 %v4583_v2, %v4583_v2  ;;  %v4602_v58 = vmul.f32 %v4584_v44, %v4584_v44  ;;  %v4603_v56 = vmul.f32 %v4585_v31, %v4585_v31  ;;  %v4604_v4 = vmul.f32 %v4586_v17, %v4586_v17 }
 0x3cd   : > { %v4617_v50 = vsel %vm4538_vm12, %v4599_v38, 0.0  ;;  %v4618_v27 = vsel %vm4538_vm12, %v4600_v45, 0.0  ;;  %v4605_v20 = vmul.f32 %v4587_v62, %v4587_v62  ;;  %v4606_v19 = vmul.f32 %v4588_v8, %v4588_v8 }
 0x3ce   : > { %v4619_v24 = vadd.f32 %v4618_v27, %v4617_v50  ;;  %v4620_v30 = vsel %vm4538_vm12, %v4601_v11, 0.0  ;;  %v4622_v42 = vsel %vm4538_vm12, %v4602_v58, 0.0  ;;  %v4624_v40 = vsel %vm4538_vm12, %v4603_v56, 0.0 }
 0x3cf   : > { %v4626_v36 = vsel %vm4538_vm12, %v4604_v4, 0.0  ;;  %v4607_v16 = vmul.f32 %v4589_v39, %v4589_v39  ;;  %v4628_v63 = vsel %vm4538_vm12, %v4605_v20, 0.0  ;;  %v4608_v10 = vmul.f32 %v4590_v41, %v4590_v41 }
 0x3d0   : > { %v4621_v35 = vadd.f32 %v4620_v30, %v4619_v24  ;;  %v4630_v26 = vsel %vm4538_vm12, %v4606_v19, 0.0  ;;  %v4609_v57 = vmul.f32 %v4591_v59, %v4591_v59  ;;  %v4610_v23 = vmul.f32 %v4592_v18, %v4592_v18 }
 0x3d1   : > { %v4632_v21 = vsel %vm4538_vm12, %v4607_v16, 0.0  ;;  %v4634_v1 = vsel %vm4538_vm12, %v4608_v10, 0.0  ;;  %v4611_v0 = vmul.f32 %v4593_v22, %v4593_v22  ;;  %v4612_v15 = vmul.f32 %v4594_v54, %v4594_v54 }
 0x3d2   : > { %v4623_v61 = vadd.f32 %v4622_v42, %v4621_v35  ;;  %v4636_v7 = vsel %vm4538_vm12, %v4609_v57, 0.0  ;;  %v4638_v12 = vsel %vm4538_vm12, %v4610_v23, 0.0  ;;  %v4613_v14 = vmul.f32 %v4595_v60, %v4595_v60 }
 0x3d3   : > { %v4640_v34 = vsel %vm4538_vm12, %v4611_v0, 0.0  ;;  %v4614_v53 = vmul.f32 %v4596_v48, %v4596_v48  ;;  %v4642_v49 = vsel %vm4538_vm12, %v4612_v15, 0.0  ;;  %v4615_v28 = vmul.f32 %v4597_v32, %v4597_v32 }
 0x3d4   : > { %v4625_v29 = vadd.f32 %v4624_v40, %v4623_v61  ;;  %v4644_v9 = vsel %vm4538_vm12, %v4613_v14, 0.0  ;;  %v4616_v43 = vmul.f32 %v4598_v47, %v4598_v47 }
 0x3d5   : > { %v4646_v2 = vsel %vm4538_vm12, %v4614_v53, 0.0  ;;  %v4648_v31 = vsel %vm4538_vm12, %v4615_v28, 0.0 }
 0x3d6   : > { %v4627_v52 = vadd.f32 %v4626_v36, %v4625_v29  ;;  %v4650_v62 = vsel %vm4538_vm12, %v4616_v43, 0.0 }
 0x3d8   : > { %v4629_v37 = vadd.f32 %v4628_v63, %v4627_v52 }
 0x3da   : > { %v4631_v6 = vadd.f32 %v4630_v26, %v4629_v37 }
 0x3dc   : > { %v4633_v5 = vadd.f32 %v4632_v21, %v4631_v6 }
 0x3de   : > { %v4635_v51 = vadd.f32 %v4634_v1, %v4633_v5 }
 0x3e0   : > { %v4637_v33 = vadd.f32 %v4636_v7, %v4635_v51 }
 0x3e2   : > { %v4639_v25 = vadd.f32 %v4638_v12, %v4637_v33 }
 0x3e4   : > { %v4641_v13 = vadd.f32 %v4640_v34, %v4639_v25 }
 0x3e6   : > { %v4643_v46 = vadd.f32 %v4642_v49, %v4641_v13 }
 0x3e8   : > { %v4645_v3 = vadd.f32 %v4644_v9, %v4643_v46 }
 0x3ea   : > { %v4647_v44 = vadd.f32 %v4646_v2, %v4645_v3 }
 0x3ec   : > { %v4649_v17 = vadd.f32 %v4648_v31, %v4647_v44 }
 0x3ee   : > { %v4651_v8 = vadd.f32 %v4650_v62, %v4649_v17 }
 0x3f0   : > { %v4652_v39 = vrot.slane %v4651_v8, 4 }
 0x3f2   : > { %v4653_v41 = vadd.f32 %v4652_v39, %v4651_v8 }
 0x3f4   : > { %v4654_v59 = vrot.slane %v4653_v41, 2 }
 0x3f6   : > { %v4655_v18 = vadd.f32 %v4654_v59, %v4653_v41 }
 0x3f8   : > { %v4656_v22 = vrot.slane %v4655_v18, 1 }
 0x3fa   : > { %v4657_v54 = vadd.f32 %v4656_v22, %v4655_v18 }
 0x3fc   : > { %v4659_v60 = vsel %vm4658_vm10, %v8386_v55, %v4657_v54 }
 0x3fd   : > { %4661 = vst.msk [vmem:[%s171_s11] sm:$0x3] %vm4660_vm8, %v4659_v60 }
 0x3fe   : > { %5895 = shalt.err (!%p5892_p3)
}
 0x3ff   : > { %s5896_s5 = scalar_lea.hbm %s8441_s30, 32  ;;  %s5900_s6 = scalar_lea.hbm %s8487_s3, 64 }
 0x400   : > { %p5897_p4 = scmp.ne.s32.totalorder %s8441_s30, %s5896_s5  ;;  %p5901_p9 = scmp.lt.u32.totalorder %s8441_s30, %s8487_s3 }
 0x401   : > { %p5902_p10 = scmp.lt.u32.totalorder %s5900_s6, %s5896_s5  ;;  %p5904_p12 = scmp.lt.u32.totalorder %s5896_s5, %s8441_s30 }
 0x402   : > { %p5898_p7 = pnand %p5897_p4, %p6025_p5 }
 0x403   : > { %p5903_p11 = por %p5902_p10, %p5901_p9 }
 0x404   : > { %p5899_p8 = pneg %p5898_p7 }
 0x405   : > { %p5905_p13 = por %p5904_p12, %p5903_p11 }
 0x407   : > { %p5906_p0 = pnand %p5905_p13, %p5899_p8 }
 0x409   : > { %5909 = shalt.err (!%p5906_p0)
}
 0x40a   : > { %5490 = dma.vmem_to_hbm [thread:$0]  (%p6025_p5), %s8443_s17, 32, %s8441_s30, %s4668_s4  }
 0x40b PF: > { %p5496_p1 = scmp.ge.s32.totalorder %s5944_s15, 2  ;;  %s4704_s24 = sand.u32 1, %s5932_s12  }
 0x40c   : > { %s4705_s9 = scalar_lea.sflag [#allocation3], %s4704_s24 }
 0x40d   : > { %p5493_p2 = pnand %p5496_p1, %p6029_p6 }
 0x40f   : > { %5927 = dma.done.wait (!%p5493_p2), %s4705_s9, 32  }
 0x410   : > { %5929 = vsyncadd (!%p5493_p2), %s4705_s9, 4294967264  ;;  %p14_p3 = scmp.ge.s32.totalorder %s6012_s18, 4   ;;  %s8763_s12 = smov %s5936_s13 }
 0x411   : > { %s8764_s13 = smov %s5940_s14  ;;  %s8765_s14 = smov %s6023_s21 }
 0x412   : > { %s8766_s15 = smov %s6012_s18  ;;  %16 = sbr.rel (!%p14_p3) target bundleno = 3 (0x3), region = 79 }
 0x419   :  { %4710 = vsyncpa [#allocation3], 1 }
 0x41a   :  { %4712 = vsyncpa [#allocation3 + $0x1], 1 }

</bundles_post_ra>
